<compile_context>
chip_gen: v7x
topology: tpu7x:2x2x1
jax: 0.10.0
libtpu: 0.0.40
codegen_flags: <defaults>
</compile_context>

<pallas_src>
import functools

import jax
import jax.numpy as jnp
from jax.experimental import pallas as pl
from jax.experimental.pallas import tpu as pltpu

ACT_DTYPE = jnp.bfloat16          # residual-stream / MXU-input dtype
W_DTYPE = jnp.bfloat16            # frozen weight dtype
VMEM_LIMIT = 32 * 1024 * 1024     # explicit scoped-VMEM budget (tiles sized well under it)


# ---------------------------- tiling helper ----------------------------

def _pick_tile(dim, desired, align):
    """Largest tile <= desired that is a multiple of `align` and evenly divides `dim`.
    Falls back to the full dimension (a full-extent block is always legal).
    NOTE: at real CLIP sizes pad M=B*T to a multiple of 256 so a large M tile exists."""
    if dim <= desired:
        return dim
    t = (desired // align) * align
    while t >= align:
        if dim % t == 0:
            return t
        t -= align
    return dim


# ---------------------------- Pallas kernels ----------------------------

def _linear_kernel(*refs, quick_gelu, has_residual):
    """K-tiled x @ W + b with f32 accumulator; optional QuickGELU and fused residual."""
    if has_residual:
        x_ref, w_ref, b_ref, r_ref, o_ref, acc_ref = refs
    else:
        x_ref, w_ref, b_ref, o_ref, acc_ref = refs

    k = pl.program_id(2)

    @pl.when(k == 0)
    def _init():
        acc_ref[...] = jnp.zeros_like(acc_ref)

    acc_ref[...] += jnp.dot(x_ref[...], w_ref[...],
                            preferred_element_type=jnp.float32)

    @pl.when(k == pl.num_programs(2) - 1)
    def _finalize():
        acc = acc_ref[...] + b_ref[...].astype(jnp.float32)
        if quick_gelu:
            acc = acc * jax.nn.sigmoid(1.702 * acc)          # CLIP QuickGELU
        if has_residual:
            acc = acc + r_ref[...].astype(jnp.float32)
        o_ref[...] = acc.astype(o_ref.dtype)


def _ln_linear_kernel(x_ref, g_ref, bta_ref, w_ref, b_ref, o_ref, *, eps, quick_gelu):
    """Fused LayerNorm(x) @ W + b (K kept whole so LN stats see the full row)."""
    x = x_ref[...].astype(jnp.float32)                        # (tm, K)
    mu = jnp.mean(x, axis=-1, keepdims=True)
    var = jnp.mean(jnp.square(x - mu), axis=-1, keepdims=True)
    xn = (x - mu) * jax.lax.rsqrt(var + eps)
    xn = xn * g_ref[...].astype(jnp.float32) + bta_ref[...].astype(jnp.float32)
    acc = jnp.dot(xn.astype(w_ref.dtype), w_ref[...],
                  preferred_element_type=jnp.float32)
    acc = acc + b_ref[...].astype(jnp.float32)
    if quick_gelu:
        acc = acc * jax.nn.sigmoid(1.702 * acc)
    o_ref[...] = acc.astype(o_ref.dtype)


def _layernorm_kernel(x_ref, g_ref, b_ref, o_ref, *, eps):
    x = x_ref[...].astype(jnp.float32)
    mu = jnp.mean(x, axis=-1, keepdims=True)
    var = jnp.mean(jnp.square(x - mu), axis=-1, keepdims=True)
    y = (x - mu) * jax.lax.rsqrt(var + eps)
    o_ref[...] = (y * g_ref[...].astype(jnp.float32)
                  + b_ref[...].astype(jnp.float32)).astype(o_ref.dtype)


def _attention_kernel(qkv_ref, o_ref, *, heads, scale):
    """Per-batch multi-head attention on packed QKV [T, 3*width]; all heads in one
    grid step so the HBM output store is lane-dense (full width)."""
    qkv = qkv_ref[0].astype(jnp.float32)                      # (T, 3*W)
    w3 = qkv.shape[-1]
    w = w3 // 3
    dh = w // heads
    outs = []
    for h in range(heads):                                    # static unroll over heads
        q = qkv[:, h * dh:(h + 1) * dh]                       # (T, Dh)
        k = qkv[:, w + h * dh: w + (h + 1) * dh]
        v = qkv[:, 2 * w + h * dh: 2 * w + (h + 1) * dh]
        s = jax.lax.dot_general(q, k, (((1,), (1,)), ((), ())),
                                preferred_element_type=jnp.float32) * scale
        s = s - jnp.max(s, axis=-1, keepdims=True)
        p = jnp.exp(s)                                        # f32 softmax
        p = p * pl.reciprocal(jnp.sum(p, axis=-1, keepdims=True), approx=True)
        outs.append(jnp.dot(p, v, preferred_element_type=jnp.float32))
    o_ref[0] = jnp.concatenate(outs, axis=-1).astype(o_ref.dtype)


# ---------------------------- pallas_call wrappers ----------------------------

def pallas_linear(x, w, b, residual=None, quick_gelu=False,
                  tm=256, tn=256, tk=512, out_dtype=None):
    """Tiled y = x @ w + b [, QuickGELU][, + residual].  x:[M,K], w:[K,N] (pre-transposed)."""
    M, K = x.shape
    _, N = w.shape
    tm = _pick_tile(M, tm, 8)
    tn = _pick_tile(N, tn, 128)
    tk = _pick_tile(K, tk, 128)
    out_dtype = out_dtype or x.dtype
    has_residual = residual is not None

    in_specs = [
        pl.BlockSpec((tm, tk), lambda m, n, k: (m, k)),
        pl.BlockSpec((tk, tn), lambda m, n, k: (k, n)),
        pl.BlockSpec((1, tn), lambda m, n, k: (0, n)),
    ]
    args = [x, w, b.reshape(1, -1)]
    if has_residual:
        in_specs.append(pl.BlockSpec((tm, tn), lambda m, n, k: (m, n)))
        args.append(residual)

    return pl.pallas_call(
        functools.partial(_linear_kernel, quick_gelu=quick_gelu,
                          has_residual=has_residual),
        grid=(M // tm, N // tn, K // tk),
        in_specs=in_specs,
        out_specs=pl.BlockSpec((tm, tn), lambda m, n, k: (m, n)),
        out_shape=jax.ShapeDtypeStruct((M, N), out_dtype),
        scratch_shapes=[pltpu.VMEM((tm, tn), jnp.float32)],
        compiler_params=pltpu.CompilerParams(
            dimension_semantics=("parallel", "parallel", "arbitrary"),
            vmem_limit_bytes=VMEM_LIMIT),
    )(*args)


def pallas_ln_linear(x, gamma, beta, w, b, quick_gelu=False,
                     tm=256, tn=256, eps=1e-5, out_dtype=None):
    """Fused LayerNorm + linear.  K (=width) is kept whole inside the block so the LN
    reduction sees the full feature row; grid tiles M and N."""
    M, K = x.shape
    _, N = w.shape
    tm = _pick_tile(M, tm, 8)
    tn = _pick_tile(N, tn, 128)
    out_dtype = out_dtype or x.dtype

    return pl.pallas_call(
        functools.partial(_ln_linear_kernel, eps=eps, quick_gelu=quick_gelu),
        grid=(M // tm, N // tn),
        in_specs=[
            pl.BlockSpec((tm, K), lambda m, n: (m, 0)),   # x block stays resident across n
            pl.BlockSpec((1, K), lambda m, n: (0, 0)),
            pl.BlockSpec((1, K), lambda m, n: (0, 0)),
            pl.BlockSpec((K, tn), lambda m, n: (0, n)),
            pl.BlockSpec((1, tn), lambda m, n: (0, n)),
        ],
        out_specs=pl.BlockSpec((tm, tn), lambda m, n: (m, n)),
        out_shape=jax.ShapeDtypeStruct((M, N), out_dtype),
        compiler_params=pltpu.CompilerParams(
            dimension_semantics=("parallel", "parallel"),
            vmem_limit_bytes=VMEM_LIMIT),
    )(x, gamma.reshape(1, -1), beta.reshape(1, -1), w, b.reshape(1, -1))


def pallas_layernorm(x, gamma, beta, eps=1e-5, tm=256, out_dtype=None):
    """Standalone tiled LayerNorm (only used for ln_pre)."""
    M, K = x.shape
    tm = _pick_tile(M, tm, 8)
    out_dtype = out_dtype or x.dtype
    return pl.pallas_call(
        functools.partial(_layernorm_kernel, eps=eps),
        grid=(M // tm,),
        in_specs=[
            pl.BlockSpec((tm, K), lambda m: (m, 0)),
            pl.BlockSpec((1, K), lambda m: (0, 0)),
            pl.BlockSpec((1, K), lambda m: (0, 0)),
        ],
        out_specs=pl.BlockSpec((tm, K), lambda m: (m, 0)),
        out_shape=jax.ShapeDtypeStruct((M, K), out_dtype),
        compiler_params=pltpu.CompilerParams(
            dimension_semantics=("parallel",),
            vmem_limit_bytes=VMEM_LIMIT),
    )(x, gamma.reshape(1, -1), beta.reshape(1, -1))


def pallas_attention(qkv, heads, out_dtype):
    """qkv: [B, T, 3*width] packed projection -> attention output [B, T, width]."""
    B, T, W3 = qkv.shape
    W = W3 // 3
    scale = 1.0 / ((W // heads) ** 0.5)
    return pl.pallas_call(
        functools.partial(_attention_kernel, heads=heads, scale=scale),
        grid=(B,),
        in_specs=[pl.BlockSpec((1, T, W3), lambda b: (b, 0, 0))],
        out_specs=pl.BlockSpec((1, T, W), lambda b: (b, 0, 0)),
        out_shape=jax.ShapeDtypeStruct((B, T, W), out_dtype),
        compiler_params=pltpu.CompilerParams(
            dimension_semantics=("parallel",),
            vmem_limit_bytes=VMEM_LIMIT),
    )(qkv)


# ---------------------------- model (CLIP ViT image encoder) ----------------------------

def init_clip_vit_params(key, *, width, layers, heads, patch, image, out_dim, in_ch=3):
    assert width % heads == 0 and image % patch == 0
    grid = image // patch
    keys = iter(jax.random.split(key, 8 + 8 * layers))

    def nrm(shape, std=0.02):
        return jax.random.normal(next(keys), shape, jnp.float32) * std

    def ln(dim):
        return (jnp.ones((dim,), jnp.float32), jnp.zeros((dim,), jnp.float32))

    params = {
        # Conv2d(3, width, patch, stride=patch, bias=False) stored pre-reshaped &
        # pre-transposed to the [C*P*P, width] matmul operand the kernel consumes.
        "conv1_w": nrm((width, in_ch * patch * patch)).T.astype(W_DTYPE),
        "class_embedding": nrm((width,)).astype(ACT_DTYPE),
        "positional_embedding": nrm((grid * grid + 1, width)).astype(ACT_DTYPE),
        "ln_pre": ln(width),
        "ln_post": ln(width),
        "proj": nrm((width, out_dim)).astype(W_DTYPE),
        "blocks": [],
    }
    for _ in range(layers):
        params["blocks"].append({
            "ln_1": ln(width),
            # all weights pre-transposed once (frozen model): kernels do x @ W[in, out]
            "in_proj_w": nrm((3 * width, width)).T.astype(W_DTYPE),
            "in_proj_b": nrm((3 * width,)),
            "out_proj_w": nrm((width, width)).T.astype(W_DTYPE),
            "out_proj_b": nrm((width,)),
            "ln_2": ln(width),
            "c_fc_w": nrm((4 * width, width)).T.astype(W_DTYPE),
            "c_fc_b": nrm((4 * width,)),
            "c_proj_w": nrm((width, 4 * width)).T.astype(W_DTYPE),
            "c_proj_b": nrm((width,)),
        })
    return params


def encode_image(params, x, *, heads):
    B, C, H, _ = x.shape
    wp = params["conv1_w"]                      # (C*P*P, width)
    width = wp.shape[1]
    P = int(round((wp.shape[0] // C) ** 0.5))
    g = H // P
    T = g * g + 1

    # conv1 (stride = kernel = P, no bias) == patch extraction + tiled matmul.
    patches = x.reshape(B, C, g, P, g, P).transpose(0, 2, 4, 1, 3, 5)
    patches = patches.reshape(B * g * g, C * P * P).astype(ACT_DTYPE)
    tok = pallas_linear(patches, wp, jnp.zeros((width,), jnp.float32),
                        out_dtype=ACT_DTYPE)
    tok = tok.reshape(B, g * g, width)

    cls = jnp.broadcast_to(params["class_embedding"][None, None, :], (B, 1, width))
    xs = jnp.concatenate([cls, tok], axis=1) + params["positional_embedding"][None]
    xs = pallas_layernorm(xs.reshape(B * T, width), *params["ln_pre"],
                          out_dtype=ACT_DTYPE)                    # [B*T, width]

    for blk in params["blocks"]:
        # ---- multi-head self attention: ln_1 fused into QKV projection ----
        qkv = pallas_ln_linear(xs, *blk["ln_1"], blk["in_proj_w"], blk["in_proj_b"],
                               out_dtype=ACT_DTYPE)               # [B*T, 3*width]
        attn = pallas_attention(qkv.reshape(B, T, 3 * width), heads,
                                out_dtype=ACT_DTYPE)              # [B, T, width]
        # out_proj with fused residual add
        xs = pallas_linear(attn.reshape(B * T, width), blk["out_proj_w"],
                           blk["out_proj_b"], residual=xs, out_dtype=ACT_DTYPE)

        # ---- MLP: ln_2 fused into c_fc (+QuickGELU), residual fused into c_proj ----
        h = pallas_ln_linear(xs, *blk["ln_2"], blk["c_fc_w"], blk["c_fc_b"],
                             quick_gelu=True, out_dtype=ACT_DTYPE)
        xs = pallas_linear(h, blk["c_proj_w"], blk["c_proj_b"],
                           residual=xs, out_dtype=ACT_DTYPE)

    cls_tok = xs.reshape(B, T, width)[:, 0, :]                    # x[:, 0, :]
    out_dim = params["proj"].shape[1]
    # ln_post fused into the final projection (proj has no bias)
    return pallas_ln_linear(cls_tok, *params["ln_post"], params["proj"],
                            jnp.zeros((out_dim,), jnp.float32),
                            out_dtype=jnp.float32)                # [B, out_dim]


def frozen_clip_image_embedder_forward(params, x, *, heads):
    # FrozenClipImageEmbedder_ORG.forward: self.model.encode_image(x).unsqueeze(1)
    return encode_image(params, x, heads=heads)[:, None, :]


# ---------------------------- demo ----------------------------

if __name__ == "__main__":
    # Small ViT consistent with CLIP's VisionTransformer structure (lane-friendly width).
    WIDTH, LAYERS, HEADS, PATCH, IMAGE, OUT_DIM = 128, 2, 4, 8, 32, 128
    key = jax.random.PRNGKey(0)
    pkey, xkey = jax.random.split(key)
    params = init_clip_vit_params(pkey, width=WIDTH, layers=LAYERS, heads=HEADS,
                                  patch=PATCH, image=IMAGE, out_dim=OUT_DIM)
    x = jax.random.normal(xkey, (2, 3, IMAGE, IMAGE), jnp.float32)  # NCHW like PyTorch

    fwd = jax.jit(functools.partial(frozen_clip_image_embedder_forward, heads=HEADS))
    out = jax.block_until_ready(fwd(params, x))

    assert out.shape == (2, 1, OUT_DIM), out.shape   # encode_image(...).unsqueeze(1)
    assert bool(jnp.all(jnp.isfinite(out)))
    print("KERNEL_OK")
</pallas_src>

<mosaic_0001>
module attributes {stable_mosaic.version = 11 : i64} {
  func.func @_layernorm_kernel(%arg0: i32, %arg1: memref<34x128xbf16, #tpu.memory_space<vmem>>, %arg2: memref<1x128xf32, #tpu.memory_space<vmem>>, %arg3: memref<1x128xf32, #tpu.memory_space<vmem>>, %arg4: memref<34x128xbf16, #tpu.memory_space<vmem>>) attributes {dimension_semantics = [#tpu.dimension_semantics<parallel>], iteration_bounds = array<i64: 1>, scalar_prefetch = 0 : i64, scratch_operands = 0 : i64, tpu.core_type = #tpu.core_type<tc>, window_params = [{transform_indices = @transform_0, window_bounds = array<i64: 34, 128>}, {pipeline_mode = #tpu.pipeline_mode<synchronous>, transform_indices = @transform_1, window_bounds = array<i64: 1, 128>}, {pipeline_mode = #tpu.pipeline_mode<synchronous>, transform_indices = @transform_2, window_bounds = array<i64: 1, 128>}, {transform_indices = @transform_3, window_bounds = array<i64: 34, 128>}]} {
    %c0 = arith.constant 0 : index
    %c0_0 = arith.constant 0 : index
    %0 = vector.load %arg1[%c0, %c0_0] : memref<34x128xbf16, #tpu.memory_space<vmem>>, vector<34x128xbf16>
    %1 = arith.extf %0 : vector<34x128xbf16> to vector<34x128xf32>
    %cst = arith.constant dense<0.000000e+00> : vector<34xf32>
    %2 = vector.multi_reduction <add>, %1, %cst [1] : vector<34x128xf32> to vector<34xf32>
    %3 = vector.shape_cast %2 : vector<34xf32> to vector<34x1xf32>
    %cst_1 = arith.constant 1.280000e+02 : f32
    %4 = vector.broadcast %cst_1 : f32 to vector<34x1xf32>
    %5 = arith.divf %3, %4 : vector<34x1xf32>
    %6 = vector.broadcast %5 : vector<34x1xf32> to vector<34x128xf32>
    %7 = arith.subf %1, %6 : vector<34x128xf32>
    %8 = arith.mulf %7, %7 : vector<34x128xf32>
    %cst_2 = arith.constant dense<0.000000e+00> : vector<34xf32>
    %9 = vector.multi_reduction <add>, %8, %cst_2 [1] : vector<34x128xf32> to vector<34xf32>
    %10 = vector.shape_cast %9 : vector<34xf32> to vector<34x1xf32>
    %cst_3 = arith.constant 1.280000e+02 : f32
    %11 = vector.broadcast %cst_3 : f32 to vector<34x1xf32>
    %12 = arith.divf %10, %11 : vector<34x1xf32>
    %13 = vector.broadcast %5 : vector<34x1xf32> to vector<34x128xf32>
    %14 = arith.subf %1, %13 : vector<34x128xf32>
    %cst_4 = arith.constant 9.99999974E-6 : f32
    %15 = vector.broadcast %cst_4 : f32 to vector<34x1xf32>
    %16 = arith.addf %12, %15 : vector<34x1xf32>
    %17 = math.rsqrt %16 : vector<34x1xf32>
    %18 = vector.broadcast %17 : vector<34x1xf32> to vector<34x128xf32>
    %19 = arith.mulf %14, %18 : vector<34x128xf32>
    %c0_5 = arith.constant 0 : index
    %c0_6 = arith.constant 0 : index
    %20 = vector.load %arg2[%c0_5, %c0_6] : memref<1x128xf32, #tpu.memory_space<vmem>>, vector<1x128xf32>
    %21 = vector.broadcast %20 : vector<1x128xf32> to vector<34x128xf32>
    %22 = arith.mulf %19, %21 : vector<34x128xf32>
    %c0_7 = arith.constant 0 : index
    %c0_8 = arith.constant 0 : index
    %23 = vector.load %arg3[%c0_7, %c0_8] : memref<1x128xf32, #tpu.memory_space<vmem>>, vector<1x128xf32>
    %24 = vector.broadcast %23 : vector<1x128xf32> to vector<34x128xf32>
    %25 = arith.addf %22, %24 : vector<34x128xf32>
    %26 = arith.truncf %25 : vector<34x128xf32> to vector<34x128xbf16>
    %c0_9 = arith.constant 0 : index
    %c0_10 = arith.constant 0 : index
    %27 = vector.load %arg4[%c0_9, %c0_10] : memref<34x128xbf16, #tpu.memory_space<vmem>>, vector<34x128xbf16>
    tpu.vector_store %arg4[%c0_9, %c0_10], %26 {strides = array<i32>} : memref<34x128xbf16, #tpu.memory_space<vmem>>, vector<34x128xbf16>,
    return
  }
  func.func @transform_0(%arg0: i32) -> (i32, i32) {
    %c0_i32 = arith.constant 0 : i32
    %c0_i32_0 = arith.constant 0 : i32
    return %arg0, %c0_i32 : i32, i32
  }
  func.func @transform_1(%arg0: i32) -> (i32, i32) {
    %c0_i32 = arith.constant 0 : i32
    %c0_i32_0 = arith.constant 0 : i32
    %c0_i32_1 = arith.constant 0 : i32
    return %c0_i32, %c0_i32_0 : i32, i32
  }
  func.func @transform_2(%arg0: i32) -> (i32, i32) {
    %c0_i32 = arith.constant 0 : i32
    %c0_i32_0 = arith.constant 0 : i32
    %c0_i32_1 = arith.constant 0 : i32
    return %c0_i32, %c0_i32_0 : i32, i32
  }
  func.func @transform_3(%arg0: i32) -> (i32, i32) {
    %c0_i32 = arith.constant 0 : i32
    %c0_i32_0 = arith.constant 0 : i32
    return %arg0, %c0_i32 : i32, i32
  }
}

module attributes {stable_mosaic.version = 11 : i64} {
  func.func @_linear_kernel(%arg0: i32, %arg1: i32, %arg2: i32, %arg3: memref<32x192xbf16, #tpu.memory_space<vmem>>, %arg4: memref<192x128xbf16, #tpu.memory_space<vmem>>, %arg5: memref<1x128xf32, #tpu.memory_space<vmem>>, %arg6: memref<32x128xbf16, #tpu.memory_space<vmem>>, %arg7: memref<32x128xf32, #tpu.memory_space<vmem>>) attributes {dimension_semantics = [#tpu.dimension_semantics<parallel>, #tpu.dimension_semantics<parallel>, #tpu.dimension_semantics<arbitrary>], iteration_bounds = array<i64: 1, 1, 1>, scalar_prefetch = 0 : i64, scratch_operands = 1 : i64, tpu.core_type = #tpu.core_type<tc>, window_params = [{transform_indices = @transform_0, window_bounds = array<i64: 32, 192>}, {transform_indices = @transform_1, window_bounds = array<i64: 192, 128>}, {transform_indices = @transform_2, window_bounds = array<i64: 1, 128>}, {transform_indices = @transform_3, window_bounds = array<i64: 32, 128>}]} {
    %c0_i32 = arith.constant 0 : i32
    %0 = arith.cmpi eq, %arg2, %c0_i32 : i32
    %1 = arith.extui %0 : i1 to i32
    %c0_i32_0 = arith.constant 0 : i32
    %2 = arith.cmpi ne, %1, %c0_i32_0 : i32
    scf.if %2 {
      %cst_10 = arith.constant 0.000000e+00 : f32
      %12 = vector.broadcast %cst_10 : f32 to vector<32x128xf32>
      %c0_11 = arith.constant 0 : index
      %c0_12 = arith.constant 0 : index
      %13 = vector.load %arg7[%c0_11, %c0_12] : memref<32x128xf32, #tpu.memory_space<vmem>>, vector<32x128xf32>
      tpu.vector_store %arg7[%c0_11, %c0_12], %12 {strides = array<i32>} : memref<32x128xf32, #tpu.memory_space<vmem>>, vector<32x128xf32>,
    } else {
    }
    %c0 = arith.constant 0 : index
    %c0_1 = arith.constant 0 : index
    %3 = vector.load %arg7[%c0, %c0_1] : memref<32x128xf32, #tpu.memory_space<vmem>>, vector<32x128xf32>
    %c0_2 = arith.constant 0 : index
    %c0_3 = arith.constant 0 : index
    %4 = vector.load %arg3[%c0_2, %c0_3] : memref<32x192xbf16, #tpu.memory_space<vmem>>, vector<32x192xbf16>
    %c0_4 = arith.constant 0 : index
    %c0_5 = arith.constant 0 : index
    %5 = vector.load %arg4[%c0_4, %c0_5] : memref<192x128xbf16, #tpu.memory_space<vmem>>, vector<192x128xbf16>
    %cst = arith.constant dense<0.000000e+00> : vector<32x128xf32>
    %6 = tpu.matmul %4, %5, %cst {dimension_numbers = #tpu.dot_dimension_numbers<[1], [0], [0], [1], [0, 0, 1, 1], [], []>} : vector<32x192xbf16>, vector<192x128xbf16>, vector<32x128xf32> -> vector<32x128xf32>
    %7 = arith.addf %3, %6 : vector<32x128xf32>
    %c0_6 = arith.constant 0 : index
    %c0_7 = arith.constant 0 : index
    %8 = vector.load %arg7[%c0_6, %c0_7] : memref<32x128xf32, #tpu.memory_space<vmem>>, vector<32x128xf32>
    tpu.vector_store %arg7[%c0_6, %c0_7], %7 {strides = array<i32>} : memref<32x128xf32, #tpu.memory_space<vmem>>, vector<32x128xf32>,
    %c0_i32_8 = arith.constant 0 : i32
    %9 = arith.cmpi eq, %arg2, %c0_i32_8 : i32
    %10 = arith.extui %9 : i1 to i32
    %c0_i32_9 = arith.constant 0 : i32
    %11 = arith.cmpi ne, %10, %c0_i32_9 : i32
    scf.if %11 {
      %c0_10 = arith.constant 0 : index
      %c0_11 = arith.constant 0 : index
      %12 = vector.load %arg7[%c0_10, %c0_11] : memref<32x128xf32, #tpu.memory_space<vmem>>, vector<32x128xf32>
      %c0_12 = arith.constant 0 : index
      %c0_13 = arith.constant 0 : index
      %13 = vector.load %arg5[%c0_12, %c0_13] : memref<1x128xf32, #tpu.memory_space<vmem>>, vector<1x128xf32>
      %14 = vector.broadcast %13 : vector<1x128xf32> to vector<32x128xf32>
      %15 = arith.addf %12, %14 : vector<32x128xf32>
      %16 = arith.truncf %15 : vector<32x128xf32> to vector<32x128xbf16>
      %c0_14 = arith.constant 0 : index
      %c0_15 = arith.constant 0 : index
      %17 = vector.load %arg6[%c0_14, %c0_15] : memref<32x128xbf16, #tpu.memory_space<vmem>>, vector<32x128xbf16>
      tpu.vector_store %arg6[%c0_14, %c0_15], %16 {strides = array<i32>} : memref<32x128xbf16, #tpu.memory_space<vmem>>, vector<32x128xbf16>,
    } else {
    }
    return
  }
  func.func @transform_0(%arg0: i32, %arg1: i32, %arg2: i32) -> (i32, i32) {
    %c0_i32 = arith.constant 0 : i32
    return %arg0, %arg2 : i32, i32
  }
  func.func @transform_1(%arg0: i32, %arg1: i32, %arg2: i32) -> (i32, i32) {
    %c0_i32 = arith.constant 0 : i32
    return %arg2, %arg1 : i32, i32
  }
  func.func @transform_2(%arg0: i32, %arg1: i32, %arg2: i32) -> (i32, i32) {
    %c0_i32 = arith.constant 0 : i32
    %c0_i32_0 = arith.constant 0 : i32
    return %c0_i32, %arg1 : i32, i32
  }
  func.func @transform_3(%arg0: i32, %arg1: i32, %arg2: i32) -> (i32, i32) {
    %c0_i32 = arith.constant 0 : i32
    return %arg0, %arg1 : i32, i32
  }
}

module attributes {stable_mosaic.version = 11 : i64} {
  func.func @_ln_linear_kernel(%arg0: i32, %arg1: i32, %arg2: memref<34x128xbf16, #tpu.memory_space<vmem>>, %arg3: memref<1x128xf32, #tpu.memory_space<vmem>>, %arg4: memref<1x128xf32, #tpu.memory_space<vmem>>, %arg5: memref<128x128xbf16, #tpu.memory_space<vmem>>, %arg6: memref<1x128xf32, #tpu.memory_space<vmem>>, %arg7: memref<34x128xbf16, #tpu.memory_space<vmem>>) attributes {dimension_semantics = [#tpu.dimension_semantics<parallel>, #tpu.dimension_semantics<parallel>], iteration_bounds = array<i64: 1, 3>, scalar_prefetch = 0 : i64, scratch_operands = 0 : i64, tpu.core_type = #tpu.core_type<tc>, window_params = [{transform_indices = @transform_0, window_bounds = array<i64: 34, 128>}, {pipeline_mode = #tpu.pipeline_mode<synchronous>, transform_indices = @transform_1, window_bounds = array<i64: 1, 128>}, {pipeline_mode = #tpu.pipeline_mode<synchronous>, transform_indices = @transform_2, window_bounds = array<i64: 1, 128>}, {transform_indices = @transform_3, window_bounds = array<i64: 128, 128>}, {transform_indices = @transform_4, window_bounds = array<i64: 1, 128>}, {transform_indices = @transform_5, window_bounds = array<i64: 34, 128>}]} {
    %c0 = arith.constant 0 : index
    %c0_0 = arith.constant 0 : index
    %0 = vector.load %arg2[%c0, %c0_0] : memref<34x128xbf16, #tpu.memory_space<vmem>>, vector<34x128xbf16>
    %1 = arith.extf %0 : vector<34x128xbf16> to vector<34x128xf32>
    %cst = arith.constant dense<0.000000e+00> : vector<34xf32>
    %2 = vector.multi_reduction <add>, %1, %cst [1] : vector<34x128xf32> to vector<34xf32>
    %3 = vector.shape_cast %2 : vector<34xf32> to vector<34x1xf32>
    %cst_1 = arith.constant 1.280000e+02 : f32
    %4 = vector.broadcast %cst_1 : f32 to vector<34x1xf32>
    %5 = arith.divf %3, %4 : vector<34x1xf32>
    %6 = vector.broadcast %5 : vector<34x1xf32> to vector<34x128xf32>
    %7 = arith.subf %1, %6 : vector<34x128xf32>
    %8 = arith.mulf %7, %7 : vector<34x128xf32>
    %cst_2 = arith.constant dense<0.000000e+00> : vector<34xf32>
    %9 = vector.multi_reduction <add>, %8, %cst_2 [1] : vector<34x128xf32> to vector<34xf32>
    %10 = vector.shape_cast %9 : vector<34xf32> to vector<34x1xf32>
    %cst_3 = arith.constant 1.280000e+02 : f32
    %11 = vector.broadcast %cst_3 : f32 to vector<34x1xf32>
    %12 = arith.divf %10, %11 : vector<34x1xf32>
    %13 = vector.broadcast %5 : vector<34x1xf32> to vector<34x128xf32>
    %14 = arith.subf %1, %13 : vector<34x128xf32>
    %cst_4 = arith.constant 9.99999974E-6 : f32
    %15 = vector.broadcast %cst_4 : f32 to vector<34x1xf32>
    %16 = arith.addf %12, %15 : vector<34x1xf32>
    %17 = math.rsqrt %16 : vector<34x1xf32>
    %18 = vector.broadcast %17 : vector<34x1xf32> to vector<34x128xf32>
    %19 = arith.mulf %14, %18 : vector<34x128xf32>
    %c0_5 = arith.constant 0 : index
    %c0_6 = arith.constant 0 : index
    %20 = vector.load %arg3[%c0_5, %c0_6] : memref<1x128xf32, #tpu.memory_space<vmem>>, vector<1x128xf32>
    %21 = vector.broadcast %20 : vector<1x128xf32> to vector<34x128xf32>
    %22 = arith.mulf %19, %21 : vector<34x128xf32>
    %c0_7 = arith.constant 0 : index
    %c0_8 = arith.constant 0 : index
    %23 = vector.load %arg4[%c0_7, %c0_8] : memref<1x128xf32, #tpu.memory_space<vmem>>, vector<1x128xf32>
    %24 = vector.broadcast %23 : vector<1x128xf32> to vector<34x128xf32>
    %25 = arith.addf %22, %24 : vector<34x128xf32>
    %26 = arith.truncf %25 : vector<34x128xf32> to vector<34x128xbf16>
    %c0_9 = arith.constant 0 : index
    %c0_10 = arith.constant 0 : index
    %27 = vector.load %arg5[%c0_9, %c0_10] : memref<128x128xbf16, #tpu.memory_space<vmem>>, vector<128x128xbf16>
    %cst_11 = arith.constant dense<0.000000e+00> : vector<34x128xf32>
    %28 = tpu.matmul %26, %27, %cst_11 {dimension_numbers = #tpu.dot_dimension_numbers<[1], [0], [0], [1], [0, 0, 1, 1], [], []>} : vector<34x128xbf16>, vector<128x128xbf16>, vector<34x128xf32> -> vector<34x128xf32>
    %c0_12 = arith.constant 0 : index
    %c0_13 = arith.constant 0 : index
    %29 = vector.load %arg6[%c0_12, %c0_13] : memref<1x128xf32, #tpu.memory_space<vmem>>, vector<1x128xf32>
    %30 = vector.broadcast %29 : vector<1x128xf32> to vector<34x128xf32>
    %31 = arith.addf %28, %30 : vector<34x128xf32>
    %32 = arith.truncf %31 : vector<34x128xf32> to vector<34x128xbf16>
    %c0_14 = arith.constant 0 : index
    %c0_15 = arith.constant 0 : index
    %33 = vector.load %arg7[%c0_14, %c0_15] : memref<34x128xbf16, #tpu.memory_space<vmem>>, vector<34x128xbf16>
    tpu.vector_store %arg7[%c0_14, %c0_15], %32 {strides = array<i32>} : memref<34x128xbf16, #tpu.memory_space<vmem>>, vector<34x128xbf16>,
    return
  }
  func.func @transform_0(%arg0: i32, %arg1: i32) -> (i32, i32) {
    %c0_i32 = arith.constant 0 : i32
    %c0_i32_0 = arith.constant 0 : i32
    return %arg0, %c0_i32 : i32, i32
  }
  func.func @transform_1(%arg0: i32, %arg1: i32) -> (i32, i32) {
    %c0_i32 = arith.constant 0 : i32
    %c0_i32_0 = arith.constant 0 : i32
    %c0_i32_1 = arith.constant 0 : i32
    return %c0_i32, %c0_i32_0 : i32, i32
  }
  func.func @transform_2(%arg0: i32, %arg1: i32) -> (i32, i32) {
    %c0_i32 = arith.constant 0 : i32
    %c0_i32_0 = arith.constant 0 : i32
    %c0_i32_1 = arith.constant 0 : i32
    return %c0_i32, %c0_i32_0 : i32, i32
  }
  func.func @transform_3(%arg0: i32, %arg1: i32) -> (i32, i32) {
    %c0_i32 = arith.constant 0 : i32
    %c0_i32_0 = arith.constant 0 : i32
    return %c0_i32, %arg1 : i32, i32
  }
  func.func @transform_4(%arg0: i32, %arg1: i32) -> (i32, i32) {
    %c0_i32 = arith.constant 0 : i32
    %c0_i32_0 = arith.constant 0 : i32
    return %c0_i32, %arg1 : i32, i32
  }
  func.func @transform_5(%arg0: i32, %arg1: i32) -> (i32, i32) {
    %c0_i32 = arith.constant 0 : i32
    return %arg0, %arg1 : i32, i32
  }
}

module attributes {stable_mosaic.version = 11 : i64} {
  func.func @_attention_kernel(%arg0: i32, %arg1: memref<1x17x384xbf16, #tpu.memory_space<vmem>>, %arg2: memref<1x17x128xbf16, #tpu.memory_space<vmem>>) attributes {dimension_semantics = [#tpu.dimension_semantics<parallel>], iteration_bounds = array<i64: 2>, scalar_prefetch = 0 : i64, scratch_operands = 0 : i64, tpu.core_type = #tpu.core_type<tc>, window_params = [{transform_indices = @transform_0, window_bounds = array<i64: 1, 17, 384>}, {transform_indices = @transform_1, window_bounds = array<i64: 1, 17, 128>}]} {
    %c0 = arith.constant 0 : index
    %c0_0 = arith.constant 0 : index
    %c0_1 = arith.constant 0 : index
    %0 = vector.load %arg1[%c0, %c0_0, %c0_1] : memref<1x17x384xbf16, #tpu.memory_space<vmem>>, vector<1x17x384xbf16>
    %1 = vector.shape_cast %0 : vector<1x17x384xbf16> to vector<17x384xbf16>
    %2 = arith.extf %1 : vector<17x384xbf16> to vector<17x384xf32>
    %3 = vector.extract_strided_slice %2 {offsets = [0, 0], sizes = [17, 32], strides = [1, 1]} : vector<17x384xf32> to vector<17x32xf32>
    %4 = vector.extract_strided_slice %2 {offsets = [0, 128], sizes = [17, 32], strides = [1, 1]} : vector<17x384xf32> to vector<17x32xf32>
    %5 = vector.extract_strided_slice %2 {offsets = [0, 256], sizes = [17, 32], strides = [1, 1]} : vector<17x384xf32> to vector<17x32xf32>
    %cst = arith.constant dense<0.000000e+00> : vector<17x17xf32>
    %6 = tpu.matmul %3, %4, %cst {dimension_numbers = #tpu.dot_dimension_numbers<[1], [1], [0], [0], [0, 0, 1, 0], [], []>} : vector<17x32xf32>, vector<17x32xf32>, vector<17x17xf32> -> vector<17x17xf32>
    %cst_2 = arith.constant 0.176776692 : f32
    %7 = vector.broadcast %cst_2 : f32 to vector<17x17xf32>
    %8 = arith.mulf %6, %7 : vector<17x17xf32>
    %cst_3 = arith.constant dense<0xFF800000> : vector<17xf32>
    %9 = vector.multi_reduction <maximumf>, %8, %cst_3 [1] : vector<17x17xf32> to vector<17xf32>
    %10 = vector.shape_cast %9 : vector<17xf32> to vector<17x1xf32>
    %11 = vector.broadcast %10 : vector<17x1xf32> to vector<17x17xf32>
    %12 = arith.subf %8, %11 : vector<17x17xf32>
    %13 = math.exp %12 : vector<17x17xf32>
    %cst_4 = arith.constant dense<0.000000e+00> : vector<17xf32>
    %14 = vector.multi_reduction <add>, %13, %cst_4 [1] : vector<17x17xf32> to vector<17xf32>
    %15 = vector.shape_cast %14 : vector<17xf32> to vector<17x1xf32>
    %16 = tpu.reciprocal %15 {approx = true} : vector<17x1xf32> -> vector<17x1xf32>
    %17 = vector.broadcast %16 : vector<17x1xf32> to vector<17x17xf32>
    %18 = arith.mulf %13, %17 : vector<17x17xf32>
    %cst_5 = arith.constant dense<0.000000e+00> : vector<17x32xf32>
    %19 = tpu.matmul %18, %5, %cst_5 {dimension_numbers = #tpu.dot_dimension_numbers<[1], [0], [0], [1], [0, 0, 1, 1], [], []>} : vector<17x17xf32>, vector<17x32xf32>, vector<17x32xf32> -> vector<17x32xf32>
    %20 = vector.extract_strided_slice %2 {offsets = [0, 32], sizes = [17, 32], strides = [1, 1]} : vector<17x384xf32> to vector<17x32xf32>
    %21 = vector.extract_strided_slice %2 {offsets = [0, 160], sizes = [17, 32], strides = [1, 1]} : vector<17x384xf32> to vector<17x32xf32>
    %22 = vector.extract_strided_slice %2 {offsets = [0, 288], sizes = [17, 32], strides = [1, 1]} : vector<17x384xf32> to vector<17x32xf32>
    %cst_6 = arith.constant dense<0.000000e+00> : vector<17x17xf32>
    %23 = tpu.matmul %20, %21, %cst_6 {dimension_numbers = #tpu.dot_dimension_numbers<[1], [1], [0], [0], [0, 0, 1, 0], [], []>} : vector<17x32xf32>, vector<17x32xf32>, vector<17x17xf32> -> vector<17x17xf32>
    %cst_7 = arith.constant 0.176776692 : f32
    %24 = vector.broadcast %cst_7 : f32 to vector<17x17xf32>
    %25 = arith.mulf %23, %24 : vector<17x17xf32>
    %cst_8 = arith.constant dense<0xFF800000> : vector<17xf32>
    %26 = vector.multi_reduction <maximumf>, %25, %cst_8 [1] : vector<17x17xf32> to vector<17xf32>
    %27 = vector.shape_cast %26 : vector<17xf32> to vector<17x1xf32>
    %28 = vector.broadcast %27 : vector<17x1xf32> to vector<17x17xf32>
    %29 = arith.subf %25, %28 : vector<17x17xf32>
    %30 = math.exp %29 : vector<17x17xf32>
    %cst_9 = arith.constant dense<0.000000e+00> : vector<17xf32>
    %31 = vector.multi_reduction <add>, %30, %cst_9 [1] : vector<17x17xf32> to vector<17xf32>
    %32 = vector.shape_cast %31 : vector<17xf32> to vector<17x1xf32>
    %33 = tpu.reciprocal %32 {approx = true} : vector<17x1xf32> -> vector<17x1xf32>
    %34 = vector.broadcast %33 : vector<17x1xf32> to vector<17x17xf32>
    %35 = arith.mulf %30, %34 : vector<17x17xf32>
    %cst_10 = arith.constant dense<0.000000e+00> : vector<17x32xf32>
    %36 = tpu.matmul %35, %22, %cst_10 {dimension_numbers = #tpu.dot_dimension_numbers<[1], [0], [0], [1], [0, 0, 1, 1], [], []>} : vector<17x17xf32>, vector<17x32xf32>, vector<17x32xf32> -> vector<17x32xf32>
    %37 = vector.extract_strided_slice %2 {offsets = [0, 64], sizes = [17, 32], strides = [1, 1]} : vector<17x384xf32> to vector<17x32xf32>
    %38 = vector.extract_strided_slice %2 {offsets = [0, 192], sizes = [17, 32], strides = [1, 1]} : vector<17x384xf32> to vector<17x32xf32>
    %39 = vector.extract_strided_slice %2 {offsets = [0, 320], sizes = [17, 32], strides = [1, 1]} : vector<17x384xf32> to vector<17x32xf32>
    %cst_11 = arith.constant dense<0.000000e+00> : vector<17x17xf32>
    %40 = tpu.matmul %37, %38, %cst_11 {dimension_numbers = #tpu.dot_dimension_numbers<[1], [1], [0], [0], [0, 0, 1, 0], [], []>} : vector<17x32xf32>, vector<17x32xf32>, vector<17x17xf32> -> vector<17x17xf32>
    %cst_12 = arith.constant 0.176776692 : f32
    %41 = vector.broadcast %cst_12 : f32 to vector<17x17xf32>
    %42 = arith.mulf %40, %41 : vector<17x17xf32>
    %cst_13 = arith.constant dense<0xFF800000> : vector<17xf32>
    %43 = vector.multi_reduction <maximumf>, %42, %cst_13 [1] : vector<17x17xf32> to vector<17xf32>
    %44 = vector.shape_cast %43 : vector<17xf32> to vector<17x1xf32>
    %45 = vector.broadcast %44 : vector<17x1xf32> to vector<17x17xf32>
    %46 = arith.subf %42, %45 : vector<17x17xf32>
    %47 = math.exp %46 : vector<17x17xf32>
    %cst_14 = arith.constant dense<0.000000e+00> : vector<17xf32>
    %48 = vector.multi_reduction <add>, %47, %cst_14 [1] : vector<17x17xf32> to vector<17xf32>
    %49 = vector.shape_cast %48 : vector<17xf32> to vector<17x1xf32>
    %50 = tpu.reciprocal %49 {approx = true} : vector<17x1xf32> -> vector<17x1xf32>
    %51 = vector.broadcast %50 : vector<17x1xf32> to vector<17x17xf32>
    %52 = arith.mulf %47, %51 : vector<17x17xf32>
    %cst_15 = arith.constant dense<0.000000e+00> : vector<17x32xf32>
    %53 = tpu.matmul %52, %39, %cst_15 {dimension_numbers = #tpu.dot_dimension_numbers<[1], [0], [0], [1], [0, 0, 1, 1], [], []>} : vector<17x17xf32>, vector<17x32xf32>, vector<17x32xf32> -> vector<17x32xf32>
    %54 = vector.extract_strided_slice %2 {offsets = [0, 96], sizes = [17, 32], strides = [1, 1]} : vector<17x384xf32> to vector<17x32xf32>
    %55 = vector.extract_strided_slice %2 {offsets = [0, 224], sizes = [17, 32], strides = [1, 1]} : vector<17x384xf32> to vector<17x32xf32>
    %56 = vector.extract_strided_slice %2 {offsets = [0, 352], sizes = [17, 32], strides = [1, 1]} : vector<17x384xf32> to vector<17x32xf32>
    %cst_16 = arith.constant dense<0.000000e+00> : vector<17x17xf32>
    %57 = tpu.matmul %54, %55, %cst_16 {dimension_numbers = #tpu.dot_dimension_numbers<[1], [1], [0], [0], [0, 0, 1, 0], [], []>} : vector<17x32xf32>, vector<17x32xf32>, vector<17x17xf32> -> vector<17x17xf32>
    %cst_17 = arith.constant 0.176776692 : f32
    %58 = vector.broadcast %cst_17 : f32 to vector<17x17xf32>
    %59 = arith.mulf %57, %58 : vector<17x17xf32>
    %cst_18 = arith.constant dense<0xFF800000> : vector<17xf32>
    %60 = vector.multi_reduction <maximumf>, %59, %cst_18 [1] : vector<17x17xf32> to vector<17xf32>
    %61 = vector.shape_cast %60 : vector<17xf32> to vector<17x1xf32>
    %62 = vector.broadcast %61 : vector<17x1xf32> to vector<17x17xf32>
    %63 = arith.subf %59, %62 : vector<17x17xf32>
    %64 = math.exp %63 : vector<17x17xf32>
    %cst_19 = arith.constant dense<0.000000e+00> : vector<17xf32>
    %65 = vector.multi_reduction <add>, %64, %cst_19 [1] : vector<17x17xf32> to vector<17xf32>
    %66 = vector.shape_cast %65 : vector<17xf32> to vector<17x1xf32>
    %67 = tpu.reciprocal %66 {approx = true} : vector<17x1xf32> -> vector<17x1xf32>
    %68 = vector.broadcast %67 : vector<17x1xf32> to vector<17x17xf32>
    %69 = arith.mulf %64, %68 : vector<17x17xf32>
    %cst_20 = arith.constant dense<0.000000e+00> : vector<17x32xf32>
    %70 = tpu.matmul %69, %56, %cst_20 {dimension_numbers = #tpu.dot_dimension_numbers<[1], [0], [0], [1], [0, 0, 1, 1], [], []>} : vector<17x17xf32>, vector<17x32xf32>, vector<17x32xf32> -> vector<17x32xf32>
    %71 = tpu.concatenate %19, %36, %53, %70 in 1 : vector<17x32xf32>, vector<17x32xf32>, vector<17x32xf32>, vector<17x32xf32> -> vector<17x128xf32>
    %72 = arith.truncf %71 : vector<17x128xf32> to vector<17x128xbf16>
    %c0_21 = arith.constant 0 : index
    %c0_22 = arith.constant 0 : index
    %c0_23 = arith.constant 0 : index
    %73 = vector.load %arg2[%c0_21, %c0_22, %c0_23] : memref<1x17x128xbf16, #tpu.memory_space<vmem>>, vector<1x17x128xbf16>
    %74 = vector.shape_cast %73 : vector<1x17x128xbf16> to vector<17x128xbf16>
    %75 = vector.shape_cast %72 : vector<17x128xbf16> to vector<1x17x128xbf16>
    tpu.vector_store %arg2[%c0_21, %c0_22, %c0_23], %75 {strides = array<i32>} : memref<1x17x128xbf16, #tpu.memory_space<vmem>>, vector<1x17x128xbf16>,
    return
  }
  func.func @transform_0(%arg0: i32) -> (i32, i32, i32) {
    %c0_i32 = arith.constant 0 : i32
    %c0_i32_0 = arith.constant 0 : i32
    %c0_i32_1 = arith.constant 0 : i32
    return %arg0, %c0_i32, %c0_i32_0 : i32, i32, i32
  }
  func.func @transform_1(%arg0: i32) -> (i32, i32, i32) {
    %c0_i32 = arith.constant 0 : i32
    %c0_i32_0 = arith.constant 0 : i32
    %c0_i32_1 = arith.constant 0 : i32
    return %arg0, %c0_i32, %c0_i32_0 : i32, i32, i32
  }
}

module attributes {stable_mosaic.version = 11 : i64} {
  func.func @_linear_kernel(%arg0: i32, %arg1: i32, %arg2: i32, %arg3: memref<34x128xbf16, #tpu.memory_space<vmem>>, %arg4: memref<128x128xbf16, #tpu.memory_space<vmem>>, %arg5: memref<1x128xf32, #tpu.memory_space<vmem>>, %arg6: memref<34x128xbf16, #tpu.memory_space<vmem>>, %arg7: memref<34x128xbf16, #tpu.memory_space<vmem>>, %arg8: memref<34x128xf32, #tpu.memory_space<vmem>>) attributes {dimension_semantics = [#tpu.dimension_semantics<parallel>, #tpu.dimension_semantics<parallel>, #tpu.dimension_semantics<arbitrary>], iteration_bounds = array<i64: 1, 1, 1>, scalar_prefetch = 0 : i64, scratch_operands = 1 : i64, tpu.core_type = #tpu.core_type<tc>, window_params = [{transform_indices = @transform_0, window_bounds = array<i64: 34, 128>}, {transform_indices = @transform_1, window_bounds = array<i64: 128, 128>}, {transform_indices = @transform_2, window_bounds = array<i64: 1, 128>}, {transform_indices = @transform_3, window_bounds = array<i64: 34, 128>}, {transform_indices = @transform_4, window_bounds = array<i64: 34, 128>}]} {
    %c0_i32 = arith.constant 0 : i32
    %0 = arith.cmpi eq, %arg2, %c0_i32 : i32
    %1 = arith.extui %0 : i1 to i32
    %c0_i32_0 = arith.constant 0 : i32
    %2 = arith.cmpi ne, %1, %c0_i32_0 : i32
    scf.if %2 {
      %cst_10 = arith.constant 0.000000e+00 : f32
      %12 = vector.broadcast %cst_10 : f32 to vector<34x128xf32>
      %c0_11 = arith.constant 0 : index
      %c0_12 = arith.constant 0 : index
      %13 = vector.load %arg8[%c0_11, %c0_12] : memref<34x128xf32, #tpu.memory_space<vmem>>, vector<34x128xf32>
      tpu.vector_store %arg8[%c0_11, %c0_12], %12 {strides = array<i32>} : memref<34x128xf32, #tpu.memory_space<vmem>>, vector<34x128xf32>,
    } else {
    }
    %c0 = arith.constant 0 : index
    %c0_1 = arith.constant 0 : index
    %3 = vector.load %arg8[%c0, %c0_1] : memref<34x128xf32, #tpu.memory_space<vmem>>, vector<34x128xf32>
    %c0_2 = arith.constant 0 : index
    %c0_3 = arith.constant 0 : index
    %4 = vector.load %arg3[%c0_2, %c0_3] : memref<34x128xbf16, #tpu.memory_space<vmem>>, vector<34x128xbf16>
    %c0_4 = arith.constant 0 : index
    %c0_5 = arith.constant 0 : index
    %5 = vector.load %arg4[%c0_4, %c0_5] : memref<128x128xbf16, #tpu.memory_space<vmem>>, vector<128x128xbf16>
    %cst = arith.constant dense<0.000000e+00> : vector<34x128xf32>
    %6 = tpu.matmul %4, %5, %cst {dimension_numbers = #tpu.dot_dimension_numbers<[1], [0], [0], [1], [0, 0, 1, 1], [], []>} : vector<34x128xbf16>, vector<128x128xbf16>, vector<34x128xf32> -> vector<34x128xf32>
    %7 = arith.addf %3, %6 : vector<34x128xf32>
    %c0_6 = arith.constant 0 : index
    %c0_7 = arith.constant 0 : index
    %8 = vector.load %arg8[%c0_6, %c0_7] : memref<34x128xf32, #tpu.memory_space<vmem>>, vector<34x128xf32>
    tpu.vector_store %arg8[%c0_6, %c0_7], %7 {strides = array<i32>} : memref<34x128xf32, #tpu.memory_space<vmem>>, vector<34x128xf32>,
    %c0_i32_8 = arith.constant 0 : i32
    %9 = arith.cmpi eq, %arg2, %c0_i32_8 : i32
    %10 = arith.extui %9 : i1 to i32
    %c0_i32_9 = arith.constant 0 : i32
    %11 = arith.cmpi ne, %10, %c0_i32_9 : i32
    scf.if %11 {
      %c0_10 = arith.constant 0 : index
      %c0_11 = arith.constant 0 : index
      %12 = vector.load %arg8[%c0_10, %c0_11] : memref<34x128xf32, #tpu.memory_space<vmem>>, vector<34x128xf32>
      %c0_12 = arith.constant 0 : index
      %c0_13 = arith.constant 0 : index
      %13 = vector.load %arg5[%c0_12, %c0_13] : memref<1x128xf32, #tpu.memory_space<vmem>>, vector<1x128xf32>
      %14 = vector.broadcast %13 : vector<1x128xf32> to vector<34x128xf32>
      %15 = arith.addf %12, %14 : vector<34x128xf32>
      %c0_14 = arith.constant 0 : index
      %c0_15 = arith.constant 0 : index
      %16 = vector.load %arg6[%c0_14, %c0_15] : memref<34x128xbf16, #tpu.memory_space<vmem>>, vector<34x128xbf16>
      %17 = arith.extf %16 : vector<34x128xbf16> to vector<34x128xf32>
      %18 = arith.addf %15, %17 : vector<34x128xf32>
      %19 = arith.truncf %18 : vector<34x128xf32> to vector<34x128xbf16>
      %c0_16 = arith.constant 0 : index
      %c0_17 = arith.constant 0 : index
      %20 = vector.load %arg7[%c0_16, %c0_17] : memref<34x128xbf16, #tpu.memory_space<vmem>>, vector<34x128xbf16>
      tpu.vector_store %arg7[%c0_16, %c0_17], %19 {strides = array<i32>} : memref<34x128xbf16, #tpu.memory_space<vmem>>, vector<34x128xbf16>,
    } else {
    }
    return
  }
  func.func @transform_0(%arg0: i32, %arg1: i32, %arg2: i32) -> (i32, i32) {
    %c0_i32 = arith.constant 0 : i32
    return %arg0, %arg2 : i32, i32
  }
  func.func @transform_1(%arg0: i32, %arg1: i32, %arg2: i32) -> (i32, i32) {
    %c0_i32 = arith.constant 0 : i32
    return %arg2, %arg1 : i32, i32
  }
  func.func @transform_2(%arg0: i32, %arg1: i32, %arg2: i32) -> (i32, i32) {
    %c0_i32 = arith.constant 0 : i32
    %c0_i32_0 = arith.constant 0 : i32
    return %c0_i32, %arg1 : i32, i32
  }
  func.func @transform_3(%arg0: i32, %arg1: i32, %arg2: i32) -> (i32, i32) {
    %c0_i32 = arith.constant 0 : i32
    return %arg0, %arg1 : i32, i32
  }
  func.func @transform_4(%arg0: i32, %arg1: i32, %arg2: i32) -> (i32, i32) {
    %c0_i32 = arith.constant 0 : i32
    return %arg0, %arg1 : i32, i32
  }
}

module attributes {stable_mosaic.version = 11 : i64} {
  func.func @_ln_linear_kernel(%arg0: i32, %arg1: i32, %arg2: memref<34x128xbf16, #tpu.memory_space<vmem>>, %arg3: memref<1x128xf32, #tpu.memory_space<vmem>>, %arg4: memref<1x128xf32, #tpu.memory_space<vmem>>, %arg5: memref<128x256xbf16, #tpu.memory_space<vmem>>, %arg6: memref<1x256xf32, #tpu.memory_space<vmem>>, %arg7: memref<34x256xbf16, #tpu.memory_space<vmem>>) attributes {dimension_semantics = [#tpu.dimension_semantics<parallel>, #tpu.dimension_semantics<parallel>], iteration_bounds = array<i64: 1, 2>, scalar_prefetch = 0 : i64, scratch_operands = 0 : i64, tpu.core_type = #tpu.core_type<tc>, window_params = [{transform_indices = @transform_0, window_bounds = array<i64: 34, 128>}, {pipeline_mode = #tpu.pipeline_mode<synchronous>, transform_indices = @transform_1, window_bounds = array<i64: 1, 128>}, {pipeline_mode = #tpu.pipeline_mode<synchronous>, transform_indices = @transform_2, window_bounds = array<i64: 1, 128>}, {transform_indices = @transform_3, window_bounds = array<i64: 128, 256>}, {transform_indices = @transform_4, window_bounds = array<i64: 1, 256>}, {transform_indices = @transform_5, window_bounds = array<i64: 34, 256>}]} {
    %c0 = arith.constant 0 : index
    %c0_0 = arith.constant 0 : index
    %0 = vector.load %arg2[%c0, %c0_0] : memref<34x128xbf16, #tpu.memory_space<vmem>>, vector<34x128xbf16>
    %1 = arith.extf %0 : vector<34x128xbf16> to vector<34x128xf32>
    %cst = arith.constant dense<0.000000e+00> : vector<34xf32>
    %2 = vector.multi_reduction <add>, %1, %cst [1] : vector<34x128xf32> to vector<34xf32>
    %3 = vector.shape_cast %2 : vector<34xf32> to vector<34x1xf32>
    %cst_1 = arith.constant 1.280000e+02 : f32
    %4 = vector.broadcast %cst_1 : f32 to vector<34x1xf32>
    %5 = arith.divf %3, %4 : vector<34x1xf32>
    %6 = vector.broadcast %5 : vector<34x1xf32> to vector<34x128xf32>
    %7 = arith.subf %1, %6 : vector<34x128xf32>
    %8 = arith.mulf %7, %7 : vector<34x128xf32>
    %cst_2 = arith.constant dense<0.000000e+00> : vector<34xf32>
    %9 = vector.multi_reduction <add>, %8, %cst_2 [1] : vector<34x128xf32> to vector<34xf32>
    %10 = vector.shape_cast %9 : vector<34xf32> to vector<34x1xf32>
    %cst_3 = arith.constant 1.280000e+02 : f32
    %11 = vector.broadcast %cst_3 : f32 to vector<34x1xf32>
    %12 = arith.divf %10, %11 : vector<34x1xf32>
    %13 = vector.broadcast %5 : vector<34x1xf32> to vector<34x128xf32>
    %14 = arith.subf %1, %13 : vector<34x128xf32>
    %cst_4 = arith.constant 9.99999974E-6 : f32
    %15 = vector.broadcast %cst_4 : f32 to vector<34x1xf32>
    %16 = arith.addf %12, %15 : vector<34x1xf32>
    %17 = math.rsqrt %16 : vector<34x1xf32>
    %18 = vector.broadcast %17 : vector<34x1xf32> to vector<34x128xf32>
    %19 = arith.mulf %14, %18 : vector<34x128xf32>
    %c0_5 = arith.constant 0 : index
    %c0_6 = arith.constant 0 : index
    %20 = vector.load %arg3[%c0_5, %c0_6] : memref<1x128xf32, #tpu.memory_space<vmem>>, vector<1x128xf32>
    %21 = vector.broadcast %20 : vector<1x128xf32> to vector<34x128xf32>
    %22 = arith.mulf %19, %21 : vector<34x128xf32>
    %c0_7 = arith.constant 0 : index
    %c0_8 = arith.constant 0 : index
    %23 = vector.load %arg4[%c0_7, %c0_8] : memref<1x128xf32, #tpu.memory_space<vmem>>, vector<1x128xf32>
    %24 = vector.broadcast %23 : vector<1x128xf32> to vector<34x128xf32>
    %25 = arith.addf %22, %24 : vector<34x128xf32>
    %26 = arith.truncf %25 : vector<34x128xf32> to vector<34x128xbf16>
    %c0_9 = arith.constant 0 : index
    %c0_10 = arith.constant 0 : index
    %27 = vector.load %arg5[%c0_9, %c0_10] : memref<128x256xbf16, #tpu.memory_space<vmem>>, vector<128x256xbf16>
    %cst_11 = arith.constant dense<0.000000e+00> : vector<34x256xf32>
    %28 = tpu.matmul %26, %27, %cst_11 {dimension_numbers = #tpu.dot_dimension_numbers<[1], [0], [0], [1], [0, 0, 1, 1], [], []>} : vector<34x128xbf16>, vector<128x256xbf16>, vector<34x256xf32> -> vector<34x256xf32>
    %c0_12 = arith.constant 0 : index
    %c0_13 = arith.constant 0 : index
    %29 = vector.load %arg6[%c0_12, %c0_13] : memref<1x256xf32, #tpu.memory_space<vmem>>, vector<1x256xf32>
    %30 = vector.broadcast %29 : vector<1x256xf32> to vector<34x256xf32>
    %31 = arith.addf %28, %30 : vector<34x256xf32>
    %cst_14 = arith.constant 1.702000e+00 : f32
    %32 = vector.broadcast %cst_14 : f32 to vector<34x256xf32>
    %33 = arith.mulf %32, %31 : vector<34x256xf32>
    %34 = arith.negf %33 : vector<34x256xf32>
    %35 = math.exp %34 : vector<34x256xf32>
    %cst_15 = arith.constant 1.000000e+00 : f32
    %36 = vector.broadcast %cst_15 : f32 to vector<34x256xf32>
    %37 = arith.addf %36, %35 : vector<34x256xf32>
    %38 = arith.divf %36, %37 : vector<34x256xf32>
    %39 = arith.mulf %31, %38 : vector<34x256xf32>
    %40 = arith.truncf %39 : vector<34x256xf32> to vector<34x256xbf16>
    %c0_16 = arith.constant 0 : index
    %c0_17 = arith.constant 0 : index
    %41 = vector.load %arg7[%c0_16, %c0_17] : memref<34x256xbf16, #tpu.memory_space<vmem>>, vector<34x256xbf16>
    tpu.vector_store %arg7[%c0_16, %c0_17], %40 {strides = array<i32>} : memref<34x256xbf16, #tpu.memory_space<vmem>>, vector<34x256xbf16>,
    return
  }
  func.func @transform_0(%arg0: i32, %arg1: i32) -> (i32, i32) {
    %c0_i32 = arith.constant 0 : i32
    %c0_i32_0 = arith.constant 0 : i32
    return %arg0, %c0_i32 : i32, i32
  }
  func.func @transform_1(%arg0: i32, %arg1: i32) -> (i32, i32) {
    %c0_i32 = arith.constant 0 : i32
    %c0_i32_0 = arith.constant 0 : i32
    %c0_i32_1 = arith.constant 0 : i32
    return %c0_i32, %c0_i32_0 : i32, i32
  }
  func.func @transform_2(%arg0: i32, %arg1: i32) -> (i32, i32) {
    %c0_i32 = arith.constant 0 : i32
    %c0_i32_0 = arith.constant 0 : i32
    %c0_i32_1 = arith.constant 0 : i32
    return %c0_i32, %c0_i32_0 : i32, i32
  }
  func.func @transform_3(%arg0: i32, %arg1: i32) -> (i32, i32) {
    %c0_i32 = arith.constant 0 : i32
    %c0_i32_0 = arith.constant 0 : i32
    return %c0_i32, %arg1 : i32, i32
  }
  func.func @transform_4(%arg0: i32, %arg1: i32) -> (i32, i32) {
    %c0_i32 = arith.constant 0 : i32
    %c0_i32_0 = arith.constant 0 : i32
    return %c0_i32, %arg1 : i32, i32
  }
  func.func @transform_5(%arg0: i32, %arg1: i32) -> (i32, i32) {
    %c0_i32 = arith.constant 0 : i32
    return %arg0, %arg1 : i32, i32
  }
}

module attributes {stable_mosaic.version = 11 : i64} {
  func.func @_linear_kernel(%arg0: i32, %arg1: i32, %arg2: i32, %arg3: memref<34x512xbf16, #tpu.memory_space<vmem>>, %arg4: memref<512x128xbf16, #tpu.memory_space<vmem>>, %arg5: memref<1x128xf32, #tpu.memory_space<vmem>>, %arg6: memref<34x128xbf16, #tpu.memory_space<vmem>>, %arg7: memref<34x128xbf16, #tpu.memory_space<vmem>>, %arg8: memref<34x128xf32, #tpu.memory_space<vmem>>) attributes {dimension_semantics = [#tpu.dimension_semantics<parallel>, #tpu.dimension_semantics<parallel>, #tpu.dimension_semantics<arbitrary>], iteration_bounds = array<i64: 1, 1, 1>, scalar_prefetch = 0 : i64, scratch_operands = 1 : i64, tpu.core_type = #tpu.core_type<tc>, window_params = [{transform_indices = @transform_0, window_bounds = array<i64: 34, 512>}, {transform_indices = @transform_1, window_bounds = array<i64: 512, 128>}, {transform_indices = @transform_2, window_bounds = array<i64: 1, 128>}, {transform_indices = @transform_3, window_bounds = array<i64: 34, 128>}, {transform_indices = @transform_4, window_bounds = array<i64: 34, 128>}]} {
    %c0_i32 = arith.constant 0 : i32
    %0 = arith.cmpi eq, %arg2, %c0_i32 : i32
    %1 = arith.extui %0 : i1 to i32
    %c0_i32_0 = arith.constant 0 : i32
    %2 = arith.cmpi ne, %1, %c0_i32_0 : i32
    scf.if %2 {
      %cst_10 = arith.constant 0.000000e+00 : f32
      %12 = vector.broadcast %cst_10 : f32 to vector<34x128xf32>
      %c0_11 = arith.constant 0 : index
      %c0_12 = arith.constant 0 : index
      %13 = vector.load %arg8[%c0_11, %c0_12] : memref<34x128xf32, #tpu.memory_space<vmem>>, vector<34x128xf32>
      tpu.vector_store %arg8[%c0_11, %c0_12], %12 {strides = array<i32>} : memref<34x128xf32, #tpu.memory_space<vmem>>, vector<34x128xf32>,
    } else {
    }
    %c0 = arith.constant 0 : index
    %c0_1 = arith.constant 0 : index
    %3 = vector.load %arg8[%c0, %c0_1] : memref<34x128xf32, #tpu.memory_space<vmem>>, vector<34x128xf32>
    %c0_2 = arith.constant 0 : index
    %c0_3 = arith.constant 0 : index
    %4 = vector.load %arg3[%c0_2, %c0_3] : memref<34x512xbf16, #tpu.memory_space<vmem>>, vector<34x512xbf16>
    %c0_4 = arith.constant 0 : index
    %c0_5 = arith.constant 0 : index
    %5 = vector.load %arg4[%c0_4, %c0_5] : memref<512x128xbf16, #tpu.memory_space<vmem>>, vector<512x128xbf16>
    %cst = arith.constant dense<0.000000e+00> : vector<34x128xf32>
    %6 = tpu.matmul %4, %5, %cst {dimension_numbers = #tpu.dot_dimension_numbers<[1], [0], [0], [1], [0, 0, 1, 1], [], []>} : vector<34x512xbf16>, vector<512x128xbf16>, vector<34x128xf32> -> vector<34x128xf32>
    %7 = arith.addf %3, %6 : vector<34x128xf32>
    %c0_6 = arith.constant 0 : index
    %c0_7 = arith.constant 0 : index
    %8 = vector.load %arg8[%c0_6, %c0_7] : memref<34x128xf32, #tpu.memory_space<vmem>>, vector<34x128xf32>
    tpu.vector_store %arg8[%c0_6, %c0_7], %7 {strides = array<i32>} : memref<34x128xf32, #tpu.memory_space<vmem>>, vector<34x128xf32>,
    %c0_i32_8 = arith.constant 0 : i32
    %9 = arith.cmpi eq, %arg2, %c0_i32_8 : i32
    %10 = arith.extui %9 : i1 to i32
    %c0_i32_9 = arith.constant 0 : i32
    %11 = arith.cmpi ne, %10, %c0_i32_9 : i32
    scf.if %11 {
      %c0_10 = arith.constant 0 : index
      %c0_11 = arith.constant 0 : index
      %12 = vector.load %arg8[%c0_10, %c0_11] : memref<34x128xf32, #tpu.memory_space<vmem>>, vector<34x128xf32>
      %c0_12 = arith.constant 0 : index
      %c0_13 = arith.constant 0 : index
      %13 = vector.load %arg5[%c0_12, %c0_13] : memref<1x128xf32, #tpu.memory_space<vmem>>, vector<1x128xf32>
      %14 = vector.broadcast %13 : vector<1x128xf32> to vector<34x128xf32>
      %15 = arith.addf %12, %14 : vector<34x128xf32>
      %c0_14 = arith.constant 0 : index
      %c0_15 = arith.constant 0 : index
      %16 = vector.load %arg6[%c0_14, %c0_15] : memref<34x128xbf16, #tpu.memory_space<vmem>>, vector<34x128xbf16>
      %17 = arith.extf %16 : vector<34x128xbf16> to vector<34x128xf32>
      %18 = arith.addf %15, %17 : vector<34x128xf32>
      %19 = arith.truncf %18 : vector<34x128xf32> to vector<34x128xbf16>
      %c0_16 = arith.constant 0 : index
      %c0_17 = arith.constant 0 : index
      %20 = vector.load %arg7[%c0_16, %c0_17] : memref<34x128xbf16, #tpu.memory_space<vmem>>, vector<34x128xbf16>
      tpu.vector_store %arg7[%c0_16, %c0_17], %19 {strides = array<i32>} : memref<34x128xbf16, #tpu.memory_space<vmem>>, vector<34x128xbf16>,
    } else {
    }
    return
  }
  func.func @transform_0(%arg0: i32, %arg1: i32, %arg2: i32) -> (i32, i32) {
    %c0_i32 = arith.constant 0 : i32
    return %arg0, %arg2 : i32, i32
  }
  func.func @transform_1(%arg0: i32, %arg1: i32, %arg2: i32) -> (i32, i32) {
    %c0_i32 = arith.constant 0 : i32
    return %arg2, %arg1 : i32, i32
  }
  func.func @transform_2(%arg0: i32, %arg1: i32, %arg2: i32) -> (i32, i32) {
    %c0_i32 = arith.constant 0 : i32
    %c0_i32_0 = arith.constant 0 : i32
    return %c0_i32, %arg1 : i32, i32
  }
  func.func @transform_3(%arg0: i32, %arg1: i32, %arg2: i32) -> (i32, i32) {
    %c0_i32 = arith.constant 0 : i32
    return %arg0, %arg1 : i32, i32
  }
  func.func @transform_4(%arg0: i32, %arg1: i32, %arg2: i32) -> (i32, i32) {
    %c0_i32 = arith.constant 0 : i32
    return %arg0, %arg1 : i32, i32
  }
}

module attributes {stable_mosaic.version = 11 : i64} {
  func.func @_ln_linear_kernel(%arg0: i32, %arg1: i32, %arg2: memref<2x128xbf16, #tpu.memory_space<vmem>>, %arg3: memref<1x128xf32, #tpu.memory_space<vmem>>, %arg4: memref<1x128xf32, #tpu.memory_space<vmem>>, %arg5: memref<128x128xbf16, #tpu.memory_space<vmem>>, %arg6: memref<1x128xf32, #tpu.memory_space<vmem>>, %arg7: memref<2x128xf32, #tpu.memory_space<vmem>>) attributes {dimension_semantics = [#tpu.dimension_semantics<parallel>, #tpu.dimension_semantics<parallel>], iteration_bounds = array<i64: 1, 1>, scalar_prefetch = 0 : i64, scratch_operands = 0 : i64, tpu.core_type = #tpu.core_type<tc>, window_params = [{transform_indices = @transform_0, window_bounds = array<i64: 2, 128>}, {pipeline_mode = #tpu.pipeline_mode<synchronous>, transform_indices = @transform_1, window_bounds = array<i64: 1, 128>}, {pipeline_mode = #tpu.pipeline_mode<synchronous>, transform_indices = @transform_2, window_bounds = array<i64: 1, 128>}, {transform_indices = @transform_3, window_bounds = array<i64: 128, 128>}, {transform_indices = @transform_4, window_bounds = array<i64: 1, 128>}, {transform_indices = @transform_5, window_bounds = array<i64: 2, 128>}]} {
    %c0 = arith.constant 0 : index
    %c0_0 = arith.constant 0 : index
    %0 = vector.load %arg2[%c0, %c0_0] : memref<2x128xbf16, #tpu.memory_space<vmem>>, vector<2x128xbf16>
    %1 = arith.extf %0 : vector<2x128xbf16> to vector<2x128xf32>
    %cst = arith.constant dense<0.000000e+00> : vector<2xf32>
    %2 = vector.multi_reduction <add>, %1, %cst [1] : vector<2x128xf32> to vector<2xf32>
    %3 = vector.shape_cast %2 : vector<2xf32> to vector<2x1xf32>
    %cst_1 = arith.constant 1.280000e+02 : f32
    %4 = vector.broadcast %cst_1 : f32 to vector<2x1xf32>
    %5 = arith.divf %3, %4 : vector<2x1xf32>
    %6 = vector.broadcast %5 : vector<2x1xf32> to vector<2x128xf32>
    %7 = arith.subf %1, %6 : vector<2x128xf32>
    %8 = arith.mulf %7, %7 : vector<2x128xf32>
    %cst_2 = arith.constant dense<0.000000e+00> : vector<2xf32>
    %9 = vector.multi_reduction <add>, %8, %cst_2 [1] : vector<2x128xf32> to vector<2xf32>
    %10 = vector.shape_cast %9 : vector<2xf32> to vector<2x1xf32>
    %cst_3 = arith.constant 1.280000e+02 : f32
    %11 = vector.broadcast %cst_3 : f32 to vector<2x1xf32>
    %12 = arith.divf %10, %11 : vector<2x1xf32>
    %13 = vector.broadcast %5 : vector<2x1xf32> to vector<2x128xf32>
    %14 = arith.subf %1, %13 : vector<2x128xf32>
    %cst_4 = arith.constant 9.99999974E-6 : f32
    %15 = vector.broadcast %cst_4 : f32 to vector<2x1xf32>
    %16 = arith.addf %12, %15 : vector<2x1xf32>
    %17 = math.rsqrt %16 : vector<2x1xf32>
    %18 = vector.broadcast %17 : vector<2x1xf32> to vector<2x128xf32>
    %19 = arith.mulf %14, %18 : vector<2x128xf32>
    %c0_5 = arith.constant 0 : index
    %c0_6 = arith.constant 0 : index
    %20 = vector.load %arg3[%c0_5, %c0_6] : memref<1x128xf32, #tpu.memory_space<vmem>>, vector<1x128xf32>
    %21 = vector.broadcast %20 : vector<1x128xf32> to vector<2x128xf32>
    %22 = arith.mulf %19, %21 : vector<2x128xf32>
    %c0_7 = arith.constant 0 : index
    %c0_8 = arith.constant 0 : index
    %23 = vector.load %arg4[%c0_7, %c0_8] : memref<1x128xf32, #tpu.memory_space<vmem>>, vector<1x128xf32>
    %24 = vector.broadcast %23 : vector<1x128xf32> to vector<2x128xf32>
    %25 = arith.addf %22, %24 : vector<2x128xf32>
    %26 = arith.truncf %25 : vector<2x128xf32> to vector<2x128xbf16>
    %c0_9 = arith.constant 0 : index
    %c0_10 = arith.constant 0 : index
    %27 = vector.load %arg5[%c0_9, %c0_10] : memref<128x128xbf16, #tpu.memory_space<vmem>>, vector<128x128xbf16>
    %cst_11 = arith.constant dense<0.000000e+00> : vector<2x128xf32>
    %28 = tpu.matmul %26, %27, %cst_11 {dimension_numbers = #tpu.dot_dimension_numbers<[1], [0], [0], [1], [0, 0, 1, 1], [], []>} : vector<2x128xbf16>, vector<128x128xbf16>, vector<2x128xf32> -> vector<2x128xf32>
    %c0_12 = arith.constant 0 : index
    %c0_13 = arith.constant 0 : index
    %29 = vector.load %arg6[%c0_12, %c0_13] : memref<1x128xf32, #tpu.memory_space<vmem>>, vector<1x128xf32>
    %30 = vector.broadcast %29 : vector<1x128xf32> to vector<2x128xf32>
    %31 = arith.addf %28, %30 : vector<2x128xf32>
    %c0_14 = arith.constant 0 : index
    %c0_15 = arith.constant 0 : index
    %32 = vector.load %arg7[%c0_14, %c0_15] : memref<2x128xf32, #tpu.memory_space<vmem>>, vector<2x128xf32>
    tpu.vector_store %arg7[%c0_14, %c0_15], %31 {strides = array<i32>} : memref<2x128xf32, #tpu.memory_space<vmem>>, vector<2x128xf32>,
    return
  }
  func.func @transform_0(%arg0: i32, %arg1: i32) -> (i32, i32) {
    %c0_i32 = arith.constant 0 : i32
    %c0_i32_0 = arith.constant 0 : i32
    return %arg0, %c0_i32 : i32, i32
  }
  func.func @transform_1(%arg0: i32, %arg1: i32) -> (i32, i32) {
    %c0_i32 = arith.constant 0 : i32
    %c0_i32_0 = arith.constant 0 : i32
    %c0_i32_1 = arith.constant 0 : i32
    return %c0_i32, %c0_i32_0 : i32, i32
  }
  func.func @transform_2(%arg0: i32, %arg1: i32) -> (i32, i32) {
    %c0_i32 = arith.constant 0 : i32
    %c0_i32_0 = arith.constant 0 : i32
    %c0_i32_1 = arith.constant 0 : i32
    return %c0_i32, %c0_i32_0 : i32, i32
  }
  func.func @transform_3(%arg0: i32, %arg1: i32) -> (i32, i32) {
    %c0_i32 = arith.constant 0 : i32
    %c0_i32_0 = arith.constant 0 : i32
    return %c0_i32, %arg1 : i32, i32
  }
  func.func @transform_4(%arg0: i32, %arg1: i32) -> (i32, i32) {
    %c0_i32 = arith.constant 0 : i32
    %c0_i32_0 = arith.constant 0 : i32
    return %c0_i32, %arg1 : i32, i32
  }
  func.func @transform_5(%arg0: i32, %arg1: i32) -> (i32, i32) {
    %c0_i32 = arith.constant 0 : i32
    return %arg0, %arg1 : i32, i32
  }
}

</mosaic_0001>

<bundles_post_ra>
// kernel: frozen_clip_image_embedder_forward.14
= control target key start
LH: loop header
LB: loop body
LE: loop exit
PB: predicated region body
PF: predicated region fallthrough
CT: control target
= control target key end

     0   :  { %vm32_vm0 = vcmask 1041408   ;;  %s225_s0 = inlined_call_operand.vmem [shape: bf16[34,128], index: 0, kind: input, shape index: {}]   ;;  %s226_s1 = inlined_call_operand.vmem [shape: f32[1,128], index: 1, kind: input, shape index: {}]   ;;  %s227_s2 = inlined_call_operand.vmem [shape: f32[1,128], index: 2, kind: input, shape index: {}]   ;;  %s228_s3 = inlined_call_operand.vmem [shape: bf16[34,128], index: 3, kind: output, shape index: {}]  }
   0x1   :  { %v150_v0 = vld [vmem:[%s225_s0] sm:$0xff]   ;;  %v167_v1 = vld [vmem:[%s225_s0 + $0x8] sm:$0xff]   ;;  %v18_v2 = vld [vmem:[%s225_s0 + $0x10] sm:$0x1] }
   0x2   :  { %v152_v3 = vunpack.c.h.bf16 %v150_v0  ;;  %v151_v4 = vunpack.c.l.bf16 %v150_v0  ;;  %v23_v5 = vunpack.c.l.bf16 %v18_v2  ;;  %v155_v6 = vunpack.c.l.bf16 %v167_v1  ;;  %v137_v46 = vld [vmem:[%s226_s1] ss:$0 sm:$0xff] }
   0x3   :  { %v156_v8 = vunpack.c.h.bf16 %v167_v1  ;;  %v138_v49 = vld [vmem:[%s227_s2] ss:$0 sm:$0xff] }
   0x4   :  { %26 = vadd.xlane.f32.xlu1 %v152_v3  ;;  %24 = vadd.xlane.f32.xlu0 %v151_v4  ;;  %v33_v7 = vsel %vm32_vm0, %v23_v5, 0.0 }
   0x8   :  { %28 = vadd.xlane.f32.xlu1 %v155_v6  ;;  %34 = vadd.xlane.f32.xlu0 %v33_v7 }
   0xc   :  { %30 = vadd.xlane.f32.xlu0 %v156_v8 }
  0x91   :  { %v27_v9 = vpop.xlane.xlu1 %26  ;;  %v25_v10 = vpop.xlane.xlu0 %24 }
  0x92   :  { %v38_v11 = vmul.f32 0.0078125, %v27_v9  ;;  %v37_v12 = vmul.f32 0.0078125, %v25_v10 }
  0x94   :  { %v43_v13 = vsub.f32 %v152_v3, %v38_v11  ;;  %v42_v14 = vsub.f32 %v151_v4, %v37_v12 }
  0x95   :  { %v29_v15 = vpop.xlane.xlu1 %28  ;;  %v35_v16 = vpop.xlane.xlu0 %34 }
  0x96   :  { %v39_v17 = vmul.f32 0.0078125, %v29_v15  ;;  %v41_v18 = vmul.f32 0.0078125, %v35_v16  ;;  %v48_v19 = vmul.f32 %v43_v13, %v43_v13  ;;  %v47_v20 = vmul.f32 %v42_v14, %v42_v14 }
  0x98   :  { %v44_v21 = vsub.f32 %v155_v6, %v39_v17  ;;  %v46_v22 = vsub.f32 %v23_v5, %v41_v18  ;;  %54 = vadd.xlane.f32.xlu0 %v48_v19  ;;  %52 = vadd.xlane.f32.xlu1 %v47_v20 }
  0x99   :  { %v31_v23 = vpop.xlane.xlu0 %30 }
  0x9a   :  { %v40_v24 = vmul.f32 0.0078125, %v31_v23  ;;  %v49_v25 = vmul.f32 %v44_v21, %v44_v21  ;;  %v51_v26 = vmul.f32 %v46_v22, %v46_v22 }
  0x9c   :  { %v45_v27 = vsub.f32 %v156_v8, %v40_v24  ;;  %56 = vadd.xlane.f32.xlu1 %v49_v25  ;;  %v60_v29 = vsel %vm32_vm0, %v51_v26, 0.0 }
  0x9e   :  { %v50_v28 = vmul.f32 %v45_v27, %v45_v27 }
  0xa0   :  { %61 = vadd.xlane.f32.xlu1 %v60_v29  ;;  %58 = vadd.xlane.f32.xlu0 %v50_v28 }
 0x125   :  { %v53_v30 = vpop.xlane.xlu1 %52  ;;  %v55_v31 = vpop.xlane.xlu0 %54 }
 0x126   :  { %v63_v32 = vmul.f32 0.0078125, %v53_v30  ;;  %v64_v33 = vmul.f32 0.0078125, %v55_v31 }
 0x128   :  { %v68_v34 = vadd.f32 1e-05, %v63_v32  ;;  %v69_v35 = vadd.f32 1e-05, %v64_v33 }
 0x129   :  { %v57_v36 = vpop.xlane.xlu1 %56 }
 0x12a   :  { %169 = vrsqrt.f32 %v68_v34  ;;  %v65_v37 = vmul.f32 0.0078125, %v57_v36 }
 0x12b   :  { %171 = vrsqrt.f32 %v69_v35 }
 0x12c   :  { %v70_v38 = vadd.f32 1e-05, %v65_v37 }
 0x12d   :  { %v62_v39 = vpop.xlane.xlu1 %61  ;;  %v59_v40 = vpop.xlane.xlu0 %58 }
 0x12e   :  { %173 = vrsqrt.f32 %v70_v38  ;;  %v67_v41 = vmul.f32 0.0078125, %v62_v39  ;;  %v66_v42 = vmul.f32 0.0078125, %v59_v40 }
 0x130   :  { %v72_v43 = vadd.f32 1e-05, %v67_v41  ;;  %v71_v44 = vadd.f32 1e-05, %v66_v42 }
 0x132   :  { %175 = vrsqrt.f32 %v72_v43 }
 0x133   :  { %177 = vrsqrt.f32 %v71_v44 }
 0x134   :  { %v170_v45 = vpop.eup %169 }
 0x135   :  { %v172_v47 = vpop.eup %171  ;;  %v78_v48 = vmul.f32 %v170_v45, %v42_v14 }
 0x136   :  { %v79_v50 = vmul.f32 %v172_v47, %v43_v13 }
 0x137   :  { %v90_v51 = vmul.f32 %v137_v46, %v78_v48 }
 0x138   :  { %v174_v52 = vpop.eup %173  ;;  %v91_v53 = vmul.f32 %v137_v46, %v79_v50 }
 0x139   :  { %v102_v54 = vadd.f32 %v138_v49, %v90_v51  ;;  %v80_v56 = vmul.f32 %v174_v52, %v44_v21 }
 0x13a   :  { %v103_v55 = vadd.f32 %v138_v49, %v91_v53 }
 0x13b   :  { %v92_v61 = vmul.f32 %v137_v46, %v80_v56 }
 0x13c   :  { %v176_v57 = vpop.eup %175  ;;  %v160_v58 = vpack.c.bf16 %v103_v55, %v102_v54 }
 0x13d   :  { %v178_v59 = vpop.eup %177  ;;  %v82_v60 = vmul.f32 %v176_v57, %v46_v22  ;;  %v104_v2 = vadd.f32 %v138_v49, %v92_v61 }
 0x13e   :  { %161 = vst [vmem:[%s228_s3] sm:$0xff] %v160_v58   ;;  %v81_v62 = vmul.f32 %v178_v59, %v45_v27 }
 0x13f   :  { %v94_v63 = vmul.f32 %v137_v46, %v82_v60 }
 0x140   :  { %v93_v0 = vmul.f32 %v137_v46, %v81_v62 }
 0x141   :  { %v106_v1 = vadd.f32 %v138_v49, %v94_v63 }
 0x142   :  { %v105_v3 = vadd.f32 %v138_v49, %v93_v0 }
 0x143   :  { %v148_v4 = vpack.c.bf16 %v106_v1, %v106_v1 }
 0x144   :  { %v165_v5 = vpack.c.bf16 %v105_v3, %v104_v2 }
 0x145   :  { %132 = vst [vmem:[%s228_s3 + $0x10] sm:$0x1] %v148_v4 }
 0x146   :  { %168 = vst [vmem:[%s228_s3 + $0x8] sm:$0xff] %v165_v5  }

// kernel: frozen_clip_image_embedder_forward.15
= control target key start
LH: loop header
LB: loop body
LE: loop exit
PB: predicated region body
PF: predicated region fallthrough
CT: control target
= control target key end

     0   :  { %s1020_s18 = smov 0   ;;  %s1022_s19 = smov 0   ;;  %s1193_s0 = inlined_call_operand.vmem [shape: bf16[34,128], index: 0, kind: input, shape index: {}]   ;;  %s1194_s1 = inlined_call_operand.vmem [shape: f32[1,128], index: 1, kind: input, shape index: {}]   ;;  %s1195_s2 = inlined_call_operand.vmem [shape: f32[1,128], index: 2, kind: input, shape index: {}]   ;;  %s1196_s3 = inlined_call_operand.vmem [shape: bf16[128,384], index: 3, kind: input, shape index: {}]   ;;  %s1197_s4 = inlined_call_operand.vmem [shape: f32[1,384], index: 4, kind: input, shape index: {}]   ;;  %s1198_s5 = inlined_call_operand.vmem [shape: bf16[34,384], index: 5, kind: output, shape index: {}]  }
   0x1   :  { %s1024_s20 = smov 0   ;;  %s1026_s21 = smov 0  }
   0x2   :  { %s1028_s22 = smov 0  }
   0x3 LB: > { %s24_s23 = sadd.s32 1, %s982_s21  ;;  %s779_s24 = sadd.s32 4294967295, %s986_s22   ;;  %s986_s22 = sphi %s1028_s22, %s15_s22   ;;  %s982_s21 = sphi %s1026_s21, %s1203_s21   ;;  %s978_s20 = sphi %s1024_s20, %s1202_s20   ;;  %s974_s19 = sphi %s1022_s19, %s1201_s19   ;;  %s970_s18 = sphi %s1020_s18, %s1200_s18  }
   0x4   : > { %p25_p0 = scmp.ge.s32.totalorder %s24_s23, 3  ;;  %p109_p1 = scmp.ne.s32.totalorder %s974_s19, %s970_s18 }
   0x5   : > { %p110_p2 = scmp.eq.s32.totalorder %s986_s22, 0  ;;  %p167_p4 = scmp.eq.s32.totalorder %s779_s24, 2 }
   0x6   : > { %s1205_s23 = smov (%p25_p0, %s24_s23), 0  ;;  %s102_s26 = sadd.s32 1, %s974_s19 }
   0x7   : > { %p111_p3 = por %p110_p2, %p109_p1  ;;  %s99_s25 = ssub.s32 %s982_s21, %s1205_s23 }
   0x8   : > { %p100_p5 = scmp.eq.s32.totalorder %s99_s25, 0  ;;  %p1055_p6 = por %p167_p4, %p109_p1 }
   0x9   : > { %p783_p7 = scmp.ge.s32.totalorder %s986_s22, 3 }
   0xa   : > { %s1060_s28 = scalar_select %p100_p5, %s974_s19, %s102_s26  }
   0xb   : > { %204 = sbr.rel (%p783_p7) target bundleno = 32 (0x20), region = 28 }
  0x12   : > { %207 = sbr.rel (!%p111_p3) target bundleno = 32 (0x20), region = 32  ;;  %s209_s29 = sand.u32 (%p111_p3), 1, %s974_s19  }
  0x13   : > { %s785_s30 = sshll.u32 (%p111_p3), %s982_s21, 2  ;;  %s784_s6 = sshll.u32 (%p111_p3), %s209_s29, 6 }
  0x14   : > { %s1068_s9 = scalar_lea.vmem (%p111_p3), %s1196_s3, %s785_s30  ;;  %s211_s10 = scalar_lea.vmem (%p111_p3), [#allocation2], %s784_s6 }
  0x15   : > { %v229_v0 = vld [vmem:[%s1068_s9] sm:$0xf] (%p111_p3)  ;;  %v231_v1 = vld [vmem:[%s1068_s9 + $0xc] sm:$0xf] (%p111_p3)  ;;  %v233_v2 = vld [vmem:[%s1068_s9 + $0x18] sm:$0xf] (%p111_p3) }
  0x16   : > { %230 = vst [vmem:[%s211_s10] sm:$0xf] (%p111_p3), %v229_v0  ;;  %232 = vst [vmem:[%s211_s10 + $0x4] sm:$0xf] (%p111_p3), %v231_v1  ;;  %v235_v3 = vld [vmem:[%s1068_s9 + $0x24] sm:$0xf] (%p111_p3) }
  0x17   : > { %v237_v4 = vld [vmem:[%s1068_s9 + $0x30] sm:$0xf] (%p111_p3)  ;;  %234 = vst [vmem:[%s211_s10 + $0x8] sm:$0xf] (%p111_p3), %v233_v2  ;;  %236 = vst [vmem:[%s211_s10 + $0xc] sm:$0xf] (%p111_p3), %v235_v3 }
  0x18   : > { %238 = vst [vmem:[%s211_s10 + $0x10] sm:$0xf] (%p111_p3), %v237_v4  ;;  %v239_v5 = vld [vmem:[%s1068_s9 + $0x3c] sm:$0xf] (%p111_p3)  ;;  %v241_v6 = vld [vmem:[%s1068_s9 + $0x48] sm:$0xf] (%p111_p3) }
  0x19   : > { %v243_v7 = vld [vmem:[%s1068_s9 + $0x54] sm:$0xf]  ;;  %240 = vst [vmem:[%s211_s10 + $0x14] sm:$0xf] %v239_v5  ;;  %242 = vst [vmem:[%s211_s10 + $0x18] sm:$0xf] %v241_v6 }
  0x1a   : > { %244 = vst [vmem:[%s211_s10 + $0x1c] sm:$0xf] %v243_v7  ;;  %v245_v8 = vld [vmem:[%s1068_s9 + $0x60] sm:$0xf]  ;;  %v247_v9 = vld [vmem:[%s1068_s9 + $0x6c] sm:$0xf] }
  0x1b   : > { %v249_v10 = vld [vmem:[%s1068_s9 + $0x78] sm:$0xf]  ;;  %246 = vst [vmem:[%s211_s10 + $0x20] sm:$0xf] %v245_v8  ;;  %248 = vst [vmem:[%s211_s10 + $0x24] sm:$0xf] %v247_v9 }
  0x1c   : > { %250 = vst [vmem:[%s211_s10 + $0x28] sm:$0xf] %v249_v10  ;;  %v251_v11 = vld [vmem:[%s1068_s9 + $0x84] sm:$0xf]  ;;  %v253_v12 = vld [vmem:[%s1068_s9 + $0x90] sm:$0xf] }
  0x1d   : > { %v255_v13 = vld [vmem:[%s1068_s9 + $0x9c] sm:$0xf]  ;;  %252 = vst [vmem:[%s211_s10 + $0x2c] sm:$0xf] %v251_v11  ;;  %254 = vst [vmem:[%s211_s10 + $0x30] sm:$0xf] %v253_v12 }
  0x1e   : > { %256 = vst [vmem:[%s211_s10 + $0x34] sm:$0xf] %v255_v13  ;;  %v257_v14 = vld [vmem:[%s1068_s9 + $0xa8] sm:$0xf]  ;;  %v259_v15 = vld [vmem:[%s1068_s9 + $0xb4] sm:$0xf] }
  0x1f   : > { %258 = vst [vmem:[%s211_s10 + $0x38] sm:$0xf] %v257_v14  ;;  %260 = vst [vmem:[%s211_s10 + $0x3c] sm:$0xf] %v259_v15 }
  0x20 PF: > { %p786_p8 = scmp.ge.s32.totalorder %s986_s22, 1  ;;  %p320_p9 = scmp.lt.s32.totalorder %s986_s22, 4 }
  0x22   : > { %p321_p10 = pnand %p786_p8, %p320_p9 }
  0x23   : > { %v830_v16 = vld [vmem:[%s1193_s0 + $0x8] sm:$0xff] (!%p321_p10)   ;;  %v813_v17 = vld [vmem:[%s1193_s0] sm:$0xff] (!%p321_p10)   ;;  %v376_v20 = vld [vmem:[%s1193_s0 + $0x10] sm:$0x1] (!%p321_p10)  ;;  %vm390_vm0 = vcmask (!%p321_p10), 1041408   ;;  %s327_s17 = sand.u32 (!%p321_p10), 1, %s970_s18  }
  0x24   : > { %324 = sbr.rel (%p321_p10) target bundleno = 588 (0x24c), region = 77  ;;  %v818_v18 = vunpack.c.l.bf16 (!%p321_p10), %v830_v16  ;;  %v814_v19 = vunpack.c.l.bf16 (!%p321_p10), %v813_v17  ;;  %v819_v21 = vunpack.c.h.bf16 (!%p321_p10), %v830_v16  ;;  %v815_v22 = vunpack.c.h.bf16 (!%p321_p10), %v813_v17  ;;  %s787_s24 = sshll.u32 (!%p321_p10), %s327_s17, 6  ;;  %v788_v8 = vld [vmem:[%s1194_s1] ss:$0 sm:$0xff] (!%p321_p10) }
  0x25   : > { %v381_v23 = vunpack.c.l.bf16 (!%p321_p10), %v376_v20  ;;  %v988_v25 = vmov (!%p321_p10), 0.0   ;;  %s1103_s25 = scalar_lea.vmem (!%p321_p10), [#allocation2], %s787_s24  ;;  %vm989_vm1 = vmmov (!%p321_p10), 0   ;;  %v789_v13 = vld [vmem:[%s1195_s2] ss:$0 sm:$0xff] (!%p321_p10)  ;;  %p367_p11 = scmp.lt.s32.totalorder (!%p321_p10), %s978_s20, 2 }
  0x26   : > { %386 = vadd.xlane.f32.xlu0 (!%p321_p10), %v818_v18  ;;  %382 = vadd.xlane.f32.xlu1 (!%p321_p10), %v814_v19  ;;  %v930_v26 = vld [vmem:[%s1103_s25] sm:$0xff] (!%p321_p10)   ;;  %v931_v48 = vld [vmem:[%s1103_s25 + $0x8] sm:$0xff] (!%p321_p10)   ;;  %v932_v49 = vld [vmem:[%s1103_s25 + $0x10] sm:$0xff] (!%p321_p10)   ;;  %s887_s11 = smul.u32 (!%p321_p10), 20, %s327_s17 }
  0x27   : > { %v391_v24 = vsel (!%p321_p10), %vm390_vm0, %v381_v23, 0.0  ;;  %871 = vmatprep.subr.bf16.mxu1 (!%p321_p10), %v988_v25  ;;  %843 = vmatprep.subr.bf16.mxu0 (!%p321_p10), %v988_v25  ;;  %v933_v50 = vld [vmem:[%s1103_s25 + $0x18] sm:$0xff] (!%p321_p10)   ;;  %v934_v51 = vld [vmem:[%s1103_s25 + $0x20] sm:$0xff] (!%p321_p10)   ;;  %v935_v52 = vld [vmem:[%s1103_s25 + $0x28] sm:$0xff] (!%p321_p10)  }
  0x28   : > { %879 = vmatpush3.bf16.msra.mxu1 (!%p321_p10), %v930_v26  ;;  %844 = vmatpush3.bf16.msra.mxu0 (!%p321_p10), %v930_v26  ;;  %v936_v53 = vld [vmem:[%s1103_s25 + $0x30] sm:$0xff] (!%p321_p10)   ;;  %v937_v54 = vld [vmem:[%s1103_s25 + $0x38] sm:$0xff] (!%p321_p10)   ;;  %s360_s12 = scalar_lea.vmem (!%p321_p10), [#allocation3], %s887_s11 }
  0x29   : > { %872 = vmatprep.subr.bf16.mxu1 (!%p321_p10), %v988_v25  ;;  %845 = vmatprep.subr.bf16.mxu0 (!%p321_p10), %v988_v25 }
  0x2a   : > { %388 = vadd.xlane.f32.xlu0 (!%p321_p10), %v819_v21  ;;  %384 = vadd.xlane.f32.xlu1 (!%p321_p10), %v815_v22 }
  0x2b   : > { %863 = vmatprep.mubr.msk.bf16.mxu1 %vm989_vm1, %v988_v25  ;;  %859 = vmatprep.mubr.msk.bf16.mxu0 %vm989_vm1, %v988_v25  ;;  %s368_s7 = scalar_select %p367_p11, %s978_s20, 2 }
  0x2c   : > { %880 = vmatpush3.bf16.msra.mxu1 %v931_v48  ;;  %846 = vmatpush3.bf16.msra.mxu0 %v931_v48  ;;  %s804_s18 = sshll.u32 (%p1055_p6), %s978_s20, 2 }
  0x2d   : > { %873 = vmatprep.subr.bf16.mxu1 %v988_v25  ;;  %847 = vmatprep.subr.bf16.mxu0 %v988_v25  ;;  %s369_s10 = scalar_lea.vmem %s1197_s4, %s368_s7  ;;  %s632_s15 = scalar_lea.vmem (%p1055_p6), %s1198_s5, %s804_s18 }
  0x2e   : > { %392 = vadd.xlane.f32.xlu0 %v391_v24 }
  0x30   : > { %881 = vmatpush3.bf16.msra.mxu1 %v932_v49  ;;  %848 = vmatpush3.bf16.msra.mxu0 %v932_v49 }
  0x31   : > { %874 = vmatprep.subr.bf16.mxu1 %v988_v25  ;;  %849 = vmatprep.subr.bf16.mxu0 %v988_v25 }
  0x34   : > { %882 = vmatpush3.bf16.msra.mxu1 %v933_v50  ;;  %850 = vmatpush3.bf16.msra.mxu0 %v933_v50 }
  0x35   : > { %875 = vmatprep.subr.bf16.mxu1 %v988_v25  ;;  %851 = vmatprep.subr.bf16.mxu0 %v988_v25 }
  0x38   : > { %883 = vmatpush3.bf16.msra.mxu1 %v934_v51  ;;  %852 = vmatpush3.bf16.msra.mxu0 %v934_v51 }
  0x39   : > { %876 = vmatprep.subr.bf16.mxu1 %v988_v25  ;;  %853 = vmatprep.subr.bf16.mxu0 %v988_v25 }
  0x3c   : > { %884 = vmatpush3.bf16.msra.mxu1 %v935_v52  ;;  %854 = vmatpush3.bf16.msra.mxu0 %v935_v52 }
  0x3d   : > { %877 = vmatprep.subr.bf16.mxu1 %v988_v25  ;;  %855 = vmatprep.subr.bf16.mxu0 %v988_v25 }
  0x40   : > { %885 = vmatpush3.bf16.msra.mxu1 %v936_v53  ;;  %856 = vmatpush3.bf16.msra.mxu0 %v936_v53 }
  0x41   : > { %878 = vmatprep.subr.bf16.mxu1 %v988_v25  ;;  %857 = vmatprep.subr.bf16.mxu0 %v988_v25 }
  0x44   : > { %886 = vmatpush3.bf16.msra.mxu1 %v937_v54  ;;  %858 = vmatpush3.bf16.msra.mxu0 %v937_v54 }
  0xb3   : > { %v387_v27 = vpop.xlane.xlu0 %386  ;;  %v383_v28 = vpop.xlane.xlu1 %382 }
  0xb4   : > { %v397_v29 = vmul.f32 0.0078125, %v387_v27  ;;  %v395_v30 = vmul.f32 0.0078125, %v383_v28 }
  0xb6   : > { %v1108_v31 = vsub.f32 %v818_v18, %v397_v29  ;;  %v1110_v32 = vsub.f32 %v814_v19, %v395_v30 }
  0xb7   : > { %v389_v33 = vpop.xlane.xlu0 %388  ;;  %v385_v34 = vpop.xlane.xlu1 %384 }
  0xb8   : > { %v398_v35 = vmul.f32 0.0078125, %v389_v33  ;;  %v407_v36 = vmul.f32 %v1108_v31, %v1108_v31  ;;  %v396_v37 = vmul.f32 0.0078125, %v385_v34  ;;  %v405_v40 = vmul.f32 %v1110_v32, %v1110_v32 }
  0xba   : > { %v1114_v38 = vsub.f32 %v819_v21, %v398_v35  ;;  %414 = vadd.xlane.f32.xlu1 %v407_v36  ;;  %v1116_v39 = vsub.f32 %v815_v22, %v396_v37 }
  0xbb   : > { %v393_v41 = vpop.xlane.xlu0 %392 }
  0xbc   : > { %v399_v42 = vmul.f32 0.0078125, %v393_v41  ;;  %v408_v43 = vmul.f32 %v1114_v38, %v1114_v38  ;;  %v406_v45 = vmul.f32 %v1116_v39, %v1116_v39 }
  0xbe   : > { %v1122_v44 = vsub.f32 %v381_v23, %v399_v42  ;;  %416 = vadd.xlane.f32.xlu0 %v408_v43  ;;  %410 = vadd.xlane.f32.xlu1 %v405_v40 }
  0xc0   : > { %v409_v46 = vmul.f32 %v1122_v44, %v1122_v44 }
  0xc2   : > { %412 = vadd.xlane.f32.xlu0 %v406_v45  ;;  %v418_v47 = vsel %vm390_vm0, %v409_v46, 0.0 }
  0xc3   : > { %419 = vadd.xlane.f32.xlu1 %v418_v47 }
 0x147   : > { %v415_v55 = vpop.xlane.xlu1 %414 }
 0x148   : > { %v423_v56 = vmul.f32 0.0078125, %v415_v55 }
 0x14a   : > { %v428_v57 = vadd.f32 1e-05, %v423_v56 }
 0x14b   : > { %v417_v58 = vpop.xlane.xlu0 %416  ;;  %v411_v59 = vpop.xlane.xlu1 %410 }
 0x14c   : > { %938 = vrsqrt.f32 %v428_v57  ;;  %v424_v60 = vmul.f32 0.0078125, %v417_v58  ;;  %v421_v61 = vmul.f32 0.0078125, %v411_v59 }
 0x14e   : > { %v429_v62 = vadd.f32 1e-05, %v424_v60  ;;  %v426_v63 = vadd.f32 1e-05, %v421_v61 }
 0x14f   : > { %v413_v0 = vpop.xlane.xlu0 %412 }
 0x150   : > { %940 = vrsqrt.f32 %v429_v62  ;;  %v422_v1 = vmul.f32 0.0078125, %v413_v0  ;;  %v420_v2 = vpop.xlane.xlu1 %419 }
 0x151   : > { %942 = vrsqrt.f32 %v426_v63  ;;  %v425_v3 = vmul.f32 0.0078125, %v420_v2 }
 0x152   : > { %v427_v4 = vadd.f32 1e-05, %v422_v1 }
 0x153   : > { %v430_v5 = vadd.f32 1e-05, %v425_v3 }
 0x154   : > { %944 = vrsqrt.f32 %v427_v4 }
 0x155   : > { %946 = vrsqrt.f32 %v430_v5 }
 0x156   : > { %v939_v6 = vpop.eup %938 }
 0x157   : > { %v438_v7 = vmul.f32 %v939_v6, %v1108_v31 }
 0x159   : > { %v450_v12 = vmul.f32 %v788_v8, %v438_v7 }
 0x15a   : > { %v941_v9 = vpop.eup %940 }
 0x15b   : > { %v943_v10 = vpop.eup %942  ;;  %v439_v11 = vmul.f32 %v941_v9, %v1114_v38  ;;  %v462_v18 = vadd.f32 %v789_v13, %v450_v12 }
 0x15c   : > { %v436_v14 = vmul.f32 %v943_v10, %v1110_v32  ;;  %v790_v32 = vld [vmem:[%s369_s10] ss:$0 sm:$0xff] }
 0x15d   : > { %v451_v15 = vmul.f32 %v788_v8, %v439_v11 }
 0x15e   : > { %v945_v16 = vpop.eup %944  ;;  %v448_v21 = vmul.f32 %v788_v8, %v436_v14 }
 0x15f   : > { %v947_v17 = vpop.eup %946  ;;  %v463_v19 = vadd.f32 %v789_v13, %v451_v15  ;;  %v437_v20 = vmul.f32 %v945_v16, %v1116_v39 }
 0x160   : > { %v440_v22 = vmul.f32 %v947_v17, %v1122_v44  ;;  %v460_v27 = vadd.f32 %v789_v13, %v448_v21 }
 0x161   : > { %v466_v23 = vpack.c.bf16 %v463_v19, %v462_v18  ;;  %v449_v24 = vmul.f32 %v788_v8, %v437_v20 }
 0x162   : > { %v452_v26 = vmul.f32 %v788_v8, %v440_v22 }
 0x163   : > { %864 = vmatmul.mubr.bf16.vlgmr.msra.gmra.mrb[0].mxu1 %v466_v23  ;;  %v461_v28 = vadd.f32 %v789_v13, %v449_v24 }
 0x164   : > { %867 = vmatprep.mubr.msk.bf16.mxu1 %vm989_vm1, %v988_v25  ;;  %v464_v30 = vadd.f32 %v789_v13, %v452_v26 }
 0x165   : > { %v465_v29 = vpack.c.bf16 %v461_v28, %v460_v27 }
 0x166   : > { %v467_v31 = vpack.c.bf16 %v464_v30, %v464_v30 }
 0x167   : > { %860 = vmatmul.mubr.bf16.vlgmr.msra.gmra.mrb[0].mxu0 %v465_v29 }
 0x16b   : > { %868 = vmatmul.mubr.bf16.gmra.mrb[4].mxu1 %v467_v31 }
 0x236   : > { %v581_v33 = vpop.f32.mrb[0].mxu1 }
 0x237   : > { %v865_v34 = vpop.f32.mrb[1].mxu1  ;;  %v582_v36 = vadd.f32 %v790_v32, %v581_v33 }
 0x238   : > { %v584_v35 = vpop.f32.mrb[2].mxu1 }
 0x239   : > { %v585_v37 = vadd.f32 %v790_v32, %v584_v35  ;;  %v866_v25 = vpop.f32.mrb[3].mxu1 }
 0x23a   : > { %v573_v38 = vpop.f32.mrb[0].mxu0 }
 0x23b   : > { %v828_v39 = vpack.c.bf16 %v585_v37, %v582_v36  ;;  %v861_v40 = vpop.f32.mrb[1].mxu0  ;;  %v574_v42 = vadd.f32 %v790_v32, %v573_v38 }
 0x23c   : > { %v576_v41 = vpop.f32.mrb[2].mxu0 }
 0x23d   : > { %831 = vst [vmem:[%s360_s12 + $0x8] sm:$0xff] %v828_v39   ;;  %v577_v43 = vadd.f32 %v790_v32, %v576_v41  ;;  %v862_v44 = vpop.f32.mrb[3].mxu0  ;;  %627 = sbr.rel (!%p1055_p6) target bundleno = 588 (0x24c), region = 85 }
 0x23e   : > { %v589_v45 = vpop.f32.mrb[4].mxu1 }
 0x23f   : > { %v823_v46 = vpack.c.bf16 %v577_v43, %v574_v42  ;;  %v590_v47 = vadd.f32 %v790_v32, %v589_v45  ;;  %v869_v48 = vpop.f32.mrb[5].mxu1 }
 0x240   : > { %v592_v49 = vpop.f32.mrb[6].mxu1 }
 0x241   : > { %824 = vst [vmem:[%s360_s12] sm:$0xff] %v823_v46   ;;  %v811_v50 = vpack.c.bf16 %v590_v47, %v590_v47  ;;  %v870_v51 = vpop.f32.mrb[7].mxu1 }
 0x243   : > { %620 = vst [vmem:[%s360_s12 + $0x10] sm:$0x1] %v811_v50 }
 0x244   : > { %v652_v54 = vld [vmem:[%s360_s12 + $0x8] sm:$0xf]  ;;  %v654_v55 = vld [vmem:[%s360_s12 + $0xc] sm:$0xf] }
 0x245   : > { %653 = vst [vmem:[%s632_s15 + $0x18] sm:$0xf] %v652_v54  ;;  %655 = vst [vmem:[%s632_s15 + $0x24] sm:$0xf] %v654_v55 }
 0x248   : > { %v648_v52 = vld [vmem:[%s360_s12] sm:$0xf]  ;;  %v650_v53 = vld [vmem:[%s360_s12 + $0x4] sm:$0xf] }
 0x249   : > { %649 = vst [vmem:[%s632_s15] sm:$0xf] %v648_v52  ;;  %651 = vst [vmem:[%s632_s15 + $0xc] sm:$0xf] %v650_v53 }
 0x24a   : > { %v656_v56 = vld [vmem:[%s360_s12 + $0x10] sm:$0xf] }
 0x24b   : > { %657 = vst [vmem:[%s632_s15 + $0x30] sm:$0xf] %v656_v56 }
 0x24c PF: > { %s15_s22 = sadd.s32 1, %s986_s22   ;;  %s1200_s18 = smov %s974_s19 }
 0x24d   : > { %p12_p12 = scmp.ge.s32.totalorder %s15_s22, 5   ;;  %s1201_s19 = smov %s1060_s28 }
 0x24e   : > { %s1202_s20 = smov %s982_s21  ;;  %s1203_s21 = smov %s1205_s23 }
 0x24f   :  { %14 = sbr.rel (!%p12_p12) target bundleno = 3 (0x3), region = 163 }

// kernel: frozen_clip_image_embedder_forward.13
= control target key start
LH: loop header
LB: loop body
LE: loop exit
PB: predicated region body
PF: predicated region fallthrough
CT: control target
= control target key end

     0   :  { %v332_v0 = vmov 0   ;;  %vm145_vm0 = vcmask 523264   ;;  %s434_s1 = inlined_call_operand.vmem [shape: bf16[192,128], index: 1, kind: input, shape index: {}]   ;;  %s435_s0 = inlined_call_operand.vmem [shape: bf16[32,192], index: 0, kind: input, shape index: {}]   ;;  %s436_s2 = inlined_call_operand.vmem [shape: f32[1,128], index: 2, kind: input, shape index: {}]   ;;  %s437_s3 = inlined_call_operand.vmem [shape: bf16[32,128], index: 3, kind: output, shape index: {}]  }
   0x1   :  { %152 = vmatprep.subr.bf16.mxu0 %v332_v0  ;;  %289 = vmatprep.subr.bf16.mxu1 %v332_v0  ;;  %v314_v1 = vld [vmem:[%s434_s1] sm:$0xff]   ;;  %v315_v2 = vld [vmem:[%s434_s1 + $0x8] sm:$0xff]   ;;  %v316_v3 = vld [vmem:[%s434_s1 + $0x10] sm:$0xff]  }
   0x2   :  { %153 = vmatpush1.bf16.msra.mxu0 %v314_v1  ;;  %301 = vmatpush1.bf16.msra.mxu1 %v314_v1  ;;  %v317_v4 = vld [vmem:[%s434_s1 + $0x18] sm:$0xff]   ;;  %v328_v5 = vld [vmem:[%s435_s0 + $0x4] ss:$8 sps:$4 sm:$0xff]   ;;  %v320_v9 = vld [vmem:[%s434_s1 + $0x30] sm:$0xff]  }
   0x3   :  { %154 = vmatprep.subr.bf16.mxu0 %v332_v0  ;;  %290 = vmatprep.subr.bf16.mxu1 %v332_v0  ;;  %v318_v6 = vld [vmem:[%s434_s1 + $0x20] sm:$0xff]   ;;  %v331_v7 = vld [vmem:[%s435_s0 + $0x14] ss:$8 sps:$4 sm:$0xff]   ;;  %v319_v8 = vld [vmem:[%s434_s1 + $0x28] sm:$0xff]  }
   0x4   :  { %267 = vmatprep.mubr.msk.bf16.mxu0 %vm145_vm0, %v328_v5  ;;  %268 = vmatprep.mubr.msk.bf16.mxu1 %vm145_vm0, %v331_v7  ;;  %v321_v10 = vld [vmem:[%s434_s1 + $0x38] sm:$0xff]   ;;  %v322_v11 = vld [vmem:[%s434_s1 + $0x40] sm:$0xff]   ;;  %v323_v12 = vld [vmem:[%s434_s1 + $0x48] sm:$0xff]  }
   0x5   :  { %v324_v13 = vld [vmem:[%s434_s1 + $0x50] sm:$0xff]   ;;  %v325_v14 = vld [vmem:[%s434_s1 + $0x58] sm:$0xff]   ;;  %v326_v15 = vld [vmem:[%s435_s0] ss:$8 sps:$4 sm:$0xff]  }
   0x6   :  { %155 = vmatpush1.bf16.msra.mxu0 %v315_v2  ;;  %302 = vmatpush1.bf16.msra.mxu1 %v315_v2  ;;  %v329_v16 = vld [vmem:[%s435_s0 + $0x10] ss:$8 sps:$4 sm:$0xff]   ;;  %v269_v18 = vld [vmem:[%s436_s2] ss:$0 sm:$0xff] }
   0x7   :  { %156 = vmatprep.subr.bf16.mxu0 %v332_v0  ;;  %291 = vmatprep.subr.bf16.mxu1 %v332_v0 }
   0xa   :  { %157 = vmatpush1.bf16.msra.mxu0 %v316_v3  ;;  %303 = vmatpush1.bf16.msra.mxu1 %v316_v3 }
   0xb   :  { %158 = vmatprep.subr.bf16.mxu0 %v332_v0  ;;  %292 = vmatprep.subr.bf16.mxu1 %v332_v0 }
   0xe   :  { %159 = vmatpush1.bf16.msra.mxu0 %v317_v4  ;;  %304 = vmatpush1.bf16.msra.mxu1 %v317_v4 }
   0xf   :  { %160 = vmatprep.subr.bf16.mxu0 %v332_v0  ;;  %293 = vmatprep.subr.bf16.mxu1 %v332_v0 }
  0x12   :  { %161 = vmatpush1.bf16.msra.mxu0 %v318_v6  ;;  %305 = vmatpush1.bf16.msra.mxu1 %v318_v6 }
  0x13   :  { %162 = vmatprep.subr.bf16.mxu0 %v332_v0  ;;  %294 = vmatprep.subr.bf16.mxu1 %v332_v0 }
  0x16   :  { %163 = vmatpush1.bf16.msra.mxu0 %v319_v8  ;;  %306 = vmatpush1.bf16.msra.mxu1 %v319_v8 }
  0x17   :  { %164 = vmatprep.subr.bf16.mxu0 %v332_v0  ;;  %295 = vmatprep.subr.bf16.mxu1 %v332_v0 }
  0x1a   :  { %165 = vmatpush1.bf16.msra.mxu0 %v320_v9  ;;  %307 = vmatpush1.bf16.msra.mxu1 %v320_v9 }
  0x1b   :  { %166 = vmatprep.subr.bf16.mxu0 %v332_v0  ;;  %296 = vmatprep.subr.bf16.mxu1 %v332_v0 }
  0x1e   :  { %167 = vmatpush1.bf16.msra.mxu0 %v321_v10  ;;  %308 = vmatpush1.bf16.msra.mxu1 %v321_v10 }
  0x1f   :  { %168 = vmatprep.subr.bf16.mxu0 %v332_v0  ;;  %297 = vmatprep.subr.bf16.mxu1 %v332_v0 }
  0x22   :  { %169 = vmatpush1.bf16.msra.mxu0 %v322_v11  ;;  %309 = vmatpush1.bf16.msra.mxu1 %v322_v11 }
  0x23   :  { %170 = vmatprep.subr.bf16.mxu0 %v332_v0  ;;  %298 = vmatprep.subr.bf16.mxu1 %v332_v0 }
  0x26   :  { %171 = vmatpush1.bf16.msra.mxu0 %v323_v12  ;;  %310 = vmatpush1.bf16.msra.mxu1 %v323_v12 }
  0x27   :  { %172 = vmatprep.subr.bf16.mxu0 %v332_v0  ;;  %299 = vmatprep.subr.bf16.mxu1 %v332_v0 }
  0x2a   :  { %173 = vmatpush1.bf16.msra.mxu0 %v324_v13  ;;  %311 = vmatpush1.bf16.msra.mxu1 %v324_v13 }
  0x2b   :  { %174 = vmatprep.subr.bf16.mxu0 %v332_v0  ;;  %300 = vmatprep.subr.bf16.mxu1 %v332_v0 }
  0x2e   :  { %175 = vmatpush1.bf16.msra.mxu0 %v325_v14  ;;  %312 = vmatpush1.bf16.msra.mxu1 %v325_v14 }
  0x31   :  { %185 = vmatmul.mubr.bf16.vlgmr.msra.gmra.mrb[0].mxu0 %v326_v15  ;;  %193 = vmatmul.mubr.bf16.vlgmr.msra.gmra.mrb[0].mxu1 %v329_v16 }
 0x104   :  { %v186_v17 = vpop.f32.mrb[0].mxu0  ;;  %v194_v19 = vpop.f32.mrb[0].mxu1 }
 0x105   :  { %v188_v20 = vpop.f32.mrb[1].mxu0  ;;  %v196_v21 = vpop.f32.mrb[1].mxu1  ;;  %v223_v24 = vadd.f32 %v269_v18, %v186_v17  ;;  %v225_v25 = vadd.f32 %v269_v18, %v194_v19 }
 0x106   :  { %v189_v22 = vpop.f32.mrb[2].mxu0  ;;  %v197_v23 = vpop.f32.mrb[2].mxu1 }
 0x107   :  { %v224_v26 = vadd.f32 %v269_v18, %v189_v22  ;;  %v226_v27 = vadd.f32 %v269_v18, %v197_v23  ;;  %v191_v28 = vpop.f32.mrb[3].mxu0  ;;  %v199_v29 = vpop.f32.mrb[3].mxu1 }
 0x109   :  { %v281_v30 = vpack.c.bf16 %v224_v26, %v223_v24  ;;  %v286_v31 = vpack.c.bf16 %v226_v27, %v225_v25 }
 0x10b   :  { %282 = vst [vmem:[%s437_s3] sm:$0xff] %v281_v30   ;;  %288 = vst [vmem:[%s437_s3 + $0x8] sm:$0xff] %v286_v31  }

// kernel: frozen_clip_image_embedder_forward.16
= control target key start
LH: loop header
LB: loop body
LE: loop exit
PB: predicated region body
PF: predicated region fallthrough
CT: control target
= control target key end

     0   :  { %s1602_s6 = smov 0   ;;  %s1890_s0 = inlined_call_operand.vmem [shape: bf16[2,17,384], index: 0, kind: input, shape index: {}]   ;;  %s1891_s1 = inlined_call_operand.vmem [shape: bf16[2,17,128], index: 1, kind: output, shape index: {}]  }
   0x1 LB: > { %s1204_s7 = sadd.s32 4294967295, %s1584_s6   ;;  %p1208_p0 = scmp.ge.s32.totalorder %s1584_s6, 1  ;;  %s1584_s6 = sphi %s1602_s6, %s11_s6  }
   0x2   : > { %p87_p1 = scmp.lt.s32.totalorder %s1584_s6, 3 }
   0x4   : > { %p88_p2 = pnand %p1208_p0, %p87_p1 }
   0x5   : > { %p107_p3 = scmp.lt.s32.totalorder (!%p88_p2), %s1204_s7, 1  ;;  %v1586_v0 = vmov (!%p88_p2), 0.0|0.0   ;;  %vm1587_vm0 = vmmov (!%p88_p2), 0   ;;  %v1588_v1 = vmov (!%p88_p2), 0.0   ;;  %vm132_vm1 = vcmask (!%p88_p2), 261120   ;;  %s1589_s12 = smov (!%p88_p2), 96  }
   0x6   : > { %91 = sbr.rel (%p88_p2) target bundleno = 1553 (0x611), region = 24  ;;  %1432 = vmatprep.subr.bf16.mxu0 (!%p88_p2), %v1586_v0  ;;  %1318 = vmatprep.mubr.msk.f32.mxu0 (!%p88_p2), %vm1587_vm0, %v1588_v1  ;;  %vm1628_vm2 = vmpackc.low (!%p88_p2), %vm132_vm1, %vm132_vm1  ;;  %vm234_vm3 = vcmask (!%p88_p2), 138240   ;;  %vm241_vm4 = vcmask (!%p88_p2), 131072   ;;  %vm278_vm5 = vcmask (!%p88_p2), 1040384   ;;  %s1590_s13 = smov (!%p88_p2), 64   ;;  %vm1120_vm6 = vcmask (!%p88_p2), 523264  }
   0x7   : > { %1436 = vmatprep.subr.bf16.mxu1 (!%p88_p2), %v1586_v0  ;;  %1333 = vmatprep.mubr.msk.f32.mxu1 (!%p88_p2), %vm1587_vm0, %v1588_v1  ;;  %s1591_s14 = smov (!%p88_p2), 32   ;;  %vm1124_vm7 = vcmask (!%p88_p2), 785408   ;;  %vm1144_vm8 = vsmask.f32 (!%p88_p2), 256 }
   0x8   : > { %vm1145_vm9 = vmand (!%p88_p2), %vm278_vm5, %vm1144_vm8 }
   0xd   : > { %s1895_s7 = smov (!%p107_p3, %s1204_s7), 1 }
   0xe   : > { %s1462_s8 = smul.u32 36, %s1895_s7 }
   0xf   : > { %s1463_s15 = smul.u32 12, %s1895_s7 }
  0x10   : > { %s1622_s11 = scalar_lea.vmem %s1890_s0, %s1462_s8 }
  0x11   : > { %v117_v2 = vld [vmem:[%s1622_s11] sm:$0xff]  ;;  %v119_v3 = vld [vmem:[%s1622_s11 + $0xc] sm:$0xff]  ;;  %v121_v6 = vld [vmem:[%s1622_s11 + $0x18] sm:$0x11]  ;;  %s116_s18 = scalar_lea.vmem %s1891_s1, %s1463_s15 }
  0x12   : > { %v1460_v5 = vcombine.high %v117_v2, %v119_v3  ;;  %v1636_v7 = vunpack.c.h.bf16 %v121_v6  ;;  %v1638_v8 = vunpack.c.l.bf16 %v117_v2  ;;  %v1645_v9 = vunpack.c.l.bf16 %v119_v3  ;;  %v1665_v35 = vld [vmem:[%s1622_s11 + $0x8] sm:$0xf]  ;;  %v1668_v36 = vld [vmem:[%s1622_s11 + $0x14] sm:$0xf]  ;;  %v122_v39 = vld [vmem:[%s1622_s11 + $0x20] sm:$0x1] }
  0x13   : > { %v1651_v10 = vunpack.c.l.bf16 %v121_v6  ;;  %v124_v33 = vunpack.c.h.bf16 %v117_v2  ;;  %v127_v34 = vunpack.c.h.bf16 %v119_v3  ;;  %v1461_v37 = vcombine.low %v1665_v35, %v1668_v36 }
  0x14   : > { %1435 = vmatpush3.bf16.xpose.msk.msra.mxu0 %vm1628_vm2, %v1460_v5  ;;  %v1676_v40 = vunpack.c.l.bf16 %v122_v39 }
  0x15   : > { %1316 = vmatprep.subr.mxu0 %v1588_v1  ;;  %1438 = vmatpush3.bf16.msra.mxu1 %v1461_v37  ;;  %v1483_v38 = vpack.i.bf16 %v127_v34, %v124_v33  ;;  %v1488_v41 = vpack.i.bf16 %v1651_v10, %v1645_v9 }
  0x16   : > { %1331 = vmatprep.subr.mxu1 %v1588_v1 }
  0x19   : > { %1332 = vmatpush3.msk.msra.mxu1 %vm278_vm5, %v1676_v40 }
  0x1a   : > { %1439 = vmatprep.subr.bf16.mxu1 %v1586_v0 }
  0x1c   : > { %1317 = vmatpush3.xpose.msk.msra.mxu0 %vm132_vm1, %v1636_v7 }
  0x1d   : > { %1443 = vmatprep.subr.bf16.mxu0 %v1586_v0 }
  0x1f   : > { %1319 = vmatmul.mubr.msk.f32.vlgmr.msra.gmra.mrb[0].mxu0 %vm132_vm1, %v1638_v8 }
  0x20   : > { %1321 = vmatprep.mubr.msk.f32.mxu0 %vm1587_vm0, %v1588_v1 }
  0x23   : > { %1322 = vmatmul.mubr.msk.f32.gmra.mrb[2].mxu0 %vm132_vm1, %v1645_v9 }
  0x24   : > { %1324 = vmatprep.mubr.msk.f32.mxu0 %vm1587_vm0, %v1588_v1 }
  0x27   : > { %1325 = vmatmul.mubr.msk.f32.gmra.mrb[4].mxu0 %vm132_vm1, %v1651_v10 }
  0x28   : > { %1363 = vmatprep.mubr.msk.f32.mxu0 %vm1587_vm0, %v1588_v1 }
  0xf2   : > { %v217_v11 = vpop.f32.mrb[0].mxu0 }
  0xf3   : > { %v231_v12 = vmul.f32 0.17677669, %v217_v11  ;;  %v1320_v13 = vpop.f32.mrb[1].mxu0 }
  0xf5   : > { %v235_v14 = vsel %vm234_vm3, %v231_v12, -inf }
  0xf6   : > { %236 = vmax.xlane.f32.xlu0 %v235_v14  ;;  %v222_v15 = vpop.f32.mrb[2].mxu0 }
  0xf7   : > { %v232_v16 = vmul.f32 0.17677669, %v222_v15  ;;  %v1323_v17 = vpop.f32.mrb[3].mxu0 }
  0xf9   : > { %v238_v18 = vsel %vm234_vm3, %v232_v16, -inf }
  0xfa   : > { %239 = vmax.xlane.f32.xlu0 %v238_v18  ;;  %v227_v19 = vpop.f32.mrb[4].mxu0 }
  0xfb   : > { %v233_v20 = vmul.f32 0.17677669, %v227_v19  ;;  %v1326_v21 = vpop.f32.mrb[5].mxu0 }
  0xfd   : > { %v242_v22 = vsel %vm241_vm4, %v233_v20, -inf }
  0xfe   : > { %243 = vmax.xlane.f32.xlu1 %v242_v22 }
 0x183   : > { %v237_v23 = vpop.xlane.xlu0 %236 }
 0x184   : > { %v245_v24 = vsub.f32 %v231_v12, %v237_v23 }
 0x186   : > { %v248_v25 = vmul.f32 1.442695, %v245_v24 }
 0x187   : > { %v240_v26 = vpop.xlane.xlu0 %239 }
 0x188   : > { %1530 = vpow2.f32 %v248_v25  ;;  %v246_v27 = vsub.f32 %v232_v16, %v240_v26 }
 0x18a   : > { %v250_v28 = vmul.f32 1.442695, %v246_v27 }
 0x18b   : > { %v244_v42 = vpop.xlane.xlu1 %243 }
 0x18c   : > { %1532 = vpow2.f32 %v250_v28  ;;  %v247_v43 = vsub.f32 %v233_v20, %v244_v42 }
 0x18e   : > { %v252_v44 = vmul.f32 1.442695, %v247_v43 }
 0x190   : > { %1534 = vpow2.f32 %v252_v44 }
 0x192   : > { %v1531_v29 = vpop.eup %1530 }
 0x193   : > { %v254_v30 = vsel %vm234_vm3, %v1531_v29, 0.0 }
 0x194   : > { %255 = vadd.xlane.f32.xlu1 %v254_v30 }
 0x196   : > { %v1533_v31 = vpop.eup %1532 }
 0x197   : > { %v257_v32 = vsel %vm234_vm3, %v1533_v31, 0.0 }
 0x198   : > { %258 = vadd.xlane.f32.xlu0 %v257_v32 }
 0x19a   : > { %v1535_v45 = vpop.eup %1534 }
 0x19b   : > { %v260_v46 = vsel %vm241_vm4, %v1535_v45, 0.0 }
 0x1a5   : > { %372 = vrot.lane.b32.xlu1 %v1636_v7, %s1589_s12 }
 0x1a9   : > { %1484 = vrot.lane.b32.xlu1 %v1483_v38, %s1590_s13 }
 0x1ae   : > { %1479 = vrot.lane.b32.xlu0 %v1483_v38, %s1589_s12 }
 0x1b2   : > { %1489 = vrot.lane.b32.xlu0 %v1488_v41, %s1589_s12 }
 0x1b6   : > { %1494 = vrot.lane.b32.xlu0 %v1483_v38, %s1591_s14 }
 0x1ba   : > { %605 = vrot.lane.b32.xlu0 %v1645_v9, %s1590_s13 }
 0x1be   : > { %852 = vrot.lane.b32.xlu0 %v1636_v7, %s1591_s14 }
 0x1c2   : > { %844 = vrot.lane.b32.xlu0 %v1645_v9, %s1591_s14 }
 0x1cd   : > { %261 = vadd.xlane.f32.xlu1 %v260_v46 }
 0x1de   : > { %362 = vrot.lane.b32.xlu1 %v1638_v8, %s1589_s12 }
 0x1e2   : > { %613 = vrot.lane.b32.xlu1 %v1636_v7, %s1590_s13 }
 0x1e6   : > { %603 = vrot.lane.b32.xlu1 %v1638_v8, %s1590_s13 }
 0x1ea   : > { %607 = vrot.lane.b32.xlu1 %v1651_v10, %s1590_s13 }
 0x1ee   : > { %842 = vrot.lane.b32.xlu1 %v1638_v8, %s1591_s14 }
 0x1f2   : > { %846 = vrot.lane.b32.xlu1 %v1651_v10, %s1591_s14 }
 0x221   : > { %v256_v47 = vpop.xlane.xlu1 %255 }
 0x222   : > { %1536 = vrcp.f32 %v256_v47 }
 0x225   : > { %v259_v48 = vpop.xlane.xlu0 %258  ;;  %v373_v57 = vpop.permute.xlu1 %372 }
 0x226   : > { %1538 = vrcp.f32 %v259_v48 }
 0x229   : > { %v1480_v49 = vpop.permute.xlu0 %1479  ;;  %v1485_v58 = vpop.permute.xlu1 %1484 }
 0x22a   : > { %v1482_v50 = vunpack.i.h.bf16 %v1480_v49  ;;  %v1481_v51 = vunpack.i.l.bf16 %v1480_v49  ;;  %v1487_v62 = vunpack.i.h.bf16 %v1485_v58  ;;  %v1486_v63 = vunpack.i.l.bf16 %v1485_v58 }
 0x22c   : > { %v1537_v52 = vpop.eup %1536  ;;  %v1440_v53 = vpack.c.bf16 %v1482_v50, %v1481_v51  ;;  %v1447_v5 = vpack.c.bf16 %v1487_v62, %v1486_v63 }
 0x22d   : > { %v266_v54 = vmul.f32 %v1537_v52, %v1531_v29  ;;  %v1490_v3 = vpop.permute.xlu0 %1489 }
 0x22e   : > { %v1491_v6 = vunpack.i.l.bf16 %v1490_v3  ;;  %v1492_v11 = vunpack.i.h.bf16 %v1490_v3  ;;  %v128_v3 = vunpack.c.l.bf16 %v1668_v36 }
 0x22f   : > { %1334 = vmatmul.mubr.msk.f32.vlgmr.msra.gmra.mrb[0].mxu1 %vm234_vm3, %v266_v54 }
 0x230   : > { %v1539_v55 = vpop.eup %1538  ;;  %1442 = vmatpush3.bf16.xpose.msk.msra.mxu1 %vm1628_vm2, %v1440_v53  ;;  %1336 = vmatprep.mubr.msk.f32.mxu1 %vm1587_vm0, %v1588_v1 }
 0x231   : > { %v267_v56 = vmul.f32 %v1539_v55, %v1533_v31  ;;  %1346 = vmatprep.subr.mxu1 %v1588_v1  ;;  %v1495_v7 = vpop.permute.xlu0 %1494 }
 0x232   : > { %v1497_v9 = vunpack.i.h.bf16 %v1495_v7  ;;  %v1496_v10 = vunpack.i.l.bf16 %v1495_v7 }
 0x233   : > { %1337 = vmatmul.mubr.msk.f32.gmra.mrb[2].mxu1 %vm234_vm3, %v267_v56 }
 0x234   : > { %1339 = vmatprep.mubr.msk.f32.mxu1 %vm1587_vm0, %v1588_v1  ;;  %v1454_v12 = vpack.c.bf16 %v1497_v9, %v1496_v10 }
 0x235   : > { %v606_v14 = vpop.permute.xlu0 %605 }
 0x238   : > { %1347 = vmatpush3.xpose.msk.msra.mxu1 %vm132_vm1, %v373_v57 }
 0x239   : > { %1446 = vmatprep.subr.bf16.mxu1 %v1586_v0  ;;  %v853_v16 = vpop.permute.xlu0 %852 }
 0x23d   : > { %v845_v4 = vpop.permute.xlu0 %844 }
 0x25a   : > { %v262_v59 = vpop.xlane.xlu1 %261 }
 0x25b   : > { %1540 = vrcp.f32 %v262_v59 }
 0x25e   : > { %v363_v2 = vpop.permute.xlu1 %362 }
 0x262   : > { %v614_v8 = vpop.permute.xlu1 %613 }
 0x265   : > { %v1541_v60 = vpop.eup %1540 }
 0x266   : > { %v268_v61 = vmul.f32 %v1541_v60, %v1535_v45  ;;  %v604_v13 = vpop.permute.xlu1 %603 }
 0x268   : > { %1340 = vmatmul.mubr.msk.f32.gmra.mrb[4].mxu1 %vm234_vm3, %v268_v61 }
 0x269   : > { %1348 = vmatprep.mubr.msk.f32.mxu1 %vm1587_vm0, %v1588_v1 }
 0x26a   : > { %v608_v15 = vpop.permute.xlu1 %607 }
 0x26c   : > { %1349 = vmatmul.mubr.msk.f32.vlgmr.msra.gmra.mrb[6].mxu1 %vm132_vm1, %v363_v2  ;;  %v125_v2 = vunpack.c.l.bf16 %v1665_v35 }
 0x26d   : > { %1449 = vmatpush3.bf16.xpose.msk.msra.mxu1 %vm1628_vm2, %v1447_v5  ;;  %1351 = vmatprep.mubr.msk.f32.mxu1 %vm1587_vm0, %v1588_v1 }
 0x26e   : > { %1376 = vmatprep.subr.mxu1 %v1588_v1  ;;  %v843_v17 = vpop.permute.xlu1 %842  ;;  %v1776_v5 = vpack.i.bf16 %v128_v3, %v125_v2 }
 0x270   : > { %1352 = vmatmul.mubr.msk.f32.gmra.mrb[8].mxu1 %vm132_vm1, %v1491_v6 }
 0x271   : > { %1354 = vmatprep.mubr.msk.f32.mxu1 %vm1587_vm0, %v1588_v1 }
 0x272   : > { %v847_v18 = vpop.permute.xlu1 %846 }
 0x274   : > { %1355 = vmatmul.mubr.msk.f32.gmra.mrb[10].mxu1 %vm132_vm1, %v1492_v11 }
 0x275   : > { %1377 = vmatpush3.xpose.msk.msra.mxu1 %vm132_vm1, %v614_v8  ;;  %1378 = vmatprep.mubr.msk.f32.mxu1 %vm1587_vm0, %v1588_v1 }
 0x276   : > { %1453 = vmatprep.subr.bf16.mxu1 %v1586_v0 }
 0x278   : > { %1379 = vmatmul.mubr.msk.f32.vlgmr.msra.gmra.mrb[12].mxu1 %vm132_vm1, %v604_v13 }
 0x279   : > { %1456 = vmatpush3.bf16.xpose.msk.msra.mxu1 %vm1628_vm2, %v1454_v12  ;;  %1381 = vmatprep.mubr.msk.f32.mxu1 %vm1587_vm0, %v1588_v1 }
 0x27a   : > { %1406 = vmatprep.subr.mxu1 %v1588_v1 }
 0x27c   : > { %1382 = vmatmul.mubr.msk.f32.gmra.mrb[14].mxu1 %vm132_vm1, %v606_v14 }
 0x27d   : > { %1384 = vmatprep.mubr.msk.f32.mxu1 %vm1587_vm0, %v1588_v1 }
 0x280   : > { %1385 = vmatmul.mubr.msk.f32.gmra.mrb[16].mxu1 %vm132_vm1, %v608_v15 }
 0x281   : > { %1407 = vmatpush3.xpose.msk.msra.mxu1 %vm132_vm1, %v853_v16  ;;  %1408 = vmatprep.mubr.msk.f32.mxu1 %vm1587_vm0, %v1588_v1 }
 0x284   : > { %1409 = vmatmul.mubr.msk.f32.vlgmr.msra.gmra.mrb[18].mxu1 %vm132_vm1, %v843_v17 }
 0x285   : > { %1411 = vmatprep.mubr.msk.f32.mxu1 %vm1587_vm0, %v1588_v1 }
 0x288   : > { %1412 = vmatmul.mubr.msk.f32.gmra.mrb[20].mxu1 %vm132_vm1, %v845_v4 }
 0x289   : > { %1414 = vmatprep.mubr.msk.f32.mxu1 %vm1587_vm0, %v1588_v1 }
 0x28c   : > { %1415 = vmatmul.mubr.msk.f32.gmra.mrb[22].mxu1 %vm132_vm1, %v847_v18 }
 0x302   : > { %v1754_v19 = vpop.f32.mrb[0].mxu1 }
 0x303   : > { %v1335_v20 = vpop.f32.mrb[1].mxu1 }
 0x306   : > { %v1756_v21 = vpop.f32.mrb[2].mxu1 }
 0x307   : > { %v1338_v22 = vpop.f32.mrb[3].mxu1 }
 0x33b   : > { %v1758_v23 = vpop.f32.mrb[4].mxu1 }
 0x33c   : > { %v1341_v24 = vpop.f32.mrb[5].mxu1 }
 0x33f   : > { %v452_v25 = vpop.f32.mrb[6].mxu1 }
 0x340   : > { %v466_v26 = vmul.f32 0.17677669, %v452_v25  ;;  %v1350_v27 = vpop.f32.mrb[7].mxu1 }
 0x342   : > { %v469_v28 = vsel %vm234_vm3, %v466_v26, -inf }
 0x343   : > { %470 = vmax.xlane.f32.xlu0 %v469_v28  ;;  %v457_v29 = vpop.f32.mrb[8].mxu1 }
 0x344   : > { %v467_v30 = vmul.f32 0.17677669, %v457_v29  ;;  %v1353_v31 = vpop.f32.mrb[9].mxu1 }
 0x346   : > { %v472_v32 = vsel %vm234_vm3, %v467_v30, -inf }
 0x347   : > { %473 = vmax.xlane.f32.xlu1 %v472_v32  ;;  %v462_v33 = vpop.f32.mrb[10].mxu1 }
 0x348   : > { %v468_v34 = vmul.f32 0.17677669, %v462_v33  ;;  %v1356_v37 = vpop.f32.mrb[11].mxu1 }
 0x34a   : > { %v475_v38 = vsel %vm241_vm4, %v468_v34, -inf }
 0x34b   : > { %476 = vmax.xlane.f32.xlu0 %v475_v38  ;;  %v693_v39 = vpop.f32.mrb[12].mxu1 }
 0x34c   : > { %v707_v41 = vmul.f32 0.17677669, %v693_v39  ;;  %v1380_v42 = vpop.f32.mrb[13].mxu1 }
 0x34e   : > { %v710_v43 = vsel %vm234_vm3, %v707_v41, -inf }
 0x34f   : > { %711 = vmax.xlane.f32.xlu0 %v710_v43  ;;  %v698_v44 = vpop.f32.mrb[14].mxu1 }
 0x350   : > { %v708_v45 = vmul.f32 0.17677669, %v698_v44  ;;  %v1383_v46 = vpop.f32.mrb[15].mxu1 }
 0x352   : > { %v713_v47 = vsel %vm234_vm3, %v708_v45, -inf }
 0x353   : > { %714 = vmax.xlane.f32.xlu0 %v713_v47  ;;  %v703_v48 = vpop.f32.mrb[16].mxu1 }
 0x354   : > { %v709_v49 = vmul.f32 0.17677669, %v703_v48  ;;  %v1386_v50 = vpop.f32.mrb[17].mxu1 }
 0x356   : > { %v716_v51 = vsel %vm241_vm4, %v709_v49, -inf }
 0x357   : > { %717 = vmax.xlane.f32.xlu1 %v716_v51  ;;  %v932_v52 = vpop.f32.mrb[18].mxu1 }
 0x358   : > { %v946_v53 = vmul.f32 0.17677669, %v932_v52  ;;  %v1410_v54 = vpop.f32.mrb[19].mxu1 }
 0x35a   : > { %v949_v55 = vsel %vm234_vm3, %v946_v53, -inf }
 0x35b   : > { %950 = vmax.xlane.f32.xlu0 %v949_v55  ;;  %v937_v56 = vpop.f32.mrb[20].mxu1 }
 0x35c   : > { %v1767_v57 = vmul.f32 0.17677669, %v937_v56  ;;  %v1413_v58 = vpop.f32.mrb[21].mxu1 }
 0x35e   : > { %v952_v59 = vsel %vm234_vm3, %v1767_v57, -inf }
 0x35f   : > { %953 = vmax.xlane.f32.xlu1 %v952_v59  ;;  %v942_v60 = vpop.f32.mrb[22].mxu1 }
 0x360   : > { %v948_v61 = vmul.f32 0.17677669, %v942_v60  ;;  %v1416_v62 = vpop.f32.mrb[23].mxu1 }
 0x362   : > { %v955_v63 = vsel %vm241_vm4, %v948_v61, -inf }
 0x363   : > { %956 = vmax.xlane.f32.xlu0 %v955_v63 }
 0x370   : > { %508 = vrot.lane.b32.xlu1 %v1676_v40, %s1589_s12 }
 0x374   : > { %1504 = vrot.lane.b32.xlu1 %v1776_v5, %s1590_s13 }
 0x379   : > { %1499 = vrot.lane.b32.xlu0 %v1776_v5, %s1589_s12 }
 0x3d0   : > { %v471_v6 = vpop.xlane.xlu0 %470 }
 0x3d1   : > { %v478_v7 = vsub.f32 %v466_v26, %v471_v6 }
 0x3d3   : > { %v481_v8 = vmul.f32 1.442695, %v478_v7 }
 0x3d4   : > { %v474_v9 = vpop.xlane.xlu1 %473 }
 0x3d5   : > { %1542 = vpow2.f32 %v481_v8  ;;  %v479_v10 = vsub.f32 %v467_v30, %v474_v9 }
 0x3d7   : > { %v483_v35 = vmul.f32 1.442695, %v479_v10 }
 0x3d8   : > { %v477_v11 = vpop.xlane.xlu0 %476 }
 0x3d9   : > { %1544 = vpow2.f32 %v483_v35  ;;  %v480_v36 = vsub.f32 %v468_v34, %v477_v11 }
 0x3db   : > { %v485_v12 = vmul.f32 1.442695, %v480_v36 }
 0x3dc   : > { %v712_v13 = vpop.xlane.xlu0 %711 }
 0x3dd   : > { %1546 = vpow2.f32 %v485_v12  ;;  %v719_v14 = vsub.f32 %v707_v41, %v712_v13 }
 0x3df   : > { %v1782_v15 = vpop.eup %1542  ;;  %v722_v16 = vmul.f32 1.442695, %v719_v14 }
 0x3e0   : > { %v715_v17 = vpop.xlane.xlu0 %714  ;;  %v487_v4 = vsel %vm234_vm3, %v1782_v15, 0.0 }
 0x3e1   : > { %1548 = vpow2.f32 %v722_v16  ;;  %v720_v18 = vsub.f32 %v708_v45, %v715_v17  ;;  %488 = vadd.xlane.f32.xlu1 %v487_v4 }
 0x3e3   : > { %v1786_v20 = vpop.eup %1544  ;;  %v724_v22 = vmul.f32 1.442695, %v720_v18 }
 0x3e4   : > { %v718_v24 = vpop.xlane.xlu1 %717  ;;  %v490_v25 = vsel %vm234_vm3, %v1786_v20, 0.0 }
 0x3e5   : > { %1550 = vpow2.f32 %v724_v22  ;;  %v721_v26 = vsub.f32 %v709_v49, %v718_v24  ;;  %491 = vadd.xlane.f32.xlu0 %v490_v25 }
 0x3e7   : > { %v1790_v27 = vpop.eup %1546  ;;  %v726_v28 = vmul.f32 1.442695, %v721_v26 }
 0x3e8   : > { %v951_v29 = vpop.xlane.xlu0 %950  ;;  %v493_v30 = vsel %vm241_vm4, %v1790_v27, 0.0 }
 0x3e9   : > { %1552 = vpow2.f32 %v726_v28  ;;  %v958_v31 = vsub.f32 %v946_v53, %v951_v29  ;;  %494 = vadd.xlane.f32.xlu1 %v493_v30 }
 0x3eb   : > { %v1794_v32 = vpop.eup %1548  ;;  %v961_v33 = vmul.f32 1.442695, %v958_v31 }
 0x3ec   : > { %v728_v34 = vsel %vm234_vm3, %v1794_v32, 0.0  ;;  %v954_v48 = vpop.xlane.xlu1 %953 }
 0x3ed   : > { %1554 = vpow2.f32 %v961_v33  ;;  %729 = vadd.xlane.f32.xlu0 %v728_v34  ;;  %v959_v55 = vsub.f32 %v1767_v57, %v954_v48 }
 0x3ef   : > { %v1798_v37 = vpop.eup %1550  ;;  %v963_v56 = vmul.f32 1.442695, %v959_v55 }
 0x3f0   : > { %v957_v38 = vpop.xlane.xlu0 %956  ;;  %v731_v39 = vsel %vm234_vm3, %v1798_v37, 0.0  ;;  %v509_v52 = vpop.permute.xlu1 %508 }
 0x3f1   : > { %v960_v41 = vsub.f32 %v948_v61, %v957_v38  ;;  %732 = vadd.xlane.f32.xlu1 %v731_v39 }
 0x3f3   : > { %v1802_v42 = vpop.eup %1552  ;;  %v965_v43 = vmul.f32 1.442695, %v960_v41 }
 0x3f4   : > { %v734_v44 = vsel %vm241_vm4, %v1802_v42, 0.0  ;;  %v1500_v45 = vpop.permute.xlu0 %1499  ;;  %v1505_v60 = vpop.permute.xlu1 %1504 }
 0x3f5   : > { %1556 = vpow2.f32 %v965_v43  ;;  %735 = vadd.xlane.f32.xlu1 %v734_v44  ;;  %v1502_v46 = vunpack.i.h.bf16 %v1500_v45  ;;  %v1501_v47 = vunpack.i.l.bf16 %v1500_v45  ;;  %v1507_v63 = vunpack.i.h.bf16 %v1505_v60 }
 0x3f6   : > { %1558 = vpow2.f32 %v963_v56  ;;  %v1506_v2 = vunpack.i.l.bf16 %v1505_v60 }
 0x3f7   : > { %v1806_v49 = vpop.eup %1554  ;;  %v1444_v50 = vpack.c.bf16 %v1502_v46, %v1501_v47 }
 0x3f8   : > { %v967_v51 = vsel %vm234_vm3, %v1806_v49, 0.0  ;;  %v1451_v7 = vpack.c.bf16 %v1507_v63, %v1506_v2 }
 0x3f9   : > { %968 = vadd.xlane.f32.xlu1 %v967_v51  ;;  %1445 = vmatpush3.bf16.msra.mxu0 %v1444_v50 }
 0x3fa   : > { %1361 = vmatprep.subr.mxu0 %v1588_v1 }
 0x3fd   : > { %1362 = vmatpush3.msk.msra.mxu0 %vm278_vm5, %v509_v52 }
 0x3fe   : > { %1450 = vmatprep.subr.bf16.mxu0 %v1586_v0 }
 0x3ff   : > { %v1813_v53 = vpop.eup %1556 }
 0x400   : > { %v973_v54 = vsel %vm241_vm4, %v1813_v53, 0.0  ;;  %v1822_v58 = vpop.eup %1558 }
 0x401   : > { %974 = vadd.xlane.f32.xlu1 %v973_v54  ;;  %v970_v59 = vsel %vm234_vm3, %v1822_v58, 0.0 }
 0x403   : > { %747 = vrot.lane.b32.xlu0 %v1676_v40, %s1590_s13 }
 0x412   : > { %1509 = vrot.lane.b32.xlu1 %v1776_v5, %s1591_s14 }
 0x422   : > { %971 = vadd.xlane.f32.xlu0 %v970_v59 }
 0x438   : > { %986 = vrot.lane.b32.xlu0 %v1676_v40, %s1591_s14 }
 0x46e   : > { %v489_v61 = vpop.xlane.xlu1 %488 }
 0x46f   : > { %1560 = vrcp.f32 %v489_v61 }
 0x472   : > { %v492_v62 = vpop.xlane.xlu0 %491 }
 0x473   : > { %1562 = vrcp.f32 %v492_v62 }
 0x476   : > { %v495_v57 = vpop.xlane.xlu1 %494 }
 0x477   : > { %1564 = vrcp.f32 %v495_v57 }
 0x479   : > { %v1561_v3 = vpop.eup %1560 }
 0x47a   : > { %v499_v5 = vmul.f32 %v1561_v3, %v1782_v15  ;;  %v730_v6 = vpop.xlane.xlu0 %729 }
 0x47b   : > { %1566 = vrcp.f32 %v730_v6 }
 0x47c   : > { %1364 = vmatmul.mubr.msk.f32.vlgmr.msra.gmra.mrb[6].mxu0 %vm234_vm3, %v499_v5 }
 0x47d   : > { %v1563_v8 = vpop.eup %1562  ;;  %1452 = vmatpush3.bf16.msra.mxu0 %v1451_v7  ;;  %1366 = vmatprep.mubr.msk.f32.mxu0 %vm1587_vm0, %v1588_v1 }
 0x47e   : > { %v733_v40 = vpop.xlane.xlu1 %732  ;;  %v748_v9 = vpop.permute.xlu0 %747  ;;  %1391 = vmatprep.subr.mxu0 %v1588_v1  ;;  %v500_v10 = vmul.f32 %v1563_v8, %v1786_v20 }
 0x47f   : > { %1568 = vrcp.f32 %v733_v40 }
 0x480   : > { %1367 = vmatmul.mubr.msk.f32.gmra.mrb[8].mxu0 %vm234_vm3, %v500_v10 }
 0x481   : > { %v1565_v35 = vpop.eup %1564  ;;  %1392 = vmatpush3.msk.msra.mxu0 %vm278_vm5, %v748_v9  ;;  %1369 = vmatprep.mubr.msk.f32.mxu0 %vm1587_vm0, %v1588_v1 }
 0x482   : > { %v736_v11 = vpop.xlane.xlu1 %735  ;;  %v501_v36 = vmul.f32 %v1565_v35, %v1790_v27  ;;  %1457 = vmatprep.subr.bf16.mxu0 %v1586_v0 }
 0x483   : > { %1570 = vrcp.f32 %v736_v11  ;;  %v1146_v11 = vld [vmem:[%s116_s18 + $0x8] sm:$0x1] }
 0x484   : > { %1370 = vmatmul.mubr.msk.f32.gmra.mrb[10].mxu0 %vm234_vm3, %v501_v36 }
 0x485   : > { %v1567_v12 = vpop.eup %1566  ;;  %1393 = vmatprep.mubr.msk.f32.mxu0 %vm1587_vm0, %v1588_v1 }
 0x486   : > { %v740_v13 = vmul.f32 %v1567_v12, %v1794_v32  ;;  %v969_v15 = vpop.xlane.xlu1 %968 }
 0x487   : > { %1572 = vrcp.f32 %v969_v15 }
 0x488   : > { %1394 = vmatmul.mubr.msk.f32.vlgmr.msra.gmra.mrb[12].mxu0 %vm234_vm3, %v740_v13 }
 0x489   : > { %v1569_v14 = vpop.eup %1568  ;;  %1396 = vmatprep.mubr.msk.f32.mxu0 %vm1587_vm0, %v1588_v1 }
 0x48a   : > { %v741_v16 = vmul.f32 %v1569_v14, %v1798_v37 }
 0x48c   : > { %1397 = vmatmul.mubr.msk.f32.gmra.mrb[14].mxu0 %vm234_vm3, %v741_v16 }
 0x48d   : > { %v1571_v0 = vpop.eup %1570  ;;  %1399 = vmatprep.mubr.msk.f32.mxu0 %vm1587_vm0, %v1588_v1 }
 0x48e   : > { %v975_v17 = vpop.xlane.xlu1 %974  ;;  %v742_v4 = vmul.f32 %v1571_v0, %v1802_v42 }
 0x490   : > { %1400 = vmatmul.mubr.msk.f32.gmra.mrb[16].mxu0 %vm234_vm3, %v742_v4 }
 0x491   : > { %1423 = vmatprep.mubr.msk.f32.mxu0 %vm1587_vm0, %v1588_v1  ;;  %v1573_v26 = vpop.eup %1572 }
 0x492   : > { %v1510_v18 = vpop.permute.xlu1 %1509  ;;  %v979_v27 = vmul.f32 %v1573_v26, %v1806_v49 }
 0x493   : > { %v1512_v20 = vunpack.i.h.bf16 %v1510_v18  ;;  %v1511_v22 = vunpack.i.l.bf16 %v1510_v18 }
 0x495   : > { %v1458_v24 = vpack.c.bf16 %v1512_v20, %v1511_v22 }
 0x497   : > { %1459 = vmatpush3.bf16.msra.mxu0 %v1458_v24 }
 0x498   : > { %1421 = vmatprep.subr.mxu0 %v1588_v1 }
 0x4af   : > { %v972_v25 = vpop.xlane.xlu0 %971 }
 0x4b0   : > { %1574 = vrcp.f32 %v972_v25 }
 0x4b1   : > { %1576 = vrcp.f32 %v975_v17 }
 0x4b3   : > { %v987_v28 = vpop.permute.xlu0 %986 }
 0x4b4   : > { %1422 = vmatpush3.msk.msra.mxu0 %vm278_vm5, %v987_v28 }
 0x4b5   : > { %1424 = vmatmul.mubr.msk.f32.vlgmr.msra.gmra.mrb[18].mxu0 %vm234_vm3, %v979_v27 }
 0x4b6   : > { %1426 = vmatprep.mubr.msk.f32.mxu0 %vm1587_vm0, %v1588_v1 }
 0x4ba   : > { %v1575_v29 = vpop.eup %1574 }
 0x4bb   : > { %v980_v30 = vmul.f32 %v1575_v29, %v1822_v58  ;;  %v1577_v31 = vpop.eup %1576 }
 0x4bc   : > { %v981_v32 = vmul.f32 %v1577_v31, %v1813_v53 }
 0x4bd   : > { %1427 = vmatmul.mubr.msk.f32.gmra.mrb[20].mxu0 %vm234_vm3, %v980_v30 }
 0x4be   : > { %1429 = vmatprep.mubr.msk.f32.mxu0 %vm1587_vm0, %v1588_v1 }
 0x4c1   : > { %1430 = vmatmul.mubr.msk.f32.gmra.mrb[22].mxu0 %vm234_vm3, %v981_v32 }
 0x54f   : > { %v589_v33 = vpop.f32.mrb[6].mxu0 }
 0x550   : > { %v1365_v34 = vpop.f32.mrb[7].mxu0 }
 0x553   : > { %v594_v37 = vpop.f32.mrb[8].mxu0 }
 0x554   : > { %1086 = vrot.lane.b32.xlu1 %v594_v37, %s1591_s14  ;;  %v1368_v38 = vpop.f32.mrb[9].mxu0 }
 0x557   : > { %v599_v39 = vpop.f32.mrb[10].mxu0 }
 0x558   : > { %v1513_v41 = vpack.i.bf16 %v589_v33, %v599_v39  ;;  %v1371_v42 = vpop.f32.mrb[11].mxu0 }
 0x55a   : > { %1514 = vrot.lane.b32.xlu0 %v1513_v41, %s1591_s14 }
 0x55b   : > { %v828_v43 = vpop.f32.mrb[12].mxu0 }
 0x55c   : > { %v1395_v44 = vpop.f32.mrb[13].mxu0 }
 0x55f   : > { %v833_v45 = vpop.f32.mrb[14].mxu0 }
 0x560   : > { %1098 = vrot.lane.b32.xlu1 %v833_v45, %s1590_s13  ;;  %v1398_v1 = vpop.f32.mrb[15].mxu0 }
 0x563   : > { %v838_v46 = vpop.f32.mrb[16].mxu0 }
 0x564   : > { %v1518_v47 = vpack.i.bf16 %v828_v43, %v838_v46  ;;  %v1401_v48 = vpop.f32.mrb[17].mxu0 }
 0x566   : > { %1519 = vrot.lane.b32.xlu0 %v1518_v47, %s1590_s13 }
 0x588   : > { %v1067_v49 = vpop.f32.mrb[18].mxu0 }
 0x589   : > { %v1425_v50 = vpop.f32.mrb[19].mxu0 }
 0x590   : > { %v1072_v51 = vpop.f32.mrb[20].mxu0 }
 0x591   : > { %1110 = vrot.lane.b32.xlu1 %v1072_v51, %s1589_s12  ;;  %v1428_v52 = vpop.f32.mrb[21].mxu0 }
 0x594   : > { %v1077_v53 = vpop.f32.mrb[22].mxu0 }
 0x595   : > { %v1523_v54 = vpack.i.bf16 %v1067_v49, %v1077_v53  ;;  %v1431_v55 = vpop.f32.mrb[23].mxu0 }
 0x597   : > { %1524 = vrot.lane.b32.xlu0 %v1523_v54, %s1589_s12 }
 0x5c6   : > { %v1087_v58 = vpop.permute.xlu1 %1086 }
 0x5c7   : > { %v1118_v2 = vsel %vm132_vm1, %v1756_v21, %v1087_v58 }
 0x5cc   : > { %v1515_v56 = vpop.permute.xlu0 %1514 }
 0x5cd   : > { %v1517_v61 = vunpack.i.h.bf16 %v1515_v56  ;;  %v1516_v62 = vunpack.i.l.bf16 %v1515_v56 }
 0x5cf   : > { %v1117_v6 = vsel %vm132_vm1, %v1754_v19, %v1517_v61  ;;  %v1119_v7 = vsel %vm132_vm1, %v1758_v23, %v1516_v62 }
 0x5d2   : > { %v1099_v60 = vpop.permute.xlu1 %1098 }
 0x5d3   : > { %v1122_v9 = vsel %vm1120_vm6, %v1118_v2, %v1099_v60 }
 0x5d8   : > { %v1520_v59 = vpop.permute.xlu0 %1519 }
 0x5d9   : > { %v1522_v57 = vunpack.i.h.bf16 %v1520_v59  ;;  %v1521_v63 = vunpack.i.l.bf16 %v1520_v59 }
 0x5db   : > { %v1121_v10 = vsel %vm1120_vm6, %v1117_v6, %v1522_v57  ;;  %v1123_v35 = vsel %vm1120_vm6, %v1119_v7, %v1521_v63 }
 0x603   : > { %v1111_v3 = vpop.permute.xlu1 %1110 }
 0x604   : > { %v1126_v21 = vsel %vm1124_vm7, %v1122_v9, %v1111_v3 }
 0x609   : > { %v1525_v5 = vpop.permute.xlu0 %1524 }
 0x60a   : > { %v1527_v8 = vunpack.i.h.bf16 %v1525_v5  ;;  %v1526_v40 = vunpack.i.l.bf16 %v1525_v5 }
 0x60c   : > { %v1125_v36 = vsel %vm1124_vm7, %v1121_v10, %v1527_v8  ;;  %v1127_v12 = vsel %vm1124_vm7, %v1123_v35, %v1526_v40 }
 0x60d   : > { %v1262_v13 = vpack.c.bf16 %v1126_v21, %v1125_v36  ;;  %v1258_v14 = vpack.c.bf16 %v1127_v12, %v1127_v12 }
 0x60f   : > { %1263 = vst [vmem:[%s116_s18] sm:$0xff] %v1262_v13   ;;  %v1147_v19 = vsel %vm1145_vm9, %v1258_v14, %v1146_v11 }
 0x610   : > { %1148 = vst [vmem:[%s116_s18 + $0x8] sm:$0x1] %v1147_v19 }
 0x611 PF: > { %s11_s6 = sadd.s32 1, %s1584_s6  }
 0x612   : > { %p8_p4 = scmp.ge.s32.totalorder %s11_s6, 4  }
 0x614   :  { %10 = sbr.rel (!%p8_p4) target bundleno = 1 (0x1), region = 54 }

// kernel: frozen_clip_image_embedder_forward.17
= control target key start
LH: loop header
LB: loop body
LE: loop exit
PB: predicated region body
PF: predicated region fallthrough
CT: control target
= control target key end

     0   :  { %v358_v0 = vmov 0.0   ;;  %vm359_vm0 = vmmov 0   ;;  %s442_s1 = inlined_call_operand.vmem [shape: bf16[128,128], index: 1, kind: input, shape index: {}]   ;;  %s443_s0 = inlined_call_operand.vmem [shape: bf16[34,128], index: 0, kind: input, shape index: {}]   ;;  %s444_s3 = inlined_call_operand.vmem [shape: bf16[34,128], index: 3, kind: input, shape index: {}]   ;;  %s445_s2 = inlined_call_operand.vmem [shape: f32[1,128], index: 2, kind: input, shape index: {}]   ;;  %s446_s4 = inlined_call_operand.vmem [shape: bf16[34,128], index: 4, kind: output, shape index: {}]  }
   0x1   :  { %329 = vmatprep.subr.bf16.mxu1 %v358_v0  ;;  %26 = vst [vmem:[#allocation2 + $0x20] sm:$0x3] %v358_v0  ;;  %v347_v1 = vld [vmem:[%s442_s1] sm:$0xff]   ;;  %301 = vmatprep.subr.bf16.mxu0 %v358_v0  ;;  %v348_v2 = vld [vmem:[%s442_s1 + $0x8] sm:$0xff]   ;;  %v349_v3 = vld [vmem:[%s442_s1 + $0x10] sm:$0xff]  }
   0x2   :  { %321 = vmatprep.mubr.msk.bf16.mxu1 %vm359_vm0, %v358_v0  ;;  %317 = vmatprep.mubr.msk.bf16.mxu0 %vm359_vm0, %v358_v0  ;;  %v350_v4 = vld [vmem:[%s442_s1 + $0x18] sm:$0xff]   ;;  %v351_v5 = vld [vmem:[%s442_s1 + $0x20] sm:$0xff]   ;;  %v352_v6 = vld [vmem:[%s442_s1 + $0x28] sm:$0xff]  }
   0x3   :  { %337 = vmatpush3.bf16.msra.mxu1 %v347_v1  ;;  %302 = vmatpush3.bf16.msra.mxu0 %v347_v1  ;;  %v353_v7 = vld [vmem:[%s442_s1 + $0x30] sm:$0xff]   ;;  %v354_v8 = vld [vmem:[%s442_s1 + $0x38] sm:$0xff]   ;;  %v355_v9 = vld [vmem:[%s443_s0 + $0x8] sm:$0xff]  }
   0x4   :  { %330 = vmatprep.subr.bf16.mxu1 %v358_v0  ;;  %303 = vmatprep.subr.bf16.mxu0 %v358_v0  ;;  %v356_v10 = vld [vmem:[%s443_s0] sm:$0xff]   ;;  %v357_v11 = vld [vmem:[%s443_s0 + $0x10] ss:$0 sps:$4 sm:$0x11]   ;;  %v288_v13 = vld [vmem:[%s444_s3 + $0x8] sm:$0xff]  }
   0x5   :  { %v271_v12 = vld [vmem:[%s444_s3] sm:$0xff]   ;;  %v276_v20 = vunpack.c.l.bf16 %v288_v13  ;;  %v277_v22 = vunpack.c.h.bf16 %v288_v13  ;;  %v207_v43 = vld [vmem:[%s444_s3 + $0x10] sm:$0x1] }
   0x6   :  { %v259_v15 = vld [vmem:[%s445_s2] ss:$0 sm:$0xff]  ;;  %v272_v18 = vunpack.c.l.bf16 %v271_v12  ;;  %v273_v24 = vunpack.c.h.bf16 %v271_v12  ;;  %v212_v44 = vunpack.c.l.bf16 %v207_v43 }
   0x7   :  { %338 = vmatpush3.bf16.msra.mxu1 %v348_v2  ;;  %304 = vmatpush3.bf16.msra.mxu0 %v348_v2 }
   0x8   :  { %331 = vmatprep.subr.bf16.mxu1 %v358_v0  ;;  %305 = vmatprep.subr.bf16.mxu0 %v358_v0  ;;  %v31_v32 = vld [vmem:[#allocation2 + $0x20] sm:$0x3] }
   0xb   :  { %339 = vmatpush3.bf16.msra.mxu1 %v349_v3  ;;  %306 = vmatpush3.bf16.msra.mxu0 %v349_v3 }
   0xc   :  { %332 = vmatprep.subr.bf16.mxu1 %v358_v0  ;;  %307 = vmatprep.subr.bf16.mxu0 %v358_v0 }
   0xf   :  { %340 = vmatpush3.bf16.msra.mxu1 %v350_v4  ;;  %308 = vmatpush3.bf16.msra.mxu0 %v350_v4 }
  0x10   :  { %333 = vmatprep.subr.bf16.mxu1 %v358_v0  ;;  %309 = vmatprep.subr.bf16.mxu0 %v358_v0 }
  0x13   :  { %341 = vmatpush3.bf16.msra.mxu1 %v351_v5  ;;  %310 = vmatpush3.bf16.msra.mxu0 %v351_v5 }
  0x14   :  { %334 = vmatprep.subr.bf16.mxu1 %v358_v0  ;;  %311 = vmatprep.subr.bf16.mxu0 %v358_v0 }
  0x17   :  { %342 = vmatpush3.bf16.msra.mxu1 %v352_v6  ;;  %312 = vmatpush3.bf16.msra.mxu0 %v352_v6 }
  0x18   :  { %335 = vmatprep.subr.bf16.mxu1 %v358_v0  ;;  %313 = vmatprep.subr.bf16.mxu0 %v358_v0 }
  0x1b   :  { %343 = vmatpush3.bf16.msra.mxu1 %v353_v7  ;;  %314 = vmatpush3.bf16.msra.mxu0 %v353_v7 }
  0x1c   :  { %336 = vmatprep.subr.bf16.mxu1 %v358_v0  ;;  %315 = vmatprep.subr.bf16.mxu0 %v358_v0 }
  0x1f   :  { %344 = vmatpush3.bf16.msra.mxu1 %v354_v8  ;;  %316 = vmatpush3.bf16.msra.mxu0 %v354_v8 }
  0x22   :  { %322 = vmatmul.mubr.bf16.vlgmr.msra.gmra.mrb[0].mxu1 %v355_v9  ;;  %318 = vmatmul.mubr.bf16.vlgmr.msra.gmra.mrb[0].mxu0 %v356_v10 }
  0x23   :  { %325 = vmatprep.mubr.msk.bf16.mxu1 %vm359_vm0, %v358_v0 }
  0x2a   :  { %326 = vmatmul.mubr.bf16.gmra.mrb[4].mxu1 %v357_v11 }
  0xf5   :  { %v159_v14 = vpop.f32.mrb[0].mxu1  ;;  %v151_v16 = vpop.f32.mrb[0].mxu0 }
  0xf6   :  { %v323_v17 = vpop.f32.mrb[1].mxu1  ;;  %v319_v19 = vpop.f32.mrb[1].mxu0  ;;  %v200_v25 = vadd.f32 %v259_v15, %v159_v14  ;;  %v198_v26 = vadd.f32 %v259_v15, %v151_v16 }
  0xf7   :  { %v162_v21 = vpop.f32.mrb[2].mxu1  ;;  %v154_v23 = vpop.f32.mrb[2].mxu0 }
  0xf8   :  { %v324_v27 = vpop.f32.mrb[3].mxu1  ;;  %v320_v28 = vpop.f32.mrb[3].mxu0  ;;  %v201_v29 = vadd.f32 %v259_v15, %v162_v21  ;;  %v213_v30 = vadd.f32 %v272_v18, %v198_v26  ;;  %v199_v31 = vadd.f32 %v259_v15, %v154_v23  ;;  %v215_v33 = vadd.f32 %v276_v20, %v200_v25 }
  0xfa   :  { %v216_v34 = vadd.f32 %v277_v22, %v201_v29  ;;  %v214_v35 = vadd.f32 %v273_v24, %v199_v31 }
  0xfc   :  { %v286_v37 = vpack.c.bf16 %v216_v34, %v215_v33  ;;  %v281_v38 = vpack.c.bf16 %v214_v35, %v213_v30 }
  0xfd   :  { %v167_v36 = vpop.f32.mrb[4].mxu1 }
  0xfe   :  { %v177_v39 = vadd.f32 %v167_v36, %v31_v32  ;;  %v327_v40 = vpop.f32.mrb[5].mxu1  ;;  %289 = vst [vmem:[%s446_s4 + $0x8] sm:$0xff] %v286_v37   ;;  %282 = vst [vmem:[%s446_s4] sm:$0xff] %v281_v38  }
  0xff   :  { %v170_v41 = vpop.f32.mrb[6].mxu1 }
 0x100   :  { %182 = vst [vmem:[#allocation2 + $0x20] sm:$0x3] %v177_v39  ;;  %v328_v42 = vpop.f32.mrb[7].mxu1 }
 0x107   :  { %v190_v45 = vld [vmem:[#allocation2 + $0x20] sm:$0x3] }
 0x108   :  { %v202_v46 = vadd.f32 %v259_v15, %v190_v45 }
 0x10a   :  { %v217_v47 = vadd.f32 %v212_v44, %v202_v46 }
 0x10c   :  { %v269_v48 = vpack.c.bf16 %v217_v47, %v217_v47 }
 0x10e   :  { %243 = vst [vmem:[%s446_s4 + $0x10] sm:$0x1] %v269_v48 }

// kernel: frozen_clip_image_embedder_forward.18
= control target key start
LH: loop header
LB: loop body
LE: loop exit
PB: predicated region body
PF: predicated region fallthrough
CT: control target
= control target key end

     0   :  { %s1175_s18 = smov 0   ;;  %s1177_s19 = smov 0   ;;  %s1373_s0 = inlined_call_operand.vmem [shape: bf16[34,128], index: 0, kind: input, shape index: {}]   ;;  %s1374_s1 = inlined_call_operand.vmem [shape: f32[1,128], index: 1, kind: input, shape index: {}]   ;;  %s1375_s2 = inlined_call_operand.vmem [shape: f32[1,128], index: 2, kind: input, shape index: {}]   ;;  %s1376_s3 = inlined_call_operand.vmem [shape: bf16[128,512], index: 3, kind: input, shape index: {}]   ;;  %s1377_s4 = inlined_call_operand.vmem [shape: f32[1,512], index: 4, kind: input, shape index: {}]   ;;  %s1378_s5 = inlined_call_operand.vmem [shape: bf16[34,512], index: 5, kind: output, shape index: {}]  }
   0x1   :  { %s1179_s20 = smov 0   ;;  %s1181_s21 = smov 0  }
   0x2   :  { %s1183_s22 = smov 0  }
   0x3 LB: > { %s24_s23 = sadd.s32 1, %s1138_s21  ;;  %s908_s24 = sadd.s32 4294967295, %s1142_s22   ;;  %s1142_s22 = sphi %s1183_s22, %s15_s22   ;;  %s1138_s21 = sphi %s1181_s21, %s1383_s21   ;;  %s1134_s20 = sphi %s1179_s20, %s1382_s20   ;;  %s1130_s19 = sphi %s1177_s19, %s1381_s19   ;;  %s1126_s18 = sphi %s1175_s18, %s1380_s18  }
   0x4   : > { %p25_p0 = scmp.ge.s32.totalorder %s24_s23, 2  ;;  %p109_p1 = scmp.ne.s32.totalorder %s1130_s19, %s1126_s18 }
   0x5   : > { %p110_p2 = scmp.eq.s32.totalorder %s1142_s22, 0  ;;  %p167_p4 = scmp.eq.s32.totalorder %s908_s24, 1 }
   0x6   : > { %s1385_s23 = smov (%p25_p0, %s24_s23), 0  ;;  %s102_s26 = sadd.s32 1, %s1130_s19 }
   0x7   : > { %p111_p3 = por %p110_p2, %p109_p1  ;;  %s99_s25 = ssub.s32 %s1138_s21, %s1385_s23 }
   0x8   : > { %p100_p5 = scmp.eq.s32.totalorder %s99_s25, 0  ;;  %p1210_p6 = por %p167_p4, %p109_p1 }
   0x9   : > { %p912_p7 = scmp.ge.s32.totalorder %s1142_s22, 2 }
   0xa   : > { %s1215_s28 = scalar_select %p100_p5, %s1130_s19, %s102_s26  }
   0xb   : > { %204 = sbr.rel (%p912_p7) target bundleno = 30 (0x1e), region = 28 }
  0x12   : > { %207 = sbr.rel (!%p111_p3) target bundleno = 30 (0x1e), region = 32  ;;  %s209_s29 = sand.u32 (%p111_p3), 1, %s1130_s19  }
  0x13   : > { %s956_s30 = sshll.u32 (%p111_p3), %s1138_s21, 3  ;;  %s913_s6 = sshll.u32 (%p111_p3), %s209_s29, 7 }
  0x14   : > { %s1223_s9 = scalar_lea.vmem (%p111_p3), %s1376_s3, %s956_s30  ;;  %s211_s10 = scalar_lea.vmem (%p111_p3), [#allocation2], %s913_s6 }
  0x15   : > { %v272_v0 = vld [vmem:[%s1223_s9] sm:$0xff] (%p111_p3)  ;;  %v274_v1 = vld [vmem:[%s1223_s9 + $0x10] sm:$0xff] (%p111_p3) }
  0x16   : > { %v276_v2 = vld [vmem:[%s1223_s9 + $0x20] sm:$0xff] (%p111_p3)  ;;  %273 = vst [vmem:[%s211_s10] sm:$0xff] (%p111_p3), %v272_v0  ;;  %275 = vst [vmem:[%s211_s10 + $0x8] sm:$0xff] (%p111_p3), %v274_v1  ;;  %v278_v3 = vld [vmem:[%s1223_s9 + $0x30] sm:$0xff] (%p111_p3) }
  0x17   : > { %277 = vst [vmem:[%s211_s10 + $0x10] sm:$0xff] (%p111_p3), %v276_v2  ;;  %v280_v4 = vld [vmem:[%s1223_s9 + $0x40] sm:$0xff] (%p111_p3)  ;;  %v282_v5 = vld [vmem:[%s1223_s9 + $0x50] sm:$0xff] (%p111_p3)  ;;  %279 = vst [vmem:[%s211_s10 + $0x18] sm:$0xff] (%p111_p3), %v278_v3 }
  0x18   : > { %281 = vst [vmem:[%s211_s10 + $0x20] sm:$0xff] (%p111_p3), %v280_v4  ;;  %283 = vst [vmem:[%s211_s10 + $0x28] sm:$0xff] (%p111_p3), %v282_v5  ;;  %v284_v6 = vld [vmem:[%s1223_s9 + $0x60] sm:$0xff] (%p111_p3)  ;;  %v286_v7 = vld [vmem:[%s1223_s9 + $0x70] sm:$0xff] (%p111_p3) }
  0x19   : > { %v288_v8 = vld [vmem:[%s1223_s9 + $0x80] sm:$0xff]  ;;  %285 = vst [vmem:[%s211_s10 + $0x30] sm:$0xff] %v284_v6  ;;  %287 = vst [vmem:[%s211_s10 + $0x38] sm:$0xff] %v286_v7  ;;  %v290_v9 = vld [vmem:[%s1223_s9 + $0x90] sm:$0xff] }
  0x1a   : > { %289 = vst [vmem:[%s211_s10 + $0x40] sm:$0xff] %v288_v8  ;;  %v292_v10 = vld [vmem:[%s1223_s9 + $0xa0] sm:$0xff]  ;;  %v294_v11 = vld [vmem:[%s1223_s9 + $0xb0] sm:$0xff]  ;;  %291 = vst [vmem:[%s211_s10 + $0x48] sm:$0xff] %v290_v9 }
  0x1b   : > { %293 = vst [vmem:[%s211_s10 + $0x50] sm:$0xff] %v292_v10  ;;  %295 = vst [vmem:[%s211_s10 + $0x58] sm:$0xff] %v294_v11  ;;  %v296_v12 = vld [vmem:[%s1223_s9 + $0xc0] sm:$0xff]  ;;  %v298_v13 = vld [vmem:[%s1223_s9 + $0xd0] sm:$0xff] }
  0x1c   : > { %v300_v14 = vld [vmem:[%s1223_s9 + $0xe0] sm:$0xff]  ;;  %297 = vst [vmem:[%s211_s10 + $0x60] sm:$0xff] %v296_v12  ;;  %299 = vst [vmem:[%s211_s10 + $0x68] sm:$0xff] %v298_v13  ;;  %v302_v15 = vld [vmem:[%s1223_s9 + $0xf0] sm:$0xff] }
  0x1d   : > { %301 = vst [vmem:[%s211_s10 + $0x70] sm:$0xff] %v300_v14  ;;  %303 = vst [vmem:[%s211_s10 + $0x78] sm:$0xff] %v302_v15 }
  0x1e PF: > { %p916_p8 = scmp.ge.s32.totalorder %s1142_s22, 1  ;;  %p316_p9 = scmp.lt.s32.totalorder %s1142_s22, 3 }
  0x20   : > { %p317_p10 = pnand %p916_p8, %p316_p9 }
  0x21   : > { %v971_v16 = vld [vmem:[%s1373_s0 + $0x8] sm:$0xff] (!%p317_p10)   ;;  %v964_v17 = vld [vmem:[%s1373_s0] sm:$0xff] (!%p317_p10)   ;;  %v377_v20 = vld [vmem:[%s1373_s0 + $0x10] sm:$0x1] (!%p317_p10)  ;;  %vm391_vm0 = vcmask (!%p317_p10), 1041408   ;;  %s323_s17 = sand.u32 (!%p317_p10), 1, %s1126_s18  }
  0x22   : > { %320 = sbr.rel (%p317_p10) target bundleno = 617 (0x269), region = 74  ;;  %v969_v18 = vunpack.c.l.bf16 (!%p317_p10), %v971_v16  ;;  %v965_v19 = vunpack.c.l.bf16 (!%p317_p10), %v964_v17  ;;  %v970_v21 = vunpack.c.h.bf16 (!%p317_p10), %v971_v16  ;;  %v966_v22 = vunpack.c.h.bf16 (!%p317_p10), %v964_v17  ;;  %s917_s24 = sshll.u32 (!%p317_p10), %s323_s17, 7  ;;  %v919_v16 = vld [vmem:[%s1374_s1] ss:$0 sm:$0xff] (!%p317_p10) }
  0x23   : > { %v382_v23 = vunpack.c.l.bf16 (!%p317_p10), %v377_v20  ;;  %s1256_s25 = scalar_lea.vmem (!%p317_p10), [#allocation2], %s917_s24  ;;  %v1144_v59 = vmov (!%p317_p10), 0   ;;  %s918_s7 = sshll.u32 (!%p317_p10), %s1134_s20, 1 }
  0x24   : > { %387 = vadd.xlane.f32.xlu0 (!%p317_p10), %v969_v18  ;;  %383 = vadd.xlane.f32.xlu1 (!%p317_p10), %v965_v19  ;;  %v1030_v25 = vld [vmem:[%s1256_s25 + $0x4] ss:$8 sps:$4 sm:$0xff] (!%p317_p10)   ;;  %v1032_v26 = vld [vmem:[%s1256_s25] ss:$8 sps:$4 sm:$0xff] (!%p317_p10)   ;;  %v1033_v48 = vld [vmem:[%s1256_s25 + $0x14] ss:$8 sps:$4 sm:$0xff] (!%p317_p10)  }
  0x25   : > { %v392_v24 = vsel (!%p317_p10), %vm391_vm0, %v382_v23, 0.0  ;;  %972 = vmatprep.subr.bf16.mxu1 (!%p317_p10), %v1030_v25  ;;  %577 = vmatprep.subr.bf16.mxu0 (!%p317_p10), %v1030_v25  ;;  %v1035_v49 = vld [vmem:[%s1256_s25 + $0x10] ss:$8 sps:$4 sm:$0xff] (!%p317_p10)   ;;  %v1036_v50 = vld [vmem:[%s1256_s25 + $0x24] ss:$8 sps:$4 sm:$0xff] (!%p317_p10)   ;;  %p366_p11 = scmp.lt.s32.totalorder (!%p317_p10), %s918_s7, 3 }
  0x26   : > { %980 = vmatpush1.bf16.msra.mxu1 (!%p317_p10), %v1032_v26  ;;  %578 = vmatpush1.bf16.msra.mxu0 (!%p317_p10), %v1032_v26  ;;  %v1038_v51 = vld [vmem:[%s1256_s25 + $0x20] ss:$8 sps:$4 sm:$0xff] (!%p317_p10)   ;;  %v1039_v52 = vld [vmem:[%s1256_s25 + $0x34] ss:$8 sps:$4 sm:$0xff] (!%p317_p10)   ;;  %v1041_v53 = vld [vmem:[%s1256_s25 + $0x30] ss:$8 sps:$4 sm:$0xff] (!%p317_p10)  }
  0x27   : > { %973 = vmatprep.subr.bf16.mxu1 (!%p317_p10), %v1033_v48  ;;  %579 = vmatprep.subr.bf16.mxu0 (!%p317_p10), %v1033_v48  ;;  %v1042_v54 = vld [vmem:[%s1256_s25 + $0x44] ss:$8 sps:$4 sm:$0xff] (!%p317_p10)   ;;  %v1044_v55 = vld [vmem:[%s1256_s25 + $0x40] ss:$8 sps:$4 sm:$0xff] (!%p317_p10)   ;;  %v1045_v56 = vld [vmem:[%s1256_s25 + $0x54] ss:$8 sps:$4 sm:$0xff] (!%p317_p10)  }
  0x28   : > { %389 = vadd.xlane.f32.xlu0 (!%p317_p10), %v970_v21  ;;  %385 = vadd.xlane.f32.xlu1 (!%p317_p10), %v966_v22  ;;  %v1047_v57 = vld [vmem:[%s1256_s25 + $0x50] ss:$8 sps:$4 sm:$0xff] (!%p317_p10)   ;;  %v1048_v58 = vld [vmem:[%s1256_s25 + $0x64] ss:$8 sps:$4 sm:$0xff] (!%p317_p10)   ;;  %v1050_v60 = vld [vmem:[%s1256_s25 + $0x60] ss:$8 sps:$4 sm:$0xff] (!%p317_p10)  }
  0x29   : > { %619 = vmatprep.mubr.bf16.mxu1 %v1144_v59  ;;  %609 = vmatprep.mubr.bf16.mxu0 %v1144_v59  ;;  %v1051_v61 = vld [vmem:[%s1256_s25 + $0x74] ss:$8 sps:$4 sm:$0xff]   ;;  %v1053_v62 = vld [vmem:[%s1256_s25 + $0x70] ss:$8 sps:$4 sm:$0xff]   ;;  %s1387_s7 = smov (!%p366_p11, %s918_s7), 3  ;;  %s988_s11 = smul.u32 40, %s323_s17 }
  0x2a   : > { %981 = vmatpush1.bf16.msra.mxu1 %v1035_v49  ;;  %580 = vmatpush1.bf16.msra.mxu0 %v1035_v49  ;;  %s368_s10 = scalar_lea.vmem %s1377_s4, %s1387_s7  ;;  %s962_s12 = sshll.u32 (%p1210_p6), %s1134_s20, 3 }
  0x2b   : > { %974 = vmatprep.subr.bf16.mxu1 %v1036_v50  ;;  %581 = vmatprep.subr.bf16.mxu0 %v1036_v50  ;;  %s357_s18 = scalar_lea.vmem [#allocation3], %s988_s11  ;;  %s767_s15 = scalar_lea.vmem (%p1210_p6), %s1378_s5, %s962_s12 }
  0x2c   : > { %393 = vadd.xlane.f32.xlu0 %v392_v24 }
  0x2e   : > { %982 = vmatpush1.bf16.msra.mxu1 %v1038_v51  ;;  %582 = vmatpush1.bf16.msra.mxu0 %v1038_v51 }
  0x2f   : > { %975 = vmatprep.subr.bf16.mxu1 %v1039_v52  ;;  %583 = vmatprep.subr.bf16.mxu0 %v1039_v52 }
  0x32   : > { %983 = vmatpush1.bf16.msra.mxu1 %v1041_v53  ;;  %584 = vmatpush1.bf16.msra.mxu0 %v1041_v53 }
  0x33   : > { %976 = vmatprep.subr.bf16.mxu1 %v1042_v54  ;;  %585 = vmatprep.subr.bf16.mxu0 %v1042_v54 }
  0x36   : > { %984 = vmatpush1.bf16.msra.mxu1 %v1044_v55  ;;  %586 = vmatpush1.bf16.msra.mxu0 %v1044_v55 }
  0x37   : > { %977 = vmatprep.subr.bf16.mxu1 %v1045_v56  ;;  %587 = vmatprep.subr.bf16.mxu0 %v1045_v56 }
  0x3a   : > { %985 = vmatpush1.bf16.msra.mxu1 %v1047_v57  ;;  %588 = vmatpush1.bf16.msra.mxu0 %v1047_v57 }
  0x3b   : > { %978 = vmatprep.subr.bf16.mxu1 %v1048_v58  ;;  %589 = vmatprep.subr.bf16.mxu0 %v1048_v58 }
  0x3e   : > { %986 = vmatpush1.bf16.msra.mxu1 %v1050_v60  ;;  %590 = vmatpush1.bf16.msra.mxu0 %v1050_v60 }
  0x3f   : > { %979 = vmatprep.subr.bf16.mxu1 %v1051_v61  ;;  %591 = vmatprep.subr.bf16.mxu0 %v1051_v61 }
  0x42   : > { %987 = vmatpush1.bf16.msra.mxu1 %v1053_v62  ;;  %592 = vmatpush1.bf16.msra.mxu0 %v1053_v62 }
  0xb1   : > { %v388_v27 = vpop.xlane.xlu0 %387  ;;  %v384_v28 = vpop.xlane.xlu1 %383 }
  0xb2   : > { %v398_v29 = vmul.f32 0.0078125, %v388_v27  ;;  %v396_v30 = vmul.f32 0.0078125, %v384_v28 }
  0xb4   : > { %v1260_v31 = vsub.f32 %v969_v18, %v398_v29  ;;  %v1262_v32 = vsub.f32 %v965_v19, %v396_v30 }
  0xb5   : > { %v390_v33 = vpop.xlane.xlu0 %389  ;;  %v386_v34 = vpop.xlane.xlu1 %385 }
  0xb6   : > { %v399_v35 = vmul.f32 0.0078125, %v390_v33  ;;  %v408_v36 = vmul.f32 %v1260_v31, %v1260_v31  ;;  %v397_v37 = vmul.f32 0.0078125, %v386_v34  ;;  %v406_v40 = vmul.f32 %v1262_v32, %v1262_v32 }
  0xb8   : > { %v1266_v38 = vsub.f32 %v970_v21, %v399_v35  ;;  %415 = vadd.xlane.f32.xlu1 %v408_v36  ;;  %v1268_v39 = vsub.f32 %v966_v22, %v397_v37  ;;  %v920_v21 = vld [vmem:[%s1375_s2] ss:$0 sm:$0xff] }
  0xb9   : > { %v394_v41 = vpop.xlane.xlu0 %393 }
  0xba   : > { %v400_v42 = vmul.f32 0.0078125, %v394_v41  ;;  %v409_v43 = vmul.f32 %v1266_v38, %v1266_v38  ;;  %v407_v45 = vmul.f32 %v1268_v39, %v1268_v39 }
  0xbc   : > { %v1274_v44 = vsub.f32 %v382_v23, %v400_v42  ;;  %417 = vadd.xlane.f32.xlu0 %v409_v43  ;;  %411 = vadd.xlane.f32.xlu1 %v406_v40  ;;  %v487_v40 = vlaneseq  ;;  %v485_v42 = vld [vmem:[%s368_s10] sm:$0x3] }
  0xbe   : > { %v410_v46 = vmul.f32 %v1274_v44, %v1274_v44 }
  0xc0   : > { %413 = vadd.xlane.f32.xlu0 %v407_v45  ;;  %v419_v47 = vsel %vm391_vm0, %v410_v46, 0.0 }
  0xc1   : > { %420 = vadd.xlane.f32.xlu1 %v419_v47 }
 0x145   : > { %v416_v63 = vpop.xlane.xlu1 %415 }
 0x146   : > { %v424_v0 = vmul.f32 0.0078125, %v416_v63 }
 0x148   : > { %v429_v1 = vadd.f32 1e-05, %v424_v0 }
 0x149   : > { %v418_v2 = vpop.xlane.xlu0 %417  ;;  %v412_v3 = vpop.xlane.xlu1 %411 }
 0x14a   : > { %1054 = vrsqrt.f32 %v429_v1  ;;  %v425_v4 = vmul.f32 0.0078125, %v418_v2  ;;  %v422_v5 = vmul.f32 0.0078125, %v412_v3 }
 0x14c   : > { %v430_v6 = vadd.f32 1e-05, %v425_v4  ;;  %v427_v7 = vadd.f32 1e-05, %v422_v5 }
 0x14d   : > { %v414_v8 = vpop.xlane.xlu0 %413 }
 0x14e   : > { %1056 = vrsqrt.f32 %v430_v6  ;;  %v423_v9 = vmul.f32 0.0078125, %v414_v8  ;;  %v421_v10 = vpop.xlane.xlu1 %420 }
 0x14f   : > { %1058 = vrsqrt.f32 %v427_v7  ;;  %v426_v11 = vmul.f32 0.0078125, %v421_v10 }
 0x150   : > { %v428_v12 = vadd.f32 1e-05, %v423_v9 }
 0x151   : > { %v431_v13 = vadd.f32 1e-05, %v426_v11 }
 0x152   : > { %1060 = vrsqrt.f32 %v428_v12 }
 0x153   : > { %1062 = vrsqrt.f32 %v431_v13 }
 0x154   : > { %v1055_v14 = vpop.eup %1054 }
 0x155   : > { %v439_v15 = vmul.f32 %v1055_v14, %v1260_v31 }
 0x157   : > { %v451_v20 = vmul.f32 %v919_v16, %v439_v15 }
 0x158   : > { %v1057_v17 = vpop.eup %1056 }
 0x159   : > { %v1059_v18 = vpop.eup %1058  ;;  %v440_v19 = vmul.f32 %v1057_v17, %v1266_v38  ;;  %v463_v26 = vadd.f32 %v920_v21, %v451_v20 }
 0x15a   : > { %v437_v22 = vmul.f32 %v1059_v18, %v1262_v32 }
 0x15b   : > { %v452_v23 = vmul.f32 %v919_v16, %v440_v19 }
 0x15c   : > { %v1061_v24 = vpop.eup %1060  ;;  %v449_v29 = vmul.f32 %v919_v16, %v437_v22 }
 0x15d   : > { %v1063_v25 = vpop.eup %1062  ;;  %v464_v27 = vadd.f32 %v920_v21, %v452_v23  ;;  %v438_v28 = vmul.f32 %v1061_v24, %v1268_v39  ;;  %v488_v39 = vshrl.u32 %v487_v40, 7 }
 0x15e   : > { %v441_v30 = vmul.f32 %v1063_v25, %v1274_v44  ;;  %v461_v35 = vadd.f32 %v920_v21, %v449_v29 }
 0x15f   : > { %v467_v31 = vpack.c.bf16 %v464_v27, %v463_v26  ;;  %v450_v33 = vmul.f32 %v919_v16, %v438_v28  ;;  %v489_v41 = vsub.s32 0, %v488_v39  ;;  %v493_v43 = vsub.s32 1, %v488_v39 }
 0x160   : > { %v453_v34 = vmul.f32 %v919_v16, %v441_v30 }
 0x161   : > { %620 = vmatmul.mubr.bf16.vlgmr.msra.gmra.mrb[0].mxu1 %v467_v31  ;;  %v462_v36 = vadd.f32 %v920_v21, %v450_v33  ;;  %v490_v44 = vrot.slane %v485_v42, %v489_v41  ;;  %v494_v45 = vrot.slane %v485_v42, %v493_v43 }
 0x162   : > { %629 = vmatprep.mubr.bf16.mxu1 %v1144_v59  ;;  %v465_v32 = vadd.f32 %v920_v21, %v453_v34 }
 0x163   : > { %v466_v37 = vpack.c.bf16 %v462_v36, %v461_v35 }
 0x164   : > { %v468_v38 = vpack.c.bf16 %v465_v32, %v465_v32 }
 0x165   : > { %610 = vmatmul.mubr.bf16.vlgmr.msra.gmra.mrb[0].mxu0 %v466_v37 }
 0x169   : > { %630 = vmatmul.mubr.bf16.gmra.mrb[4].mxu1 %v468_v38 }
 0x234   : > { %v621_v46 = vpop.f32.mrb[0].mxu1 }
 0x235   : > { %v1310_v47 = vadd.f32 %v621_v46, %v490_v44  ;;  %v623_v48 = vpop.f32.mrb[1].mxu1 }
 0x236   : > { %v1312_v49 = vadd.f32 %v623_v48, %v494_v45  ;;  %v625_v50 = vpop.f32.mrb[2].mxu1 }
 0x237   : > { %v941_v51 = vmul.f32 -1.702, %v1310_v47  ;;  %v1315_v52 = vadd.f32 %v625_v50, %v490_v44  ;;  %v627_v53 = vpop.f32.mrb[3].mxu1 }
 0x238   : > { %v942_v54 = vmul.f32 -1.702, %v1312_v49  ;;  %v1318_v55 = vadd.f32 %v627_v53, %v494_v45  ;;  %v611_v56 = vpop.f32.mrb[0].mxu0 }
 0x239   : > { %v666_v57 = vmul.f32 1.442695, %v941_v51  ;;  %v943_v58 = vmul.f32 -1.702, %v1315_v52  ;;  %v1321_v59 = vadd.f32 %v611_v56, %v490_v44  ;;  %v613_v60 = vpop.f32.mrb[1].mxu0 }
 0x23a   : > { %v668_v61 = vmul.f32 1.442695, %v942_v54  ;;  %v944_v62 = vmul.f32 -1.702, %v1318_v55  ;;  %v1324_v63 = vadd.f32 %v613_v60, %v494_v45  ;;  %v615_v0 = vpop.f32.mrb[2].mxu0 }
 0x23b   : > { %1064 = vpow2.f32 %v666_v57  ;;  %v670_v1 = vmul.f32 1.442695, %v943_v58  ;;  %v937_v2 = vmul.f32 -1.702, %v1321_v59  ;;  %v1327_v3 = vadd.f32 %v615_v0, %v490_v44  ;;  %v617_v4 = vpop.f32.mrb[3].mxu0 }
 0x23c   : > { %1066 = vpow2.f32 %v668_v61  ;;  %v672_v5 = vmul.f32 1.442695, %v944_v62  ;;  %v938_v6 = vmul.f32 -1.702, %v1324_v63  ;;  %v1330_v7 = vadd.f32 %v617_v4, %v494_v45  ;;  %v631_v8 = vpop.f32.mrb[4].mxu1 }
 0x23d   : > { %1068 = vpow2.f32 %v670_v1  ;;  %v658_v9 = vmul.f32 1.442695, %v937_v2  ;;  %v939_v10 = vmul.f32 -1.702, %v1327_v3  ;;  %v1333_v11 = vadd.f32 %v631_v8, %v490_v44  ;;  %v633_v12 = vpop.f32.mrb[5].mxu1 }
 0x23e   : > { %1070 = vpow2.f32 %v672_v5  ;;  %v660_v13 = vmul.f32 1.442695, %v938_v6  ;;  %v940_v14 = vmul.f32 -1.702, %v1330_v7  ;;  %v1336_v15 = vadd.f32 %v633_v12, %v494_v45  ;;  %v635_v16 = vpop.f32.mrb[6].mxu1 }
 0x23f   : > { %1072 = vpow2.f32 %v658_v9  ;;  %v662_v17 = vmul.f32 1.442695, %v939_v10  ;;  %v945_v18 = vmul.f32 -1.702, %v1333_v11  ;;  %v636_v19 = vpop.f32.mrb[7].mxu1 }
 0x240   : > { %1074 = vpow2.f32 %v660_v13  ;;  %v664_v20 = vmul.f32 1.442695, %v940_v14  ;;  %v946_v21 = vmul.f32 -1.702, %v1336_v15 }
 0x241   : > { %1076 = vpow2.f32 %v662_v17  ;;  %v674_v22 = vmul.f32 1.442695, %v945_v18 }
 0x242   : > { %1078 = vpow2.f32 %v664_v20  ;;  %v676_v23 = vmul.f32 1.442695, %v946_v21 }
 0x243   : > { %1080 = vpow2.f32 %v674_v22 }
 0x244   : > { %1082 = vpow2.f32 %v676_v23 }
 0x245   : > { %v1065_v24 = vpop.eup %1064 }
 0x246   : > { %v1067_v25 = vpop.eup %1066  ;;  %v682_v26 = vadd.f32 1.0, %v1065_v24 }
 0x247   : > { %v1069_v27 = vpop.eup %1068  ;;  %v683_v28 = vadd.f32 1.0, %v1067_v25 }
 0x248   : > { %v1071_v29 = vpop.eup %1070  ;;  %1084 = vrcp.f32 %v682_v26  ;;  %v684_v30 = vadd.f32 1.0, %v1069_v27 }
 0x249   : > { %v1073_v31 = vpop.eup %1072  ;;  %1086 = vrcp.f32 %v683_v28  ;;  %v685_v33 = vadd.f32 1.0, %v1071_v29 }
 0x24a   : > { %v1075_v34 = vpop.eup %1074  ;;  %1088 = vrcp.f32 %v684_v30  ;;  %v678_v35 = vadd.f32 1.0, %v1073_v31 }
 0x24b   : > { %v1077_v36 = vpop.eup %1076  ;;  %1090 = vrcp.f32 %v685_v33  ;;  %v679_v37 = vadd.f32 1.0, %v1075_v34 }
 0x24c   : > { %v1079_v32 = vpop.eup %1078  ;;  %1092 = vrcp.f32 %v678_v35  ;;  %v680_v38 = vadd.f32 1.0, %v1077_v36 }
 0x24d   : > { %v1081_v40 = vpop.eup %1080  ;;  %1094 = vrcp.f32 %v679_v37  ;;  %v681_v39 = vadd.f32 1.0, %v1079_v32 }
 0x24e   : > { %v1083_v41 = vpop.eup %1082  ;;  %1096 = vrcp.f32 %v680_v38  ;;  %v686_v42 = vadd.f32 1.0, %v1081_v40 }
 0x24f   : > { %1098 = vrcp.f32 %v681_v39  ;;  %v687_v43 = vadd.f32 1.0, %v1083_v41 }
 0x250   : > { %1100 = vrcp.f32 %v686_v42 }
 0x251   : > { %1102 = vrcp.f32 %v687_v43 }
 0x252   : > { %v1085_v44 = vpop.eup %1084 }
 0x253   : > { %v1087_v45 = vpop.eup %1086  ;;  %v712_v46 = vmul.f32 %v1085_v44, %v1310_v47 }
 0x254   : > { %v1089_v48 = vpop.eup %1088  ;;  %v713_v50 = vmul.f32 %v1087_v45, %v1312_v49 }
 0x255   : > { %v1091_v51 = vpop.eup %1090  ;;  %v714_v53 = vmul.f32 %v1089_v48, %v1315_v52 }
 0x256   : > { %v1093_v54 = vpop.eup %1092  ;;  %v959_v56 = vpack.c.bf16 %v713_v50, %v712_v46  ;;  %v715_v57 = vmul.f32 %v1091_v51, %v1318_v55 }
 0x257   : > { %v1095_v58 = vpop.eup %1094  ;;  %v708_v60 = vmul.f32 %v1093_v54, %v1321_v59 }
 0x258   : > { %v1097_v61 = vpop.eup %1096  ;;  %752 = vst [vmem:[%s357_s18 + $0x10] sm:$0xff] %v959_v56  ;;  %v960_v62 = vpack.c.bf16 %v715_v57, %v714_v53  ;;  %v709_v0 = vmul.f32 %v1095_v58, %v1324_v63 }
 0x259   : > { %v1099_v47 = vpop.eup %1098  ;;  %v710_v1 = vmul.f32 %v1097_v61, %v1327_v3 }
 0x25a   : > { %v1101_v49 = vpop.eup %1100  ;;  %753 = vst [vmem:[%s357_s18 + $0x18] sm:$0xff] %v960_v62  ;;  %v957_v2 = vpack.c.bf16 %v709_v0, %v708_v60  ;;  %v711_v52 = vmul.f32 %v1099_v47, %v1330_v7  ;;  %761 = sbr.rel (!%p1210_p6) target bundleno = 617 (0x269), region = 82 }
 0x25b   : > { %v1103_v4 = vpop.eup %1102  ;;  %v716_v55 = vmul.f32 %v1101_v49, %v1333_v11 }
 0x25c   : > { %750 = vst [vmem:[%s357_s18] sm:$0xff] %v957_v2  ;;  %v958_v5 = vpack.c.bf16 %v711_v52, %v710_v1  ;;  %v717_v59 = vmul.f32 %v1103_v4, %v1336_v15 }
 0x25e   : > { %751 = vst [vmem:[%s357_s18 + $0x8] sm:$0xff] %v958_v5  ;;  %v961_v6 = vpack.c.bf16 %v717_v59, %v716_v55 }
 0x25f   : > { %v807_v8 = vld [vmem:[%s357_s18 + $0x10] sm:$0xff] (%p1210_p6) }
 0x260   : > { %754 = vst [vmem:[%s357_s18 + $0x20] sm:$0x11] %v961_v6  ;;  %808 = vst [vmem:[%s767_s15 + $0x20] sm:$0xff] (%p1210_p6), %v807_v8 }
 0x261   : > { %v809_v7 = vld [vmem:[%s357_s18 + $0x18] sm:$0xff] }
 0x262   : > { %810 = vst [vmem:[%s767_s15 + $0x30] sm:$0xff] %v809_v7 }
 0x263   : > { %v803_v63 = vld [vmem:[%s357_s18] sm:$0xff] }
 0x264   : > { %804 = vst [vmem:[%s767_s15] sm:$0xff] %v803_v63 }
 0x265   : > { %v805_v3 = vld [vmem:[%s357_s18 + $0x8] sm:$0xff] }
 0x266   : > { %806 = vst [vmem:[%s767_s15 + $0x10] sm:$0xff] %v805_v3 }
 0x267   : > { %v811_v9 = vld [vmem:[%s357_s18 + $0x20] sm:$0xff] }
 0x268   : > { %812 = vst [vmem:[%s767_s15 + $0x40] sm:$0xff] %v811_v9 }
 0x269 PF: > { %s15_s22 = sadd.s32 1, %s1142_s22   ;;  %s1380_s18 = smov %s1130_s19 }
 0x26a   : > { %p12_p12 = scmp.ge.s32.totalorder %s15_s22, 4   ;;  %s1381_s19 = smov %s1215_s28 }
 0x26b   : > { %s1382_s20 = smov %s1138_s21  ;;  %s1383_s21 = smov %s1385_s23 }
 0x26c   :  { %14 = sbr.rel (!%p12_p12) target bundleno = 3 (0x3), region = 157 }

// kernel: frozen_clip_image_embedder_forward.19
= control target key start
LH: loop header
LB: loop body
LE: loop exit
PB: predicated region body
PF: predicated region fallthrough
CT: control target
= control target key end

     0   :  { %v731_v46 = vmov 0.0   ;;  %s904_s1 = inlined_call_operand.vmem [shape: bf16[512,128], index: 1, kind: input, shape index: {}]   ;;  %s905_s0 = inlined_call_operand.vmem [shape: bf16[34,512], index: 0, kind: input, shape index: {}]   ;;  %s906_s2 = inlined_call_operand.vmem [shape: f32[1,128], index: 2, kind: input, shape index: {}]   ;;  %s907_s3 = inlined_call_operand.vmem [shape: bf16[34,128], index: 3, kind: input, shape index: {}]   ;;  %s908_s4 = inlined_call_operand.vmem [shape: bf16[34,128], index: 4, kind: output, shape index: {}]  }
   0x1   :  { %v683_v0 = vld [vmem:[%s904_s1 + $0x40] sm:$0xff]   ;;  %v687_v4 = vld [vmem:[%s904_s1 + $0x48] sm:$0xff]   ;;  %v691_v8 = vld [vmem:[%s904_s1 + $0x50] sm:$0xff]   ;;  %26 = vst [vmem:[#allocation2 + $0x20] sm:$0x3] %v731_v46 }
   0x2   :  { %v684_v1 = vld [vmem:[%s904_s1 + $0xc0] sm:$0xff]   ;;  %614 = vmatprep.subr.bf16.mxu0 %v683_v0  ;;  %v688_v5 = vld [vmem:[%s904_s1 + $0xc8] sm:$0xff]   ;;  %v692_v9 = vld [vmem:[%s904_s1 + $0xd0] sm:$0xff]  }
   0x3   :  { %v685_v2 = vld [vmem:[%s904_s1] sm:$0xff]   ;;  %648 = vmatprep.subr.bf16.mxu1 %v684_v1  ;;  %v689_v6 = vld [vmem:[%s904_s1 + $0x8] sm:$0xff]   ;;  %v693_v10 = vld [vmem:[%s904_s1 + $0x10] sm:$0xff]  }
   0x4   :  { %v686_v3 = vld [vmem:[%s904_s1 + $0x80] sm:$0xff]   ;;  %615 = vmatpush3.bf16.msra.mxu0 %v685_v2  ;;  %v690_v7 = vld [vmem:[%s904_s1 + $0x88] sm:$0xff]   ;;  %v694_v11 = vld [vmem:[%s904_s1 + $0x90] sm:$0xff]  }
   0x5   :  { %649 = vmatpush3.bf16.msra.mxu1 %v686_v3  ;;  %616 = vmatprep.subr.bf16.mxu0 %v687_v4  ;;  %v695_v12 = vld [vmem:[%s904_s1 + $0x58] sm:$0xff]   ;;  %v699_v16 = vld [vmem:[%s904_s1 + $0x60] sm:$0xff]   ;;  %v703_v20 = vld [vmem:[%s904_s1 + $0x68] sm:$0xff]  }
   0x6   :  { %650 = vmatprep.subr.bf16.mxu1 %v688_v5  ;;  %v696_v13 = vld [vmem:[%s904_s1 + $0xd8] sm:$0xff]   ;;  %v700_v17 = vld [vmem:[%s904_s1 + $0xe0] sm:$0xff]   ;;  %v704_v21 = vld [vmem:[%s904_s1 + $0xe8] sm:$0xff]  }
   0x7   :  { %v697_v14 = vld [vmem:[%s904_s1 + $0x18] sm:$0xff]   ;;  %v701_v18 = vld [vmem:[%s904_s1 + $0x20] sm:$0xff]   ;;  %v705_v22 = vld [vmem:[%s904_s1 + $0x28] sm:$0xff]  }
   0x8   :  { %617 = vmatpush3.bf16.msra.mxu0 %v689_v6  ;;  %v698_v15 = vld [vmem:[%s904_s1 + $0x98] sm:$0xff]   ;;  %v702_v19 = vld [vmem:[%s904_s1 + $0xa0] sm:$0xff]   ;;  %v706_v23 = vld [vmem:[%s904_s1 + $0xa8] sm:$0xff]  }
   0x9   :  { %651 = vmatpush3.bf16.msra.mxu1 %v690_v7  ;;  %618 = vmatprep.subr.bf16.mxu0 %v691_v8  ;;  %v707_v24 = vld [vmem:[%s904_s1 + $0x70] sm:$0xff]   ;;  %v711_v28 = vld [vmem:[%s904_s1 + $0x78] sm:$0xff]   ;;  %v40_v38 = vld [vmem:[%s905_s0 + $0x40] sm:$0x11] }
   0xa   :  { %652 = vmatprep.subr.bf16.mxu1 %v692_v9  ;;  %v708_v25 = vld [vmem:[%s904_s1 + $0xf0] sm:$0xff]   ;;  %v712_v29 = vld [vmem:[%s904_s1 + $0xf8] sm:$0xff]   ;;  %v41_v39 = vld [vmem:[%s905_s0 + $0x48] sm:$0x11]  ;;  %v548_v42 = vcombine.high %v40_v38, %v40_v38  ;;  %v547_v44 = vcombine.low %v40_v38, %v40_v38 }
   0xb   :  { %v709_v26 = vld [vmem:[%s904_s1 + $0x30] sm:$0xff]   ;;  %v713_v30 = vld [vmem:[%s904_s1 + $0x38] sm:$0xff]   ;;  %v550_v43 = vcombine.high %v41_v39, %v41_v39  ;;  %v549_v45 = vcombine.low %v41_v39, %v41_v39  ;;  %v583_v60 = vld [vmem:[%s906_s2] ss:$0 sm:$0xff] }
   0xc   :  { %619 = vmatpush3.bf16.msra.mxu0 %v693_v10  ;;  %v710_v27 = vld [vmem:[%s904_s1 + $0xb0] sm:$0xff]   ;;  %v714_v31 = vld [vmem:[%s904_s1 + $0xb8] sm:$0xff]   ;;  %v595_v61 = vld [vmem:[%s907_s3] sm:$0xff]  }
   0xd   :  { %653 = vmatpush3.bf16.msra.mxu1 %v694_v11  ;;  %620 = vmatprep.subr.bf16.mxu0 %v695_v12  ;;  %v715_v32 = vld [vmem:[%s905_s0] ss:$16 sps:$4 sm:$0xff]   ;;  %v717_v33 = vld [vmem:[%s905_s0 + $0x4] ss:$16 sps:$4 sm:$0xff]   ;;  %v718_v34 = vld [vmem:[%s905_s0 + $0x8] ss:$16 sps:$4 sm:$0xff]   ;;  %v596_v1 = vunpack.c.l.bf16 %v595_v61  ;;  %v597_v2 = vunpack.c.h.bf16 %v595_v61 }
   0xe   :  { %654 = vmatprep.subr.bf16.mxu1 %v696_v13  ;;  %v720_v35 = vld [vmem:[%s905_s0 + $0xc] ss:$16 sps:$4 sm:$0xff]   ;;  %384 = vmatprep.mubr.bf16.mxu0 %v717_v33  ;;  %v721_v36 = vld [vmem:[%s905_s0 + $0x24] ss:$16 sps:$4 sm:$0xff]   ;;  %v725_v40 = vld [vmem:[%s905_s0 + $0x20] ss:$16 sps:$4 sm:$0xff]  }
   0xf   :  { %440 = vmatprep.mubr.bf16.mxu1 %v720_v35  ;;  %v723_v37 = vld [vmem:[%s905_s0 + $0x2c] ss:$16 sps:$4 sm:$0xff]   ;;  %v726_v41 = vld [vmem:[%s905_s0 + $0x28] ss:$16 sps:$4 sm:$0xff]  }
  0x10   :  { %621 = vmatpush3.bf16.msra.mxu0 %v697_v14 }
  0x11   :  { %655 = vmatpush3.bf16.msra.mxu1 %v698_v15  ;;  %622 = vmatprep.subr.bf16.mxu0 %v699_v16 }
  0x12   :  { %656 = vmatprep.subr.bf16.mxu1 %v700_v17 }
  0x14   :  { %623 = vmatpush3.bf16.msra.mxu0 %v701_v18  ;;  %v612_v18 = vld [vmem:[%s907_s3 + $0x8] sm:$0xff]  }
  0x15   :  { %657 = vmatpush3.bf16.msra.mxu1 %v702_v19  ;;  %624 = vmatprep.subr.bf16.mxu0 %v703_v20 }
  0x16   :  { %658 = vmatprep.subr.bf16.mxu1 %v704_v21 }
  0x18   :  { %625 = vmatpush3.bf16.msra.mxu0 %v705_v22 }
  0x19   :  { %659 = vmatpush3.bf16.msra.mxu1 %v706_v23  ;;  %626 = vmatprep.subr.bf16.mxu0 %v707_v24  ;;  %v600_v23 = vunpack.c.l.bf16 %v612_v18  ;;  %v601_v24 = vunpack.c.h.bf16 %v612_v18 }
  0x1a   :  { %660 = vmatprep.subr.bf16.mxu1 %v708_v25 }
  0x1c   :  { %627 = vmatpush3.bf16.msra.mxu0 %v709_v26 }
  0x1d   :  { %661 = vmatpush3.bf16.msra.mxu1 %v710_v27  ;;  %628 = vmatprep.subr.bf16.mxu0 %v711_v28 }
  0x1e   :  { %662 = vmatprep.subr.bf16.mxu1 %v712_v29 }
  0x20   :  { %629 = vmatpush3.bf16.msra.mxu0 %v713_v30 }
  0x21   :  { %663 = vmatpush3.bf16.msra.mxu1 %v714_v31 }
  0x23   :  { %385 = vmatmul.mubr.bf16.vlgmr.msra.gmra.mrb[0].mxu0 %v715_v32 }
  0x24   :  { %441 = vmatmul.mubr.bf16.vlgmr.msra.gmra.mrb[0].mxu1 %v718_v34  ;;  %392 = vmatprep.mubr.bf16.mxu0 %v721_v36  ;;  %v31_v34 = vld [vmem:[#allocation2 + $0x20] sm:$0x3] }
  0x25   :  { %448 = vmatprep.mubr.bf16.mxu1 %v723_v37 }
  0x2b   :  { %393 = vmatmul.mubr.bf16.gmra.mrb[4].mxu0 %v725_v40 }
  0x2c   :  { %449 = vmatmul.mubr.bf16.gmra.mrb[4].mxu1 %v726_v41  ;;  %400 = vmatprep.mubr.bf16.mxu0 %v548_v42  ;;  %v498_v41 = vld [vmem:[%s907_s3 + $0x10] sm:$0x1] }
  0x2d   :  { %456 = vmatprep.mubr.bf16.mxu1 %v550_v43  ;;  %v503_v42 = vunpack.c.l.bf16 %v498_v41 }
  0x33   :  { %401 = vmatmul.mubr.bf16.gmra.mrb[8].mxu0 %v547_v44 }
  0x34   :  { %457 = vmatmul.mubr.bf16.gmra.mrb[8].mxu1 %v549_v45 }
  0xf6   :  { %v630_v47 = vpop.f32.mrb[0].mxu0 }
  0xf7   :  { %v664_v48 = vpop.f32.mrb[0].mxu1  ;;  %v631_v49 = vpop.f32.mrb[1].mxu0 }
  0xf8   :  { %v632_v50 = vadd.f32 %v631_v49, %v630_v47  ;;  %v665_v51 = vpop.f32.mrb[1].mxu1  ;;  %v633_v52 = vpop.f32.mrb[2].mxu0 }
  0xf9   :  { %v666_v53 = vadd.f32 %v665_v51, %v664_v48  ;;  %v667_v54 = vpop.f32.mrb[2].mxu1  ;;  %v634_v55 = vpop.f32.mrb[3].mxu0 }
  0xfa   :  { %v635_v56 = vadd.f32 %v634_v55, %v633_v52  ;;  %v668_v57 = vpop.f32.mrb[3].mxu1 }
  0xfb   :  { %v443_v58 = vadd.f32 %v666_v53, %v632_v50  ;;  %v669_v59 = vadd.f32 %v668_v57, %v667_v54 }
  0xfd   :  { %v446_v62 = vadd.f32 %v669_v59, %v635_v56  ;;  %v489_v0 = vadd.f32 %v583_v60, %v443_v58 }
  0xfe   :  { %v636_v63 = vpop.f32.mrb[4].mxu0 }
  0xff   :  { %v670_v3 = vpop.f32.mrb[4].mxu1  ;;  %v637_v4 = vpop.f32.mrb[5].mxu0  ;;  %v490_v8 = vadd.f32 %v583_v60, %v446_v62  ;;  %v504_v14 = vadd.f32 %v596_v1, %v489_v0 }
 0x100   :  { %v638_v5 = vadd.f32 %v637_v4, %v636_v63  ;;  %v671_v6 = vpop.f32.mrb[5].mxu1  ;;  %v639_v7 = vpop.f32.mrb[6].mxu0 }
 0x101   :  { %v672_v9 = vadd.f32 %v671_v6, %v670_v3  ;;  %v673_v10 = vpop.f32.mrb[6].mxu1  ;;  %v640_v11 = vpop.f32.mrb[7].mxu0  ;;  %v505_v15 = vadd.f32 %v597_v2, %v490_v8 }
 0x102   :  { %v641_v12 = vadd.f32 %v640_v11, %v639_v7  ;;  %v674_v13 = vpop.f32.mrb[7].mxu1 }
 0x103   :  { %v451_v16 = vadd.f32 %v672_v9, %v638_v5  ;;  %v675_v17 = vadd.f32 %v674_v13, %v673_v10  ;;  %v605_v19 = vpack.c.bf16 %v505_v15, %v504_v14 }
 0x105   :  { %v454_v20 = vadd.f32 %v675_v17, %v641_v12  ;;  %606 = vst [vmem:[%s908_s4] sm:$0xff] %v605_v19   ;;  %v491_v22 = vadd.f32 %v583_v60, %v451_v16 }
 0x106   :  { %v642_v21 = vpop.f32.mrb[8].mxu0 }
 0x107   :  { %v676_v25 = vpop.f32.mrb[8].mxu1  ;;  %v643_v26 = vpop.f32.mrb[9].mxu0  ;;  %v492_v30 = vadd.f32 %v583_v60, %v454_v20  ;;  %v506_v36 = vadd.f32 %v600_v23, %v491_v22 }
 0x108   :  { %v644_v27 = vadd.f32 %v643_v26, %v642_v21  ;;  %v677_v28 = vpop.f32.mrb[9].mxu1  ;;  %v645_v29 = vpop.f32.mrb[10].mxu0 }
 0x109   :  { %v678_v31 = vadd.f32 %v677_v28, %v676_v25  ;;  %v679_v32 = vpop.f32.mrb[10].mxu1  ;;  %v646_v33 = vpop.f32.mrb[11].mxu0  ;;  %v507_v37 = vadd.f32 %v601_v24, %v492_v30 }
 0x10a   :  { %v680_v35 = vpop.f32.mrb[11].mxu1 }
 0x10b   :  { %v459_v38 = vadd.f32 %v678_v31, %v644_v27  ;;  %v610_v39 = vpack.c.bf16 %v507_v37, %v506_v36 }
 0x10d   :  { %v468_v40 = vadd.f32 %v459_v38, %v31_v34  ;;  %613 = vst [vmem:[%s908_s4 + $0x8] sm:$0xff] %v610_v39  }
 0x10f   :  { %473 = vst [vmem:[#allocation2 + $0x20] sm:$0x3] %v468_v40 }
 0x116   :  { %v481_v43 = vld [vmem:[#allocation2 + $0x20] sm:$0x3] }
 0x117   :  { %v493_v44 = vadd.f32 %v583_v60, %v481_v43 }
 0x119   :  { %v508_v45 = vadd.f32 %v503_v42, %v493_v44 }
 0x11b   :  { %v593_v46 = vpack.c.bf16 %v508_v45, %v508_v45 }
 0x11d   :  { %534 = vst [vmem:[%s908_s4 + $0x10] sm:$0x1] %v593_v46 }

// kernel: frozen_clip_image_embedder_forward.25
= control target key start
LH: loop header
LB: loop body
LE: loop exit
PB: predicated region body
PF: predicated region fallthrough
CT: control target
= control target key end

     0   :  { %vm24_vm0 = vcmask 1041408   ;;  %s342_s0 = inlined_call_operand.vmem [shape: bf16[2,128], index: 0, kind: input, shape index: {}]   ;;  %s343_s1 = inlined_call_operand.vmem [shape: f32[1,128], index: 1, kind: input, shape index: {}]   ;;  %s344_s2 = inlined_call_operand.vmem [shape: f32[1,128], index: 2, kind: input, shape index: {}]   ;;  %s345_s3 = inlined_call_operand.vmem [shape: bf16[128,128], index: 3, kind: input, shape index: {}]   ;;  %s346_s4 = inlined_call_operand.vmem [shape: f32[1,128], index: 4, kind: input, shape index: {}]   ;;  %s347_s5 = inlined_call_operand.hbm [shape: f32[2,128], index: 5, kind: output, shape index: {}]  }
   0x1   :  { %v22_v0 = vld [vmem:[%s342_s0] sm:$0x1] }
   0x2   :  { %v23_v1 = vunpack.c.l.bf16 %v22_v0 }
   0x4   :  { %v25_v2 = vsel %vm24_vm0, %v23_v1, 0.0 }
   0x5   :  { %26 = vadd.xlane.f32.xlu0 %v25_v2 }
   0x6   :  { %10 = vsyncpa [#allocation3], 0  ;;  %v225_v3 = vld [vmem:[%s345_s3] sm:$0xff]   ;;  %v259_v4 = vmov 0.0   ;;  %v226_v5 = vld [vmem:[%s345_s3 + $0x8] sm:$0xff]   ;;  %vm260_vm1 = vmmov 0  }
   0x7   :  { %202 = vmatprep.subr.bf16.mxu0 %v259_v4  ;;  %v227_v11 = vld [vmem:[%s345_s3 + $0x10] sm:$0xff]   ;;  %v228_v12 = vld [vmem:[%s345_s3 + $0x18] sm:$0xff]   ;;  %v229_v13 = vld [vmem:[%s345_s3 + $0x20] sm:$0xff]   ;;  %218 = vmatprep.mubr.msk.bf16.mxu0 %vm260_vm1, %v259_v4  ;;  %s261_s15 = smov [#allocation2]  }
   0x8   :  { %203 = vmatpush3.bf16.msra.mxu0 %v225_v3  ;;  %v230_v14 = vld [vmem:[%s345_s3 + $0x28] sm:$0xff]   ;;  %v231_v15 = vld [vmem:[%s345_s3 + $0x30] sm:$0xff]   ;;  %v232_v16 = vld [vmem:[%s345_s3 + $0x38] sm:$0xff]   ;;  %s174_s16 = sshll.u32 %s261_s15, 4  ;;  %s175_s16 = int_to_ptr.vmem [resolvable:$true] %s174_s16 }
   0x9   :  { %204 = vmatprep.subr.bf16.mxu0 %v259_v4  ;;  %v182_v21 = vld [vmem:[%s343_s1] ss:$0 sm:$0xff]  ;;  %s235_s1 = scalar_lea.vmem %s175_s16, 32  ;;  %p240_p1 = scmp.lt.s32.totalorder %s175_s16, %s175_s16 }
   0xa   :  { %v183_v23 = vld [vmem:[%s344_s2] ss:$0 sm:$0xff]  ;;  %p236_p0 = scmp.ne.s32.totalorder %s175_s16, %s235_s1  ;;  %p241_p2 = scmp.lt.s32.totalorder %s235_s1, %s235_s1 }
   0xb   :  { %v184_v27 = vld [vmem:[%s346_s4] ss:$0 sm:$0xff] }
   0xc   :  { %205 = vmatpush3.bf16.msra.mxu0 %v226_v5  ;;  %p242_p3 = por %p241_p2, %p240_p1 }
   0xd   :  { %206 = vmatprep.subr.bf16.mxu0 %v259_v4 }
   0xe   :  { %p243_p4 = pnand %p242_p3, %p236_p0 }
  0x10   :  { %207 = vmatpush3.bf16.msra.mxu0 %v227_v11 }
  0x11   :  { %208 = vmatprep.subr.bf16.mxu0 %v259_v4 }
  0x14   :  { %209 = vmatpush3.bf16.msra.mxu0 %v228_v12 }
  0x15   :  { %210 = vmatprep.subr.bf16.mxu0 %v259_v4 }
  0x18   :  { %211 = vmatpush3.bf16.msra.mxu0 %v229_v13 }
  0x19   :  { %212 = vmatprep.subr.bf16.mxu0 %v259_v4 }
  0x1c   :  { %213 = vmatpush3.bf16.msra.mxu0 %v230_v14 }
  0x1d   :  { %214 = vmatprep.subr.bf16.mxu0 %v259_v4 }
  0x20   :  { %215 = vmatpush3.bf16.msra.mxu0 %v231_v15 }
  0x21   :  { %216 = vmatprep.subr.bf16.mxu0 %v259_v4 }
  0x24   :  { %217 = vmatpush3.bf16.msra.mxu0 %v232_v16 }
  0x92   :  { %v27_v6 = vpop.xlane.xlu0 %26 }
  0x93   :  { %v29_v7 = vmul.f32 0.0078125, %v27_v6 }
  0x95   :  { %v30_v8 = vsub.f32 %v23_v1, %v29_v7 }
  0x97   :  { %v31_v9 = vmul.f32 %v30_v8, %v30_v8 }
  0x99   :  { %v32_v10 = vsel %vm24_vm0, %v31_v9, 0.0 }
  0x9a   :  { %33 = vadd.xlane.f32.xlu0 %v32_v10 }
 0x127   :  { %v34_v17 = vpop.xlane.xlu0 %33 }
 0x128   :  { %v35_v18 = vmul.f32 0.0078125, %v34_v17 }
 0x12a   :  { %v36_v19 = vadd.f32 1e-05, %v35_v18 }
 0x12c   :  { %233 = vrsqrt.f32 %v36_v19 }
 0x136   :  { %v234_v20 = vpop.eup %233 }
 0x137   :  { %v38_v22 = vmul.f32 %v234_v20, %v30_v8 }
 0x139   :  { %v46_v24 = vmul.f32 %v182_v21, %v38_v22 }
 0x13b   :  { %v54_v25 = vadd.f32 %v183_v23, %v46_v24 }
 0x13d   :  { %v55_v26 = vpack.c.bf16 %v54_v25, %v54_v25 }
 0x13f   :  { %219 = vmatmul.mubr.bf16.vlgmr.msra.gmra.mrb[0].mxu0 %v55_v26 }
 0x212   :  { %v161_v28 = vpop.f32.mrb[0].mxu0 }
 0x213   :  { %v162_v29 = vadd.f32 %v184_v27, %v161_v28  ;;  %v220_v30 = vpop.f32.mrb[1].mxu0 }
 0x214   :  { %v164_v31 = vpop.f32.mrb[2].mxu0 }
 0x215   :  { %167 = vst [vmem:[#allocation2] sm:$0x3] %v162_v29  ;;  %v221_v32 = vpop.f32.mrb[3].mxu0 }
 0x216   :  { %246 = shalt.err (!%p243_p4)
}
 0x217   :  { %s247_s4 = scalar_lea.hbm %s347_s5, 32 }
 0x218   :  { %p248_p5 = scmp.ne.s32.totalorder %s347_s5, %s247_s4  ;;  %p251_p6 = scmp.lt.u32.totalorder %s247_s4, %s347_s5 }
 0x21a   :  { %p253_p7 = pnand %p251_p6, %p248_p5 }
 0x21c   :  { %256 = shalt.err (!%p253_p7)
}
 0x21d   :  { %177 = dma.vmem_to_hbm [thread:$0]  %s175_s16, 32, %s347_s5, [#allocation3]  }
 0x21e   :  { %257 = dma.done.wait [#allocation3], 32  }
 0x21f   :  { %258 = vsyncadd [#allocation3], 4294967264 }
 0x220   :  { %181 = vsyncpa [#allocation3], 1 }

</bundles_post_ra>
